<compile_context>
chip_gen: v7x
topology: tpu7x:2x2x1
jax: 0.10.0
libtpu: 0.0.40
codegen_flags: <defaults>
</compile_context>

<pallas_src>
import math
import numpy as np

import jax
import jax.numpy as jnp
from jax.experimental import pallas as pl
from jax.experimental.pallas import tpu as pltpu

# ----------------------------- configuration (small) ------------------------
HID = 32                    # hid_size
HEADS = 4                   # num_heads
HEAD_DIM = HID // HEADS     # 8
LAYERS = 2                  # num_layers (small for the demo)
CROSS_DIM = 48              # cross_attention_dim
NUM_PATCHES = (1, 4, 9)     # (l, m, s)
TOTAL = sum(NUM_PATCHES)    # 14
EPS = 1e-5                  # nn.LayerNorm default
FF_DIM = 4 * HID            # 128

# padded / packed layout
H_PAD = 128                          # hidden padded to one full lane width
HEAD_PAD = 32                        # per-head lane slot (8 valid + 24 zero)
C_PAD = 128                          # cross_attention_dim padded to lane width
K_OFF = HEADS * HEAD_PAD             # 128
V_OFF = 2 * HEADS * HEAD_PAD         # 256
QKV_COLS = 3 * HEADS * HEAD_PAD      # 384
NB = 3 * LAYERS                      # total transformer blocks (l + m + s)
SCALE = 1.0 / math.sqrt(HEAD_DIM)
S_MAX = 16                           # tokens per scale, padded (8-aligned rows)

assert HEADS * HEAD_PAD == H_PAD
assert FF_DIM <= H_PAD
assert S_MAX % 8 == 0 and S_MAX >= max(NUM_PATCHES)


# ----------------------------- in-kernel helpers ----------------------------
def _layernorm_padded(x, g, b):
    """LayerNorm over the first HID lanes of a 128-lane-padded activation.

    Padded lanes of x are guaranteed to be exactly zero (weight packing keeps
    them zero), so sum(x)/HID and sum(x*x)/HID give the correct statistics;
    g/b are zero-padded so padded output lanes stay exactly zero.
    """
    mu = jnp.sum(x, axis=-1, keepdims=True) * (1.0 / HID)
    msq = jnp.sum(x * x, axis=-1, keepdims=True) * (1.0 / HID)
    var = msq - mu * mu
    return (x - mu) * jax.lax.rsqrt(var + EPS) * g + b


def _gelu(x):
    # TODO(synk): PyTorch nn.GELU defaults to exact erf-GELU; tanh approximation
    # used here for a guaranteed Mosaic-safe EUP lowering (~1e-3 divergence).
    c = math.sqrt(2.0 / math.pi)
    return 0.5 * x * (1.0 + jnp.tanh(c * (x + 0.044715 * x * x * x)))


# ----------------------------- the fused Pallas kernel ----------------------
def encoder_kernel(x_ref, mask_ref, qkv_w_ref, qkv_b_ref, wo_w_ref,
                   ff1_w_ref, ff2_w_ref, vec_ref, proj_w_ref, fin_ref, out_ref):
    """One grid step == one scale's stack of BasicTransformerBlocks.

    x_ref    : (N, 128)          f32  — this scale's tokens (batch-major, padded rows)
    mask_ref : (HEADS*N, N)      f32  — head-tiled additive mask (batch-block + key pad)
    qkv_w    : (LAYERS, 128, 384) bf16 — fused, head-slotted Q|K|V weights
    qkv_b    : (LAYERS, 1, 384)   f32
    wo_w     : (LAYERS, 128, 128) bf16 — head-slotted attention output proj
    ff1_w    : (LAYERS, 128, 128) bf16
    ff2_w    : (LAYERS, 128, 128) bf16
    vec      : (LAYERS, 8, 128)   f32  — [ln1_g, ln1_b, wo_b, ln3_g, ln3_b, b1, b2, -]
    proj_w   : (128, 128)         bf16 — final proj_out (resident across the grid)
    fin      : (8, 128)           f32  — [final_ln_g, final_ln_b, proj_b, ...]
    out_ref  : (N, 128)           f32
    """
    n = x_ref.shape[0]                       # B * S_MAX, multiple of 8
    x = x_ref[...]                           # (n, 128) f32
    bias = mask_ref[...]                     # (4n, n)  f32

    # per-head lane masks for the 32-lane head slots (built once, VPU-cheap)
    lane = jax.lax.broadcasted_iota(jnp.int32, (1, H_PAD), 1)
    head_mask = [((lane >= h * HEAD_PAD) & (lane < (h + 1) * HEAD_PAD))
                 .astype(jnp.float32) for h in range(HEADS)]

    fin_g = fin_ref[0:1, :]
    fin_b = fin_ref[1:2, :]
    proj_b = fin_ref[2:3, :]

    for layer in range(LAYERS):
        ln1_g = vec_ref[layer, 0:1, :]
        ln1_b = vec_ref[layer, 1:2, :]
        wo_b = vec_ref[layer, 2:3, :]
        ln3_g = vec_ref[layer, 3:4, :]
        ln3_b = vec_ref[layer, 4:5, :]
        ff1_b = vec_ref[layer, 5:6, :]
        ff2_b = vec_ref[layer, 6:7, :]

        # --- self-attention branch ---
        h = _layernorm_padded(x, ln1_g, ln1_b)
        qkv = jnp.dot(h.astype(jnp.bfloat16), qkv_w_ref[layer],
                      preferred_element_type=jnp.float32) + qkv_b_ref[layer]  # (n,384)
        q = qkv[:, 0:K_OFF]                                                   # (n,128)
        k = qkv[:, K_OFF:V_OFF].astype(jnp.bfloat16)                          # (n,128)
        v = qkv[:, V_OFF:QKV_COLS].astype(jnp.bfloat16)                       # (n,128)

        # block-diagonal Q: head h occupies rows [h*n,(h+1)*n) and its 32-lane slot.
        # 8-aligned sublane concat (n % 8 == 0) -> no retiling copies.
        q_bd = jnp.concatenate([q * head_mask[hh] for hh in range(HEADS)],
                               axis=0).astype(jnp.bfloat16)                   # (4n,128)

        # all-head scores in ONE MXU launch; rows of block h = head-h scores.
        # TODO(synk): q.k runs in bf16 (f32 accumulate); keep f32 operands if
        # tighter parity with the torch module is ever required.
        sc = jax.lax.dot_general(q_bd, k, (((1,), (1,)), ((), ())),
                                 preferred_element_type=jnp.float32)          # (4n,n)
        sc = sc * SCALE + bias
        sc = sc - jnp.max(sc, axis=-1, keepdims=True)
        e = jnp.exp(sc)
        p = e * pl.reciprocal(jnp.sum(e, axis=-1, keepdims=True), approx=True)

        # all-head context in ONE MXU launch; extract head h's lane slot from row
        # block h (aligned sublane slices + lane masks; V's pad lanes are zero).
        o_parts = jnp.dot(p.astype(jnp.bfloat16), v,
                          preferred_element_type=jnp.float32)                 # (4n,128)
        o_big = o_parts[0:n] * head_mask[0]
        for hh in range(1, HEADS):
            o_big = o_big + o_parts[hh * n:(hh + 1) * n] * head_mask[hh]      # (n,128)

        attn = jnp.dot(o_big.astype(jnp.bfloat16), wo_w_ref[layer],
                       preferred_element_type=jnp.float32) + wo_b
        x = x + attn

        # --- feed-forward branch (Linear -> GELU -> Linear) ---
        h2 = _layernorm_padded(x, ln3_g, ln3_b)
        f = jnp.dot(h2.astype(jnp.bfloat16), ff1_w_ref[layer],
                    preferred_element_type=jnp.float32) + ff1_b
        f = _gelu(f)
        f = jnp.dot(f.astype(jnp.bfloat16), ff2_w_ref[layer],
                    preferred_element_type=jnp.float32) + ff2_b
        x = x + f

    # ---- final LayerNorm + proj_out; one full-block, lane-dense aligned store ----
    y = _layernorm_padded(x, fin_g, fin_b)
    out_ref[...] = jnp.dot(y.astype(jnp.bfloat16), proj_w_ref[...],
                           preferred_element_type=jnp.float32) + proj_b


# ----------------------------- host-side mask --------------------------------
def _build_mask(batch):
    """(3, HEADS*N, N) additive mask: 0 for same-batch & valid key, -1e30 else."""
    n = batch * S_MAX
    idx = np.arange(n)
    same = (idx[:, None] // S_MAX) == (idx[None, :] // S_MAX)
    masks = []
    for s in NUM_PATCHES:
        k_valid = (idx[None, :] % S_MAX) < s
        base = np.where(same & k_valid, 0.0, -1e30).astype(np.float32)   # (n, n)
        masks.append(np.tile(base, (HEADS, 1)))                          # (4n, n)
    return np.stack(masks, axis=0)


# ----------------------------- pallas_call wrapper ---------------------------
@jax.jit
def _forward_impl(clip_features, packed):
    B = clip_features.shape[0]
    n = B * S_MAX

    # pos-emb add + per-scale gather / batch packing done as XLA layout plumbing
    latent = clip_features.astype(jnp.float32) + packed["pos"][None]     # (B,TOTAL,HID)
    xs = []
    off = 0
    for S in NUM_PATCHES:
        piece = latent[:, off:off + S, :]                                # (B,S,HID)
        piece = jnp.pad(piece, ((0, 0), (0, S_MAX - S), (0, H_PAD - HID)))
        xs.append(piece.reshape(B * S_MAX, H_PAD))
        off += S
    x_in = jnp.stack(xs, axis=0)                                         # (3,n,128)

    mask = jnp.asarray(_build_mask(B))                                   # (3,4n,n)

    out = pl.pallas_call(
        encoder_kernel,
        out_shape=jax.ShapeDtypeStruct((3, n, C_PAD), jnp.float32),
        grid=(3,),
        in_specs=[
            pl.BlockSpec((None, n, H_PAD), lambda s: (s, 0, 0)),               # x
            pl.BlockSpec((None, HEADS * n, n), lambda s: (s, 0, 0)),           # mask
            pl.BlockSpec((LAYERS, H_PAD, QKV_COLS), lambda s: (s, 0, 0)),      # qkv_w
            pl.BlockSpec((LAYERS, 1, QKV_COLS), lambda s: (s, 0, 0)),          # qkv_b
            pl.BlockSpec((LAYERS, HEADS * HEAD_PAD, H_PAD), lambda s: (s, 0, 0)),  # wo_w
            pl.BlockSpec((LAYERS, H_PAD, FF_DIM), lambda s: (s, 0, 0)),        # ff1_w
            pl.BlockSpec((LAYERS, FF_DIM, H_PAD), lambda s: (s, 0, 0)),        # ff2_w
            pl.BlockSpec((LAYERS, 8, H_PAD), lambda s: (s, 0, 0)),             # vec
            pl.BlockSpec((H_PAD, C_PAD), lambda s: (0, 0)),                    # proj_w
            pl.BlockSpec((8, C_PAD), lambda s: (0, 0)),                        # fin
        ],
        out_specs=pl.BlockSpec((None, n, C_PAD), lambda s: (s, 0, 0)),
        compiler_params=pltpu.CompilerParams(
            dimension_semantics=("parallel",)),     # v7x: scales split across 2 TCs
    )(x_in, mask, packed["qkv_w"], packed["qkv_b"], packed["wo_w"],
      packed["ff1_w"], packed["ff2_w"], packed["vec"], packed["proj_w"],
      packed["fin"])

    # unpack (3, n, 128) -> (B, TOTAL, CROSS_DIM) in the wrapper
    pieces = []
    for s_idx, S in enumerate(NUM_PATCHES):
        pieces.append(out[s_idx].reshape(B, S_MAX, C_PAD)[:, :S, :CROSS_DIM])
    return jnp.concatenate(pieces, axis=1)


def condition_patch_encoder_forward(clip_features, params,
                                    return_uncond_vector=False):
    out = _forward_impl(clip_features, params["packed"])
    if return_uncond_vector:
        return out, params["uncond_vector"]
    return out


# ----------------------------- parameters / packing --------------------------
def positional_encoding_2d(channels, height, width):
    pe = np.zeros((channels, height, width), dtype=np.float32)
    d = int(channels / 2)
    freq = 1.0 / 10000.0 ** (np.arange(0.0, d, 2) / d)
    x = np.arange(0.0, width)[:, None]
    y = np.arange(0.0, height)[:, None]
    pe[0:d:2] = np.sin(x * freq).T[:, None, :]
    pe[1:d:2] = np.cos(x * freq).T[:, None, :]
    pe[d::2] = np.sin(y * freq).T[:, :, None]
    pe[d + 1::2] = np.cos(y * freq).T[:, :, None]
    return pe


def build_pos_emb(hid_size, num_patches):
    pieces = []
    for i in num_patches:
        s = int(math.sqrt(i))
        pieces.append(positional_encoding_2d(hid_size, s, s).reshape(1, i, hid_size))
    return jnp.asarray(np.concatenate(pieces, axis=1))        # (1, TOTAL, HID)


def init_linear(key, din, dout, scale=0.02):
    kw, kb = jax.random.split(key)
    w = jax.random.normal(kw, (din, dout), jnp.float32) * scale
    b = jax.random.normal(kb, (dout,), jnp.float32) * scale
    return w, b


def init_block_raw(key):
    ks = jax.random.split(key, 6)
    d = {"ln1_g": jnp.ones((HID,), jnp.float32),
         "ln1_b": jnp.zeros((HID,), jnp.float32),
         "ln3_g": jnp.ones((HID,), jnp.float32),
         "ln3_b": jnp.zeros((HID,), jnp.float32)}
    d["wq"], d["bq"] = init_linear(ks[0], HID, HID)
    d["wk"], d["bk"] = init_linear(ks[1], HID, HID)
    d["wv"], d["bv"] = init_linear(ks[2], HID, HID)
    d["wo"], d["bo"] = init_linear(ks[3], HID, HID)
    d["w1"], d["b1"] = init_linear(ks[4], HID, FF_DIM)
    d["w2"], d["b2"] = init_linear(ks[5], FF_DIM, HID)
    return d


def pack_params(raw):
    """Pack raw per-block f32 weights into stacked, 32-lane-head-slotted arrays."""
    qkv_w = np.zeros((NB, H_PAD, QKV_COLS), np.float32)
    qkv_b = np.zeros((NB, 1, QKV_COLS), np.float32)
    wo_w = np.zeros((NB, HEADS * HEAD_PAD, H_PAD), np.float32)
    ff1_w = np.zeros((NB, H_PAD, FF_DIM), np.float32)
    ff2_w = np.zeros((NB, FF_DIM, H_PAD), np.float32)
    vec = np.zeros((NB, 8, H_PAD), np.float32)

    blocks = raw["l_layers"] + raw["m_layers"] + raw["s_layers"]
    for i, blk in enumerate(blocks):
        for j, nm in enumerate(("q", "k", "v")):
            w = np.asarray(blk[f"w{nm}"])
            b = np.asarray(blk[f"b{nm}"])
            for h in range(HEADS):
                c0 = j * HEADS * HEAD_PAD + h * HEAD_PAD
                qkv_w[i, :HID, c0:c0 + HEAD_DIM] = w[:, h * HEAD_DIM:(h + 1) * HEAD_DIM]
                qkv_b[i, 0, c0:c0 + HEAD_DIM] = b[h * HEAD_DIM:(h + 1) * HEAD_DIM]
        wo = np.asarray(blk["wo"])
        for h in range(HEADS):
            wo_w[i, h * HEAD_PAD:h * HEAD_PAD + HEAD_DIM, :HID] = \
                wo[h * HEAD_DIM:(h + 1) * HEAD_DIM, :]
        ff1_w[i, :HID, :] = np.asarray(blk["w1"])
        ff2_w[i, :, :HID] = np.asarray(blk["w2"])
        vec[i, 0, :HID] = np.asarray(blk["ln1_g"])
        vec[i, 1, :HID] = np.asarray(blk["ln1_b"])
        vec[i, 2, :HID] = np.asarray(blk["bo"])
        vec[i, 3, :HID] = np.asarray(blk["ln3_g"])
        vec[i, 4, :HID] = np.asarray(blk["ln3_b"])
        vec[i, 5, :FF_DIM] = np.asarray(blk["b1"])
        vec[i, 6, :HID] = np.asarray(blk["b2"])

    proj_w = np.zeros((H_PAD, C_PAD), np.float32)
    proj_w[:HID, :CROSS_DIM] = np.asarray(raw["proj_w"])
    fin = np.zeros((8, C_PAD), np.float32)
    fin[0, :HID] = np.asarray(raw["final_g"])
    fin[1, :HID] = np.asarray(raw["final_b"])
    fin[2, :CROSS_DIM] = np.asarray(raw["proj_b"])

    # --- packing-time invariants the kernel relies on (zero padding) ---
    assert not np.any(qkv_w[:, HID:, :]) and not np.any(ff1_w[:, HID:, :])
    assert not np.any(wo_w[:, :, HID:]) and not np.any(ff2_w[:, :, HID:])
    assert not np.any(proj_w[HID:, :]) and not np.any(vec[:, :, FF_DIM:])
    for h in range(HEADS):
        for j in range(3):
            c0 = j * HEADS * HEAD_PAD + h * HEAD_PAD
            assert not np.any(qkv_w[:, :, c0 + HEAD_DIM:c0 + HEAD_PAD])
            assert not np.any(qkv_b[:, :, c0 + HEAD_DIM:c0 + HEAD_PAD])

    return dict(
        pos=jnp.asarray(np.asarray(raw["pos_emb"])[0]),       # (TOTAL, HID) f32
        qkv_w=jnp.asarray(qkv_w, jnp.bfloat16),
        qkv_b=jnp.asarray(qkv_b),
        wo_w=jnp.asarray(wo_w, jnp.bfloat16),
        ff1_w=jnp.asarray(ff1_w, jnp.bfloat16),
        ff2_w=jnp.asarray(ff2_w, jnp.bfloat16),
        vec=jnp.asarray(vec),
        proj_w=jnp.asarray(proj_w, jnp.bfloat16),
        fin=jnp.asarray(fin),
    )


def init_params(key):
    keys = jax.random.split(key, 3 * LAYERS + 2)
    raw = {"pos_emb": build_pos_emb(HID, NUM_PATCHES)}
    idx = 0
    for name in ("l", "m", "s"):
        raw[f"{name}_layers"] = []
        for _ in range(LAYERS):
            raw[f"{name}_layers"].append(init_block_raw(keys[idx]))
            idx += 1
    raw["final_g"] = jnp.ones((HID,), jnp.float32)
    raw["final_b"] = jnp.zeros((HID,), jnp.float32)
    raw["proj_w"], raw["proj_b"] = init_linear(keys[idx], HID, CROSS_DIM)
    uncond = jax.random.normal(keys[idx + 1], (1, TOTAL, CROSS_DIM), jnp.float32)
    return {"raw": raw, "packed": pack_params(raw), "uncond_vector": uncond}


# ----------------------------- pure-JAX reference (f32) ----------------------
def _ref_layernorm(x, g, b):
    mu = jnp.mean(x, axis=-1, keepdims=True)
    var = jnp.mean((x - mu) ** 2, axis=-1, keepdims=True)
    return (x - mu) * jax.lax.rsqrt(var + EPS) * g + b


def _ref_block(x, p):
    B, S, _ = x.shape
    h = _ref_layernorm(x, p["ln1_g"], p["ln1_b"])
    q = h @ p["wq"] + p["bq"]
    k = h @ p["wk"] + p["bk"]
    v = h @ p["wv"] + p["bv"]

    def split(t):
        return t.reshape(B, S, HEADS, HEAD_DIM).transpose(0, 2, 1, 3)

    qh, kh, vh = split(q), split(k), split(v)
    sc = jnp.einsum("bhqd,bhkd->bhqk", qh, kh) * SCALE
    pa = jax.nn.softmax(sc, axis=-1)
    ctx = jnp.einsum("bhqk,bhkd->bhqd", pa, vh).transpose(0, 2, 1, 3).reshape(B, S, HID)
    x = x + (ctx @ p["wo"] + p["bo"])
    h2 = _ref_layernorm(x, p["ln3_g"], p["ln3_b"])
    f = _gelu(h2 @ p["w1"] + p["b1"])
    return x + (f @ p["w2"] + p["b2"])


def reference_forward(clip_features, raw):
    latent = clip_features + raw["pos_emb"]
    l, m, _ = NUM_PATCHES
    secs = [latent[:, :l], latent[:, l:l + m], latent[:, l + m:]]
    stacks = [raw["l_layers"], raw["m_layers"], raw["s_layers"]]
    outs = []
    for x, layers in zip(secs, stacks):
        for blk in layers:
            x = _ref_block(x, blk)
        outs.append(x)
    latent = jnp.concatenate(outs, axis=1)
    h = _ref_layernorm(latent, raw["final_g"], raw["final_b"])
    return h @ raw["proj_w"] + raw["proj_b"]


# ----------------------------- demo -----------------------------------------
if __name__ == "__main__":
    root = jax.random.PRNGKey(0)
    k_params, k_x = jax.random.split(root)

    params = init_params(k_params)

    bsz = 2
    # synthetic CLIP features for bsz images x TOTAL patches
    clip_features = jax.random.normal(k_x, (bsz, TOTAL, HID), jnp.float32)

    out, uncond = condition_patch_encoder_forward(
        clip_features, params, return_uncond_vector=True)
    out = jax.block_until_ready(out)
    uncond = jax.block_until_ready(uncond)

    assert out.shape == (bsz, TOTAL, CROSS_DIM), out.shape
    assert uncond.shape == (1, TOTAL, CROSS_DIM), uncond.shape
    assert bool(jnp.all(jnp.isfinite(out)))

    # numerical check against a pure-JAX f32 reference (bf16-matmul tolerance)
    ref = jax.block_until_ready(reference_forward(clip_features, params["raw"]))
    np.testing.assert_allclose(np.asarray(out), np.asarray(ref),
                               rtol=2e-2, atol=2e-2)

    print("KERNEL_OK")
</pallas_src>

<mosaic_0001>
module attributes {stable_mosaic.version = 11 : i64} {
  func.func @encoder_kernel(%arg0: i32, %arg1: memref<1x32x128xf32, #tpu.memory_space<vmem>>, %arg2: memref<1x128x32xf32, #tpu.memory_space<vmem>>, %arg3: memref<2x128x384xbf16, #tpu.memory_space<vmem>>, %arg4: memref<2x1x384xf32, #tpu.memory_space<vmem>>, %arg5: memref<2x128x128xbf16, #tpu.memory_space<vmem>>, %arg6: memref<2x128x128xbf16, #tpu.memory_space<vmem>>, %arg7: memref<2x128x128xbf16, #tpu.memory_space<vmem>>, %arg8: memref<2x8x128xf32, #tpu.memory_space<vmem>>, %arg9: memref<128x128xbf16, #tpu.memory_space<vmem>>, %arg10: memref<8x128xf32, #tpu.memory_space<vmem>>, %arg11: memref<1x32x128xf32, #tpu.memory_space<vmem>>) attributes {dimension_semantics = [#tpu.dimension_semantics<parallel>], iteration_bounds = array<i64: 3>, scalar_prefetch = 0 : i64, scratch_operands = 0 : i64, tpu.core_type = #tpu.core_type<tc>, window_params = [{transform_indices = @transform_0, window_bounds = array<i64: 1, 32, 128>}, {transform_indices = @transform_1, window_bounds = array<i64: 1, 128, 32>}, {transform_indices = @transform_2, window_bounds = array<i64: 2, 128, 384>}, {transform_indices = @transform_3, window_bounds = array<i64: 2, 1, 384>}, {transform_indices = @transform_4, window_bounds = array<i64: 2, 128, 128>}, {transform_indices = @transform_5, window_bounds = array<i64: 2, 128, 128>}, {transform_indices = @transform_6, window_bounds = array<i64: 2, 128, 128>}, {transform_indices = @transform_7, window_bounds = array<i64: 2, 8, 128>}, {pipeline_mode = #tpu.pipeline_mode<synchronous>, transform_indices = @transform_8, window_bounds = array<i64: 128, 128>}, {pipeline_mode = #tpu.pipeline_mode<synchronous>, transform_indices = @transform_9, window_bounds = array<i64: 8, 128>}, {transform_indices = @transform_10, window_bounds = array<i64: 1, 32, 128>}]} {
    %c0 = arith.constant 0 : index
    %c0_0 = arith.constant 0 : index
    %c0_1 = arith.constant 0 : index
    %0 = vector.load %arg1[%c0, %c0_0, %c0_1] : memref<1x32x128xf32, #tpu.memory_space<vmem>>, vector<1x32x128xf32>
    %1 = vector.shape_cast %0 : vector<1x32x128xf32> to vector<32x128xf32>
    %c0_2 = arith.constant 0 : index
    %c0_3 = arith.constant 0 : index
    %c0_4 = arith.constant 0 : index
    %2 = vector.load %arg2[%c0_2, %c0_3, %c0_4] : memref<1x128x32xf32, #tpu.memory_space<vmem>>, vector<1x128x32xf32>
    %3 = vector.shape_cast %2 : vector<1x128x32xf32> to vector<128x32xf32>
    %4 = tpu.iota {dimensions = array<i32: 1>} : vector<1x128xi32>
    %c0_i32 = arith.constant 0 : i32
    %5 = vector.broadcast %c0_i32 : i32 to vector<1x128xi32>
    %6 = arith.cmpi sge, %4, %5 : vector<1x128xi32>
    %c32_i32 = arith.constant 32 : i32
    %7 = vector.broadcast %c32_i32 : i32 to vector<1x128xi32>
    %8 = arith.cmpi slt, %4, %7 : vector<1x128xi32>
    %9 = arith.andi %6, %8 : vector<1x128xi1>
    %10 = arith.extui %9 : vector<1x128xi1> to vector<1x128xi32>
    %11 = arith.sitofp %10 : vector<1x128xi32> to vector<1x128xf32>
    %c32_i32_5 = arith.constant 32 : i32
    %12 = vector.broadcast %c32_i32_5 : i32 to vector<1x128xi32>
    %13 = arith.cmpi sge, %4, %12 : vector<1x128xi32>
    %c64_i32 = arith.constant 64 : i32
    %14 = vector.broadcast %c64_i32 : i32 to vector<1x128xi32>
    %15 = arith.cmpi slt, %4, %14 : vector<1x128xi32>
    %16 = arith.andi %13, %15 : vector<1x128xi1>
    %17 = arith.extui %16 : vector<1x128xi1> to vector<1x128xi32>
    %18 = arith.sitofp %17 : vector<1x128xi32> to vector<1x128xf32>
    %c64_i32_6 = arith.constant 64 : i32
    %19 = vector.broadcast %c64_i32_6 : i32 to vector<1x128xi32>
    %20 = arith.cmpi sge, %4, %19 : vector<1x128xi32>
    %c96_i32 = arith.constant 96 : i32
    %21 = vector.broadcast %c96_i32 : i32 to vector<1x128xi32>
    %22 = arith.cmpi slt, %4, %21 : vector<1x128xi32>
    %23 = arith.andi %20, %22 : vector<1x128xi1>
    %24 = arith.extui %23 : vector<1x128xi1> to vector<1x128xi32>
    %25 = arith.sitofp %24 : vector<1x128xi32> to vector<1x128xf32>
    %c96_i32_7 = arith.constant 96 : i32
    %26 = vector.broadcast %c96_i32_7 : i32 to vector<1x128xi32>
    %27 = arith.cmpi sge, %4, %26 : vector<1x128xi32>
    %c128_i32 = arith.constant 128 : i32
    %28 = vector.broadcast %c128_i32 : i32 to vector<1x128xi32>
    %29 = arith.cmpi slt, %4, %28 : vector<1x128xi32>
    %30 = arith.andi %27, %29 : vector<1x128xi1>
    %31 = arith.extui %30 : vector<1x128xi1> to vector<1x128xi32>
    %32 = arith.sitofp %31 : vector<1x128xi32> to vector<1x128xf32>
    %c0_8 = arith.constant 0 : index
    %c0_9 = arith.constant 0 : index
    %33 = vector.load %arg10[%c0_8, %c0_9] : memref<8x128xf32, #tpu.memory_space<vmem>>, vector<1x128xf32>
    %c1 = arith.constant 1 : index
    %c0_10 = arith.constant 0 : index
    %34 = vector.load %arg10[%c1, %c0_10] : memref<8x128xf32, #tpu.memory_space<vmem>>, vector<1x128xf32>
    %c2 = arith.constant 2 : index
    %c0_11 = arith.constant 0 : index
    %35 = vector.load %arg10[%c2, %c0_11] : memref<8x128xf32, #tpu.memory_space<vmem>>, vector<1x128xf32>
    %c0_12 = arith.constant 0 : index
    %c0_13 = arith.constant 0 : index
    %c0_14 = arith.constant 0 : index
    %36 = vector.load %arg8[%c0_12, %c0_13, %c0_14] : memref<2x8x128xf32, #tpu.memory_space<vmem>>, vector<1x1x128xf32>
    %37 = vector.shape_cast %36 : vector<1x1x128xf32> to vector<1x128xf32>
    %c0_15 = arith.constant 0 : index
    %c1_16 = arith.constant 1 : index
    %c0_17 = arith.constant 0 : index
    %38 = vector.load %arg8[%c0_15, %c1_16, %c0_17] : memref<2x8x128xf32, #tpu.memory_space<vmem>>, vector<1x1x128xf32>
    %39 = vector.shape_cast %38 : vector<1x1x128xf32> to vector<1x128xf32>
    %c0_18 = arith.constant 0 : index
    %c2_19 = arith.constant 2 : index
    %c0_20 = arith.constant 0 : index
    %40 = vector.load %arg8[%c0_18, %c2_19, %c0_20] : memref<2x8x128xf32, #tpu.memory_space<vmem>>, vector<1x1x128xf32>
    %41 = vector.shape_cast %40 : vector<1x1x128xf32> to vector<1x128xf32>
    %c0_21 = arith.constant 0 : index
    %c3 = arith.constant 3 : index
    %c0_22 = arith.constant 0 : index
    %42 = vector.load %arg8[%c0_21, %c3, %c0_22] : memref<2x8x128xf32, #tpu.memory_space<vmem>>, vector<1x1x128xf32>
    %43 = vector.shape_cast %42 : vector<1x1x128xf32> to vector<1x128xf32>
    %c0_23 = arith.constant 0 : index
    %c4 = arith.constant 4 : index
    %c0_24 = arith.constant 0 : index
    %44 = vector.load %arg8[%c0_23, %c4, %c0_24] : memref<2x8x128xf32, #tpu.memory_space<vmem>>, vector<1x1x128xf32>
    %45 = vector.shape_cast %44 : vector<1x1x128xf32> to vector<1x128xf32>
    %c0_25 = arith.constant 0 : index
    %c5 = arith.constant 5 : index
    %c0_26 = arith.constant 0 : index
    %46 = vector.load %arg8[%c0_25, %c5, %c0_26] : memref<2x8x128xf32, #tpu.memory_space<vmem>>, vector<1x1x128xf32>
    %47 = vector.shape_cast %46 : vector<1x1x128xf32> to vector<1x128xf32>
    %c0_27 = arith.constant 0 : index
    %c6 = arith.constant 6 : index
    %c0_28 = arith.constant 0 : index
    %48 = vector.load %arg8[%c0_27, %c6, %c0_28] : memref<2x8x128xf32, #tpu.memory_space<vmem>>, vector<1x1x128xf32>
    %49 = vector.shape_cast %48 : vector<1x1x128xf32> to vector<1x128xf32>
    %cst = arith.constant dense<0.000000e+00> : vector<32xf32>
    %50 = vector.multi_reduction <add>, %1, %cst [1] : vector<32x128xf32> to vector<32xf32>
    %51 = vector.shape_cast %50 : vector<32xf32> to vector<32x1xf32>
    %cst_29 = arith.constant 3.125000e-02 : f32
    %52 = vector.broadcast %cst_29 : f32 to vector<32x1xf32>
    %53 = arith.mulf %51, %52 : vector<32x1xf32>
    %54 = arith.mulf %1, %1 : vector<32x128xf32>
    %cst_30 = arith.constant dense<0.000000e+00> : vector<32xf32>
    %55 = vector.multi_reduction <add>, %54, %cst_30 [1] : vector<32x128xf32> to vector<32xf32>
    %56 = vector.shape_cast %55 : vector<32xf32> to vector<32x1xf32>
    %cst_31 = arith.constant 3.125000e-02 : f32
    %57 = vector.broadcast %cst_31 : f32 to vector<32x1xf32>
    %58 = arith.mulf %56, %57 : vector<32x1xf32>
    %59 = arith.mulf %53, %53 : vector<32x1xf32>
    %60 = arith.subf %58, %59 : vector<32x1xf32>
    %61 = vector.broadcast %53 : vector<32x1xf32> to vector<32x128xf32>
    %62 = arith.subf %1, %61 : vector<32x128xf32>
    %cst_32 = arith.constant 9.99999974E-6 : f32
    %63 = vector.broadcast %cst_32 : f32 to vector<32x1xf32>
    %64 = arith.addf %60, %63 : vector<32x1xf32>
    %65 = math.rsqrt %64 : vector<32x1xf32>
    %66 = vector.broadcast %65 : vector<32x1xf32> to vector<32x128xf32>
    %67 = arith.mulf %62, %66 : vector<32x128xf32>
    %68 = vector.broadcast %37 : vector<1x128xf32> to vector<32x128xf32>
    %69 = arith.mulf %67, %68 : vector<32x128xf32>
    %70 = vector.broadcast %39 : vector<1x128xf32> to vector<32x128xf32>
    %71 = arith.addf %69, %70 : vector<32x128xf32>
    %72 = arith.truncf %71 : vector<32x128xf32> to vector<32x128xbf16>
    %c0_33 = arith.constant 0 : index
    %c0_34 = arith.constant 0 : index
    %c0_35 = arith.constant 0 : index
    %73 = vector.load %arg3[%c0_33, %c0_34, %c0_35] : memref<2x128x384xbf16, #tpu.memory_space<vmem>>, vector<1x128x384xbf16>
    %74 = vector.shape_cast %73 : vector<1x128x384xbf16> to vector<128x384xbf16>
    %cst_36 = arith.constant dense<0.000000e+00> : vector<32x384xf32>
    %75 = tpu.matmul %72, %74, %cst_36 {dimension_numbers = #tpu.dot_dimension_numbers<[1], [0], [0], [1], [0, 0, 1, 1], [], []>} : vector<32x128xbf16>, vector<128x384xbf16>, vector<32x384xf32> -> vector<32x384xf32>
    %c0_37 = arith.constant 0 : index
    %c0_38 = arith.constant 0 : index
    %c0_39 = arith.constant 0 : index
    %76 = vector.load %arg4[%c0_37, %c0_38, %c0_39] : memref<2x1x384xf32, #tpu.memory_space<vmem>>, vector<1x1x384xf32>
    %77 = vector.shape_cast %76 : vector<1x1x384xf32> to vector<1x384xf32>
    %78 = vector.broadcast %77 : vector<1x384xf32> to vector<32x384xf32>
    %79 = arith.addf %75, %78 : vector<32x384xf32>
    %80 = vector.extract_strided_slice %79 {offsets = [0, 0], sizes = [32, 128], strides = [1, 1]} : vector<32x384xf32> to vector<32x128xf32>
    %81 = vector.extract_strided_slice %79 {offsets = [0, 128], sizes = [32, 128], strides = [1, 1]} : vector<32x384xf32> to vector<32x128xf32>
    %82 = arith.truncf %81 : vector<32x128xf32> to vector<32x128xbf16>
    %83 = vector.extract_strided_slice %79 {offsets = [0, 256], sizes = [32, 128], strides = [1, 1]} : vector<32x384xf32> to vector<32x128xf32>
    %84 = arith.truncf %83 : vector<32x128xf32> to vector<32x128xbf16>
    %85 = vector.broadcast %11 : vector<1x128xf32> to vector<32x128xf32>
    %86 = arith.mulf %80, %85 : vector<32x128xf32>
    %87 = vector.broadcast %18 : vector<1x128xf32> to vector<32x128xf32>
    %88 = arith.mulf %80, %87 : vector<32x128xf32>
    %89 = vector.broadcast %25 : vector<1x128xf32> to vector<32x128xf32>
    %90 = arith.mulf %80, %89 : vector<32x128xf32>
    %91 = vector.broadcast %32 : vector<1x128xf32> to vector<32x128xf32>
    %92 = arith.mulf %80, %91 : vector<32x128xf32>
    %93 = tpu.concatenate %86, %88, %90, %92 in 0 : vector<32x128xf32>, vector<32x128xf32>, vector<32x128xf32>, vector<32x128xf32> -> vector<128x128xf32>
    %94 = arith.truncf %93 : vector<128x128xf32> to vector<128x128xbf16>
    %cst_40 = arith.constant dense<0.000000e+00> : vector<128x32xf32>
    %95 = tpu.matmul %94, %82, %cst_40 {dimension_numbers = #tpu.dot_dimension_numbers<[1], [1], [0], [0], [0, 0, 1, 0], [], []>} : vector<128x128xbf16>, vector<32x128xbf16>, vector<128x32xf32> -> vector<128x32xf32>
    %cst_41 = arith.constant 0.353553385 : f32
    %96 = vector.broadcast %cst_41 : f32 to vector<128x32xf32>
    %97 = arith.mulf %95, %96 : vector<128x32xf32>
    %98 = arith.addf %97, %3 : vector<128x32xf32>
    %cst_42 = arith.constant dense<0xFF800000> : vector<128xf32>
    %99 = vector.multi_reduction <maximumf>, %98, %cst_42 [1] : vector<128x32xf32> to vector<128xf32>
    %100 = vector.shape_cast %99 : vector<128xf32> to vector<128x1xf32>
    %101 = vector.broadcast %100 : vector<128x1xf32> to vector<128x32xf32>
    %102 = arith.subf %98, %101 : vector<128x32xf32>
    %103 = math.exp %102 : vector<128x32xf32>
    %cst_43 = arith.constant dense<0.000000e+00> : vector<128xf32>
    %104 = vector.multi_reduction <add>, %103, %cst_43 [1] : vector<128x32xf32> to vector<128xf32>
    %105 = vector.shape_cast %104 : vector<128xf32> to vector<128x1xf32>
    %106 = tpu.reciprocal %105 {approx = true} : vector<128x1xf32> -> vector<128x1xf32>
    %107 = vector.broadcast %106 : vector<128x1xf32> to vector<128x32xf32>
    %108 = arith.mulf %103, %107 : vector<128x32xf32>
    %109 = arith.truncf %108 : vector<128x32xf32> to vector<128x32xbf16>
    %cst_44 = arith.constant dense<0.000000e+00> : vector<128x128xf32>
    %110 = tpu.matmul %109, %84, %cst_44 {dimension_numbers = #tpu.dot_dimension_numbers<[1], [0], [0], [1], [0, 0, 1, 1], [], []>} : vector<128x32xbf16>, vector<32x128xbf16>, vector<128x128xf32> -> vector<128x128xf32>
    %111 = vector.extract_strided_slice %110 {offsets = [0, 0], sizes = [32, 128], strides = [1, 1]} : vector<128x128xf32> to vector<32x128xf32>
    %112 = vector.broadcast %11 : vector<1x128xf32> to vector<32x128xf32>
    %113 = arith.mulf %111, %112 : vector<32x128xf32>
    %114 = vector.extract_strided_slice %110 {offsets = [32, 0], sizes = [32, 128], strides = [1, 1]} : vector<128x128xf32> to vector<32x128xf32>
    %115 = vector.broadcast %18 : vector<1x128xf32> to vector<32x128xf32>
    %116 = arith.mulf %114, %115 : vector<32x128xf32>
    %117 = arith.addf %113, %116 : vector<32x128xf32>
    %118 = vector.extract_strided_slice %110 {offsets = [64, 0], sizes = [32, 128], strides = [1, 1]} : vector<128x128xf32> to vector<32x128xf32>
    %119 = vector.broadcast %25 : vector<1x128xf32> to vector<32x128xf32>
    %120 = arith.mulf %118, %119 : vector<32x128xf32>
    %121 = arith.addf %117, %120 : vector<32x128xf32>
    %122 = vector.extract_strided_slice %110 {offsets = [96, 0], sizes = [32, 128], strides = [1, 1]} : vector<128x128xf32> to vector<32x128xf32>
    %123 = vector.broadcast %32 : vector<1x128xf32> to vector<32x128xf32>
    %124 = arith.mulf %122, %123 : vector<32x128xf32>
    %125 = arith.addf %121, %124 : vector<32x128xf32>
    %126 = arith.truncf %125 : vector<32x128xf32> to vector<32x128xbf16>
    %c0_45 = arith.constant 0 : index
    %c0_46 = arith.constant 0 : index
    %c0_47 = arith.constant 0 : index
    %127 = vector.load %arg5[%c0_45, %c0_46, %c0_47] : memref<2x128x128xbf16, #tpu.memory_space<vmem>>, vector<1x128x128xbf16>
    %128 = vector.shape_cast %127 : vector<1x128x128xbf16> to vector<128x128xbf16>
    %cst_48 = arith.constant dense<0.000000e+00> : vector<32x128xf32>
    %129 = tpu.matmul %126, %128, %cst_48 {dimension_numbers = #tpu.dot_dimension_numbers<[1], [0], [0], [1], [0, 0, 1, 1], [], []>} : vector<32x128xbf16>, vector<128x128xbf16>, vector<32x128xf32> -> vector<32x128xf32>
    %130 = vector.broadcast %41 : vector<1x128xf32> to vector<32x128xf32>
    %131 = arith.addf %129, %130 : vector<32x128xf32>
    %132 = arith.addf %1, %131 : vector<32x128xf32>
    %cst_49 = arith.constant dense<0.000000e+00> : vector<32xf32>
    %133 = vector.multi_reduction <add>, %132, %cst_49 [1] : vector<32x128xf32> to vector<32xf32>
    %134 = vector.shape_cast %133 : vector<32xf32> to vector<32x1xf32>
    %cst_50 = arith.constant 3.125000e-02 : f32
    %135 = vector.broadcast %cst_50 : f32 to vector<32x1xf32>
    %136 = arith.mulf %134, %135 : vector<32x1xf32>
    %137 = arith.mulf %132, %132 : vector<32x128xf32>
    %cst_51 = arith.constant dense<0.000000e+00> : vector<32xf32>
    %138 = vector.multi_reduction <add>, %137, %cst_51 [1] : vector<32x128xf32> to vector<32xf32>
    %139 = vector.shape_cast %138 : vector<32xf32> to vector<32x1xf32>
    %cst_52 = arith.constant 3.125000e-02 : f32
    %140 = vector.broadcast %cst_52 : f32 to vector<32x1xf32>
    %141 = arith.mulf %139, %140 : vector<32x1xf32>
    %142 = arith.mulf %136, %136 : vector<32x1xf32>
    %143 = arith.subf %141, %142 : vector<32x1xf32>
    %144 = vector.broadcast %136 : vector<32x1xf32> to vector<32x128xf32>
    %145 = arith.subf %132, %144 : vector<32x128xf32>
    %cst_53 = arith.constant 9.99999974E-6 : f32
    %146 = vector.broadcast %cst_53 : f32 to vector<32x1xf32>
    %147 = arith.addf %143, %146 : vector<32x1xf32>
    %148 = math.rsqrt %147 : vector<32x1xf32>
    %149 = vector.broadcast %148 : vector<32x1xf32> to vector<32x128xf32>
    %150 = arith.mulf %145, %149 : vector<32x128xf32>
    %151 = vector.broadcast %43 : vector<1x128xf32> to vector<32x128xf32>
    %152 = arith.mulf %150, %151 : vector<32x128xf32>
    %153 = vector.broadcast %45 : vector<1x128xf32> to vector<32x128xf32>
    %154 = arith.addf %152, %153 : vector<32x128xf32>
    %155 = arith.truncf %154 : vector<32x128xf32> to vector<32x128xbf16>
    %c0_54 = arith.constant 0 : index
    %c0_55 = arith.constant 0 : index
    %c0_56 = arith.constant 0 : index
    %156 = vector.load %arg6[%c0_54, %c0_55, %c0_56] : memref<2x128x128xbf16, #tpu.memory_space<vmem>>, vector<1x128x128xbf16>
    %157 = vector.shape_cast %156 : vector<1x128x128xbf16> to vector<128x128xbf16>
    %cst_57 = arith.constant dense<0.000000e+00> : vector<32x128xf32>
    %158 = tpu.matmul %155, %157, %cst_57 {dimension_numbers = #tpu.dot_dimension_numbers<[1], [0], [0], [1], [0, 0, 1, 1], [], []>} : vector<32x128xbf16>, vector<128x128xbf16>, vector<32x128xf32> -> vector<32x128xf32>
    %159 = vector.broadcast %47 : vector<1x128xf32> to vector<32x128xf32>
    %160 = arith.addf %158, %159 : vector<32x128xf32>
    %cst_58 = arith.constant 5.000000e-01 : f32
    %161 = vector.broadcast %cst_58 : f32 to vector<32x128xf32>
    %162 = arith.mulf %161, %160 : vector<32x128xf32>
    %cst_59 = arith.constant 4.471500e-02 : f32
    %163 = vector.broadcast %cst_59 : f32 to vector<32x128xf32>
    %164 = arith.mulf %163, %160 : vector<32x128xf32>
    %165 = arith.mulf %164, %160 : vector<32x128xf32>
    %166 = arith.mulf %165, %160 : vector<32x128xf32>
    %167 = arith.addf %160, %166 : vector<32x128xf32>
    %cst_60 = arith.constant 0.797884583 : f32
    %168 = vector.broadcast %cst_60 : f32 to vector<32x128xf32>
    %169 = arith.mulf %168, %167 : vector<32x128xf32>
    %170 = math.tanh %169 : vector<32x128xf32>
    %cst_61 = arith.constant 1.000000e+00 : f32
    %171 = vector.broadcast %cst_61 : f32 to vector<32x128xf32>
    %172 = arith.addf %171, %170 : vector<32x128xf32>
    %173 = arith.mulf %162, %172 : vector<32x128xf32>
    %174 = arith.truncf %173 : vector<32x128xf32> to vector<32x128xbf16>
    %c0_62 = arith.constant 0 : index
    %c0_63 = arith.constant 0 : index
    %c0_64 = arith.constant 0 : index
    %175 = vector.load %arg7[%c0_62, %c0_63, %c0_64] : memref<2x128x128xbf16, #tpu.memory_space<vmem>>, vector<1x128x128xbf16>
    %176 = vector.shape_cast %175 : vector<1x128x128xbf16> to vector<128x128xbf16>
    %cst_65 = arith.constant dense<0.000000e+00> : vector<32x128xf32>
    %177 = tpu.matmul %174, %176, %cst_65 {dimension_numbers = #tpu.dot_dimension_numbers<[1], [0], [0], [1], [0, 0, 1, 1], [], []>} : vector<32x128xbf16>, vector<128x128xbf16>, vector<32x128xf32> -> vector<32x128xf32>
    %178 = vector.broadcast %49 : vector<1x128xf32> to vector<32x128xf32>
    %179 = arith.addf %177, %178 : vector<32x128xf32>
    %180 = arith.addf %132, %179 : vector<32x128xf32>
    %c1_66 = arith.constant 1 : index
    %c0_67 = arith.constant 0 : index
    %c0_68 = arith.constant 0 : index
    %181 = vector.load %arg8[%c1_66, %c0_67, %c0_68] : memref<2x8x128xf32, #tpu.memory_space<vmem>>, vector<1x1x128xf32>
    %182 = vector.shape_cast %181 : vector<1x1x128xf32> to vector<1x128xf32>
    %c1_69 = arith.constant 1 : index
    %c1_70 = arith.constant 1 : index
    %c0_71 = arith.constant 0 : index
    %183 = vector.load %arg8[%c1_69, %c1_70, %c0_71] : memref<2x8x128xf32, #tpu.memory_space<vmem>>, vector<1x1x128xf32>
    %184 = vector.shape_cast %183 : vector<1x1x128xf32> to vector<1x128xf32>
    %c1_72 = arith.constant 1 : index
    %c2_73 = arith.constant 2 : index
    %c0_74 = arith.constant 0 : index
    %185 = vector.load %arg8[%c1_72, %c2_73, %c0_74] : memref<2x8x128xf32, #tpu.memory_space<vmem>>, vector<1x1x128xf32>
    %186 = vector.shape_cast %185 : vector<1x1x128xf32> to vector<1x128xf32>
    %c1_75 = arith.constant 1 : index
    %c3_76 = arith.constant 3 : index
    %c0_77 = arith.constant 0 : index
    %187 = vector.load %arg8[%c1_75, %c3_76, %c0_77] : memref<2x8x128xf32, #tpu.memory_space<vmem>>, vector<1x1x128xf32>
    %188 = vector.shape_cast %187 : vector<1x1x128xf32> to vector<1x128xf32>
    %c1_78 = arith.constant 1 : index
    %c4_79 = arith.constant 4 : index
    %c0_80 = arith.constant 0 : index
    %189 = vector.load %arg8[%c1_78, %c4_79, %c0_80] : memref<2x8x128xf32, #tpu.memory_space<vmem>>, vector<1x1x128xf32>
    %190 = vector.shape_cast %189 : vector<1x1x128xf32> to vector<1x128xf32>
    %c1_81 = arith.constant 1 : index
    %c5_82 = arith.constant 5 : index
    %c0_83 = arith.constant 0 : index
    %191 = vector.load %arg8[%c1_81, %c5_82, %c0_83] : memref<2x8x128xf32, #tpu.memory_space<vmem>>, vector<1x1x128xf32>
    %192 = vector.shape_cast %191 : vector<1x1x128xf32> to vector<1x128xf32>
    %c1_84 = arith.constant 1 : index
    %c6_85 = arith.constant 6 : index
    %c0_86 = arith.constant 0 : index
    %193 = vector.load %arg8[%c1_84, %c6_85, %c0_86] : memref<2x8x128xf32, #tpu.memory_space<vmem>>, vector<1x1x128xf32>
    %194 = vector.shape_cast %193 : vector<1x1x128xf32> to vector<1x128xf32>
    %cst_87 = arith.constant dense<0.000000e+00> : vector<32xf32>
    %195 = vector.multi_reduction <add>, %180, %cst_87 [1] : vector<32x128xf32> to vector<32xf32>
    %196 = vector.shape_cast %195 : vector<32xf32> to vector<32x1xf32>
    %cst_88 = arith.constant 3.125000e-02 : f32
    %197 = vector.broadcast %cst_88 : f32 to vector<32x1xf32>
    %198 = arith.mulf %196, %197 : vector<32x1xf32>
    %199 = arith.mulf %180, %180 : vector<32x128xf32>
    %cst_89 = arith.constant dense<0.000000e+00> : vector<32xf32>
    %200 = vector.multi_reduction <add>, %199, %cst_89 [1] : vector<32x128xf32> to vector<32xf32>
    %201 = vector.shape_cast %200 : vector<32xf32> to vector<32x1xf32>
    %cst_90 = arith.constant 3.125000e-02 : f32
    %202 = vector.broadcast %cst_90 : f32 to vector<32x1xf32>
    %203 = arith.mulf %201, %202 : vector<32x1xf32>
    %204 = arith.mulf %198, %198 : vector<32x1xf32>
    %205 = arith.subf %203, %204 : vector<32x1xf32>
    %206 = vector.broadcast %198 : vector<32x1xf32> to vector<32x128xf32>
    %207 = arith.subf %180, %206 : vector<32x128xf32>
    %cst_91 = arith.constant 9.99999974E-6 : f32
    %208 = vector.broadcast %cst_91 : f32 to vector<32x1xf32>
    %209 = arith.addf %205, %208 : vector<32x1xf32>
    %210 = math.rsqrt %209 : vector<32x1xf32>
    %211 = vector.broadcast %210 : vector<32x1xf32> to vector<32x128xf32>
    %212 = arith.mulf %207, %211 : vector<32x128xf32>
    %213 = vector.broadcast %182 : vector<1x128xf32> to vector<32x128xf32>
    %214 = arith.mulf %212, %213 : vector<32x128xf32>
    %215 = vector.broadcast %184 : vector<1x128xf32> to vector<32x128xf32>
    %216 = arith.addf %214, %215 : vector<32x128xf32>
    %217 = arith.truncf %216 : vector<32x128xf32> to vector<32x128xbf16>
    %c1_92 = arith.constant 1 : index
    %c0_93 = arith.constant 0 : index
    %c0_94 = arith.constant 0 : index
    %218 = vector.load %arg3[%c1_92, %c0_93, %c0_94] : memref<2x128x384xbf16, #tpu.memory_space<vmem>>, vector<1x128x384xbf16>
    %219 = vector.shape_cast %218 : vector<1x128x384xbf16> to vector<128x384xbf16>
    %cst_95 = arith.constant dense<0.000000e+00> : vector<32x384xf32>
    %220 = tpu.matmul %217, %219, %cst_95 {dimension_numbers = #tpu.dot_dimension_numbers<[1], [0], [0], [1], [0, 0, 1, 1], [], []>} : vector<32x128xbf16>, vector<128x384xbf16>, vector<32x384xf32> -> vector<32x384xf32>
    %c1_96 = arith.constant 1 : index
    %c0_97 = arith.constant 0 : index
    %c0_98 = arith.constant 0 : index
    %221 = vector.load %arg4[%c1_96, %c0_97, %c0_98] : memref<2x1x384xf32, #tpu.memory_space<vmem>>, vector<1x1x384xf32>
    %222 = vector.shape_cast %221 : vector<1x1x384xf32> to vector<1x384xf32>
    %223 = vector.broadcast %222 : vector<1x384xf32> to vector<32x384xf32>
    %224 = arith.addf %220, %223 : vector<32x384xf32>
    %225 = vector.extract_strided_slice %224 {offsets = [0, 0], sizes = [32, 128], strides = [1, 1]} : vector<32x384xf32> to vector<32x128xf32>
    %226 = vector.extract_strided_slice %224 {offsets = [0, 128], sizes = [32, 128], strides = [1, 1]} : vector<32x384xf32> to vector<32x128xf32>
    %227 = arith.truncf %226 : vector<32x128xf32> to vector<32x128xbf16>
    %228 = vector.extract_strided_slice %224 {offsets = [0, 256], sizes = [32, 128], strides = [1, 1]} : vector<32x384xf32> to vector<32x128xf32>
    %229 = arith.truncf %228 : vector<32x128xf32> to vector<32x128xbf16>
    %230 = vector.broadcast %11 : vector<1x128xf32> to vector<32x128xf32>
    %231 = arith.mulf %225, %230 : vector<32x128xf32>
    %232 = vector.broadcast %18 : vector<1x128xf32> to vector<32x128xf32>
    %233 = arith.mulf %225, %232 : vector<32x128xf32>
    %234 = vector.broadcast %25 : vector<1x128xf32> to vector<32x128xf32>
    %235 = arith.mulf %225, %234 : vector<32x128xf32>
    %236 = vector.broadcast %32 : vector<1x128xf32> to vector<32x128xf32>
    %237 = arith.mulf %225, %236 : vector<32x128xf32>
    %238 = tpu.concatenate %231, %233, %235, %237 in 0 : vector<32x128xf32>, vector<32x128xf32>, vector<32x128xf32>, vector<32x128xf32> -> vector<128x128xf32>
    %239 = arith.truncf %238 : vector<128x128xf32> to vector<128x128xbf16>
    %cst_99 = arith.constant dense<0.000000e+00> : vector<128x32xf32>
    %240 = tpu.matmul %239, %227, %cst_99 {dimension_numbers = #tpu.dot_dimension_numbers<[1], [1], [0], [0], [0, 0, 1, 0], [], []>} : vector<128x128xbf16>, vector<32x128xbf16>, vector<128x32xf32> -> vector<128x32xf32>
    %cst_100 = arith.constant 0.353553385 : f32
    %241 = vector.broadcast %cst_100 : f32 to vector<128x32xf32>
    %242 = arith.mulf %240, %241 : vector<128x32xf32>
    %243 = arith.addf %242, %3 : vector<128x32xf32>
    %cst_101 = arith.constant dense<0xFF800000> : vector<128xf32>
    %244 = vector.multi_reduction <maximumf>, %243, %cst_101 [1] : vector<128x32xf32> to vector<128xf32>
    %245 = vector.shape_cast %244 : vector<128xf32> to vector<128x1xf32>
    %246 = vector.broadcast %245 : vector<128x1xf32> to vector<128x32xf32>
    %247 = arith.subf %243, %246 : vector<128x32xf32>
    %248 = math.exp %247 : vector<128x32xf32>
    %cst_102 = arith.constant dense<0.000000e+00> : vector<128xf32>
    %249 = vector.multi_reduction <add>, %248, %cst_102 [1] : vector<128x32xf32> to vector<128xf32>
    %250 = vector.shape_cast %249 : vector<128xf32> to vector<128x1xf32>
    %251 = tpu.reciprocal %250 {approx = true} : vector<128x1xf32> -> vector<128x1xf32>
    %252 = vector.broadcast %251 : vector<128x1xf32> to vector<128x32xf32>
    %253 = arith.mulf %248, %252 : vector<128x32xf32>
    %254 = arith.truncf %253 : vector<128x32xf32> to vector<128x32xbf16>
    %cst_103 = arith.constant dense<0.000000e+00> : vector<128x128xf32>
    %255 = tpu.matmul %254, %229, %cst_103 {dimension_numbers = #tpu.dot_dimension_numbers<[1], [0], [0], [1], [0, 0, 1, 1], [], []>} : vector<128x32xbf16>, vector<32x128xbf16>, vector<128x128xf32> -> vector<128x128xf32>
    %256 = vector.extract_strided_slice %255 {offsets = [0, 0], sizes = [32, 128], strides = [1, 1]} : vector<128x128xf32> to vector<32x128xf32>
    %257 = vector.broadcast %11 : vector<1x128xf32> to vector<32x128xf32>
    %258 = arith.mulf %256, %257 : vector<32x128xf32>
    %259 = vector.extract_strided_slice %255 {offsets = [32, 0], sizes = [32, 128], strides = [1, 1]} : vector<128x128xf32> to vector<32x128xf32>
    %260 = vector.broadcast %18 : vector<1x128xf32> to vector<32x128xf32>
    %261 = arith.mulf %259, %260 : vector<32x128xf32>
    %262 = arith.addf %258, %261 : vector<32x128xf32>
    %263 = vector.extract_strided_slice %255 {offsets = [64, 0], sizes = [32, 128], strides = [1, 1]} : vector<128x128xf32> to vector<32x128xf32>
    %264 = vector.broadcast %25 : vector<1x128xf32> to vector<32x128xf32>
    %265 = arith.mulf %263, %264 : vector<32x128xf32>
    %266 = arith.addf %262, %265 : vector<32x128xf32>
    %267 = vector.extract_strided_slice %255 {offsets = [96, 0], sizes = [32, 128], strides = [1, 1]} : vector<128x128xf32> to vector<32x128xf32>
    %268 = vector.broadcast %32 : vector<1x128xf32> to vector<32x128xf32>
    %269 = arith.mulf %267, %268 : vector<32x128xf32>
    %270 = arith.addf %266, %269 : vector<32x128xf32>
    %271 = arith.truncf %270 : vector<32x128xf32> to vector<32x128xbf16>
    %c1_104 = arith.constant 1 : index
    %c0_105 = arith.constant 0 : index
    %c0_106 = arith.constant 0 : index
    %272 = vector.load %arg5[%c1_104, %c0_105, %c0_106] : memref<2x128x128xbf16, #tpu.memory_space<vmem>>, vector<1x128x128xbf16>
    %273 = vector.shape_cast %272 : vector<1x128x128xbf16> to vector<128x128xbf16>
    %cst_107 = arith.constant dense<0.000000e+00> : vector<32x128xf32>
    %274 = tpu.matmul %271, %273, %cst_107 {dimension_numbers = #tpu.dot_dimension_numbers<[1], [0], [0], [1], [0, 0, 1, 1], [], []>} : vector<32x128xbf16>, vector<128x128xbf16>, vector<32x128xf32> -> vector<32x128xf32>
    %275 = vector.broadcast %186 : vector<1x128xf32> to vector<32x128xf32>
    %276 = arith.addf %274, %275 : vector<32x128xf32>
    %277 = arith.addf %180, %276 : vector<32x128xf32>
    %cst_108 = arith.constant dense<0.000000e+00> : vector<32xf32>
    %278 = vector.multi_reduction <add>, %277, %cst_108 [1] : vector<32x128xf32> to vector<32xf32>
    %279 = vector.shape_cast %278 : vector<32xf32> to vector<32x1xf32>
    %cst_109 = arith.constant 3.125000e-02 : f32
    %280 = vector.broadcast %cst_109 : f32 to vector<32x1xf32>
    %281 = arith.mulf %279, %280 : vector<32x1xf32>
    %282 = arith.mulf %277, %277 : vector<32x128xf32>
    %cst_110 = arith.constant dense<0.000000e+00> : vector<32xf32>
    %283 = vector.multi_reduction <add>, %282, %cst_110 [1] : vector<32x128xf32> to vector<32xf32>
    %284 = vector.shape_cast %283 : vector<32xf32> to vector<32x1xf32>
    %cst_111 = arith.constant 3.125000e-02 : f32
    %285 = vector.broadcast %cst_111 : f32 to vector<32x1xf32>
    %286 = arith.mulf %284, %285 : vector<32x1xf32>
    %287 = arith.mulf %281, %281 : vector<32x1xf32>
    %288 = arith.subf %286, %287 : vector<32x1xf32>
    %289 = vector.broadcast %281 : vector<32x1xf32> to vector<32x128xf32>
    %290 = arith.subf %277, %289 : vector<32x128xf32>
    %cst_112 = arith.constant 9.99999974E-6 : f32
    %291 = vector.broadcast %cst_112 : f32 to vector<32x1xf32>
    %292 = arith.addf %288, %291 : vector<32x1xf32>
    %293 = math.rsqrt %292 : vector<32x1xf32>
    %294 = vector.broadcast %293 : vector<32x1xf32> to vector<32x128xf32>
    %295 = arith.mulf %290, %294 : vector<32x128xf32>
    %296 = vector.broadcast %188 : vector<1x128xf32> to vector<32x128xf32>
    %297 = arith.mulf %295, %296 : vector<32x128xf32>
    %298 = vector.broadcast %190 : vector<1x128xf32> to vector<32x128xf32>
    %299 = arith.addf %297, %298 : vector<32x128xf32>
    %300 = arith.truncf %299 : vector<32x128xf32> to vector<32x128xbf16>
    %c1_113 = arith.constant 1 : index
    %c0_114 = arith.constant 0 : index
    %c0_115 = arith.constant 0 : index
    %301 = vector.load %arg6[%c1_113, %c0_114, %c0_115] : memref<2x128x128xbf16, #tpu.memory_space<vmem>>, vector<1x128x128xbf16>
    %302 = vector.shape_cast %301 : vector<1x128x128xbf16> to vector<128x128xbf16>
    %cst_116 = arith.constant dense<0.000000e+00> : vector<32x128xf32>
    %303 = tpu.matmul %300, %302, %cst_116 {dimension_numbers = #tpu.dot_dimension_numbers<[1], [0], [0], [1], [0, 0, 1, 1], [], []>} : vector<32x128xbf16>, vector<128x128xbf16>, vector<32x128xf32> -> vector<32x128xf32>
    %304 = vector.broadcast %192 : vector<1x128xf32> to vector<32x128xf32>
    %305 = arith.addf %303, %304 : vector<32x128xf32>
    %cst_117 = arith.constant 5.000000e-01 : f32
    %306 = vector.broadcast %cst_117 : f32 to vector<32x128xf32>
    %307 = arith.mulf %306, %305 : vector<32x128xf32>
    %cst_118 = arith.constant 4.471500e-02 : f32
    %308 = vector.broadcast %cst_118 : f32 to vector<32x128xf32>
    %309 = arith.mulf %308, %305 : vector<32x128xf32>
    %310 = arith.mulf %309, %305 : vector<32x128xf32>
    %311 = arith.mulf %310, %305 : vector<32x128xf32>
    %312 = arith.addf %305, %311 : vector<32x128xf32>
    %cst_119 = arith.constant 0.797884583 : f32
    %313 = vector.broadcast %cst_119 : f32 to vector<32x128xf32>
    %314 = arith.mulf %313, %312 : vector<32x128xf32>
    %315 = math.tanh %314 : vector<32x128xf32>
    %cst_120 = arith.constant 1.000000e+00 : f32
    %316 = vector.broadcast %cst_120 : f32 to vector<32x128xf32>
    %317 = arith.addf %316, %315 : vector<32x128xf32>
    %318 = arith.mulf %307, %317 : vector<32x128xf32>
    %319 = arith.truncf %318 : vector<32x128xf32> to vector<32x128xbf16>
    %c1_121 = arith.constant 1 : index
    %c0_122 = arith.constant 0 : index
    %c0_123 = arith.constant 0 : index
    %320 = vector.load %arg7[%c1_121, %c0_122, %c0_123] : memref<2x128x128xbf16, #tpu.memory_space<vmem>>, vector<1x128x128xbf16>
    %321 = vector.shape_cast %320 : vector<1x128x128xbf16> to vector<128x128xbf16>
    %cst_124 = arith.constant dense<0.000000e+00> : vector<32x128xf32>
    %322 = tpu.matmul %319, %321, %cst_124 {dimension_numbers = #tpu.dot_dimension_numbers<[1], [0], [0], [1], [0, 0, 1, 1], [], []>} : vector<32x128xbf16>, vector<128x128xbf16>, vector<32x128xf32> -> vector<32x128xf32>
    %323 = vector.broadcast %194 : vector<1x128xf32> to vector<32x128xf32>
    %324 = arith.addf %322, %323 : vector<32x128xf32>
    %325 = arith.addf %277, %324 : vector<32x128xf32>
    %cst_125 = arith.constant dense<0.000000e+00> : vector<32xf32>
    %326 = vector.multi_reduction <add>, %325, %cst_125 [1] : vector<32x128xf32> to vector<32xf32>
    %327 = vector.shape_cast %326 : vector<32xf32> to vector<32x1xf32>
    %cst_126 = arith.constant 3.125000e-02 : f32
    %328 = vector.broadcast %cst_126 : f32 to vector<32x1xf32>
    %329 = arith.mulf %327, %328 : vector<32x1xf32>
    %330 = arith.mulf %325, %325 : vector<32x128xf32>
    %cst_127 = arith.constant dense<0.000000e+00> : vector<32xf32>
    %331 = vector.multi_reduction <add>, %330, %cst_127 [1] : vector<32x128xf32> to vector<32xf32>
    %332 = vector.shape_cast %331 : vector<32xf32> to vector<32x1xf32>
    %cst_128 = arith.constant 3.125000e-02 : f32
    %333 = vector.broadcast %cst_128 : f32 to vector<32x1xf32>
    %334 = arith.mulf %332, %333 : vector<32x1xf32>
    %335 = arith.mulf %329, %329 : vector<32x1xf32>
    %336 = arith.subf %334, %335 : vector<32x1xf32>
    %337 = vector.broadcast %329 : vector<32x1xf32> to vector<32x128xf32>
    %338 = arith.subf %325, %337 : vector<32x128xf32>
    %cst_129 = arith.constant 9.99999974E-6 : f32
    %339 = vector.broadcast %cst_129 : f32 to vector<32x1xf32>
    %340 = arith.addf %336, %339 : vector<32x1xf32>
    %341 = math.rsqrt %340 : vector<32x1xf32>
    %342 = vector.broadcast %341 : vector<32x1xf32> to vector<32x128xf32>
    %343 = arith.mulf %338, %342 : vector<32x128xf32>
    %344 = vector.broadcast %33 : vector<1x128xf32> to vector<32x128xf32>
    %345 = arith.mulf %343, %344 : vector<32x128xf32>
    %346 = vector.broadcast %34 : vector<1x128xf32> to vector<32x128xf32>
    %347 = arith.addf %345, %346 : vector<32x128xf32>
    %348 = arith.truncf %347 : vector<32x128xf32> to vector<32x128xbf16>
    %c0_130 = arith.constant 0 : index
    %c0_131 = arith.constant 0 : index
    %349 = vector.load %arg9[%c0_130, %c0_131] : memref<128x128xbf16, #tpu.memory_space<vmem>>, vector<128x128xbf16>
    %cst_132 = arith.constant dense<0.000000e+00> : vector<32x128xf32>
    %350 = tpu.matmul %348, %349, %cst_132 {dimension_numbers = #tpu.dot_dimension_numbers<[1], [0], [0], [1], [0, 0, 1, 1], [], []>} : vector<32x128xbf16>, vector<128x128xbf16>, vector<32x128xf32> -> vector<32x128xf32>
    %351 = vector.broadcast %35 : vector<1x128xf32> to vector<32x128xf32>
    %352 = arith.addf %350, %351 : vector<32x128xf32>
    %c0_133 = arith.constant 0 : index
    %c0_134 = arith.constant 0 : index
    %c0_135 = arith.constant 0 : index
    %353 = vector.load %arg11[%c0_133, %c0_134, %c0_135] : memref<1x32x128xf32, #tpu.memory_space<vmem>>, vector<1x32x128xf32>
    %354 = vector.shape_cast %353 : vector<1x32x128xf32> to vector<32x128xf32>
    %355 = vector.shape_cast %352 : vector<32x128xf32> to vector<1x32x128xf32>
    tpu.vector_store %arg11[%c0_133, %c0_134, %c0_135], %355 {strides = array<i32>} : memref<1x32x128xf32, #tpu.memory_space<vmem>>, vector<1x32x128xf32>,
    return
  }
  func.func @transform_0(%arg0: i32) -> (i32, i32, i32) {
    %c0_i32 = arith.constant 0 : i32
    %c0_i32_0 = arith.constant 0 : i32
    %c0_i32_1 = arith.constant 0 : i32
    return %arg0, %c0_i32, %c0_i32_0 : i32, i32, i32
  }
  func.func @transform_1(%arg0: i32) -> (i32, i32, i32) {
    %c0_i32 = arith.constant 0 : i32
    %c0_i32_0 = arith.constant 0 : i32
    %c0_i32_1 = arith.constant 0 : i32
    return %arg0, %c0_i32, %c0_i32_0 : i32, i32, i32
  }
  func.func @transform_2(%arg0: i32) -> (i32, i32, i32) {
    %c0_i32 = arith.constant 0 : i32
    %c0_i32_0 = arith.constant 0 : i32
    %c0_i32_1 = arith.constant 0 : i32
    return %arg0, %c0_i32, %c0_i32_0 : i32, i32, i32
  }
  func.func @transform_3(%arg0: i32) -> (i32, i32, i32) {
    %c0_i32 = arith.constant 0 : i32
    %c0_i32_0 = arith.constant 0 : i32
    %c0_i32_1 = arith.constant 0 : i32
    return %arg0, %c0_i32, %c0_i32_0 : i32, i32, i32
  }
  func.func @transform_4(%arg0: i32) -> (i32, i32, i32) {
    %c0_i32 = arith.constant 0 : i32
    %c0_i32_0 = arith.constant 0 : i32
    %c0_i32_1 = arith.constant 0 : i32
    return %arg0, %c0_i32, %c0_i32_0 : i32, i32, i32
  }
  func.func @transform_5(%arg0: i32) -> (i32, i32, i32) {
    %c0_i32 = arith.constant 0 : i32
    %c0_i32_0 = arith.constant 0 : i32
    %c0_i32_1 = arith.constant 0 : i32
    return %arg0, %c0_i32, %c0_i32_0 : i32, i32, i32
  }
  func.func @transform_6(%arg0: i32) -> (i32, i32, i32) {
    %c0_i32 = arith.constant 0 : i32
    %c0_i32_0 = arith.constant 0 : i32
    %c0_i32_1 = arith.constant 0 : i32
    return %arg0, %c0_i32, %c0_i32_0 : i32, i32, i32
  }
  func.func @transform_7(%arg0: i32) -> (i32, i32, i32) {
    %c0_i32 = arith.constant 0 : i32
    %c0_i32_0 = arith.constant 0 : i32
    %c0_i32_1 = arith.constant 0 : i32
    return %arg0, %c0_i32, %c0_i32_0 : i32, i32, i32
  }
  func.func @transform_8(%arg0: i32) -> (i32, i32) {
    %c0_i32 = arith.constant 0 : i32
    %c0_i32_0 = arith.constant 0 : i32
    %c0_i32_1 = arith.constant 0 : i32
    return %c0_i32, %c0_i32_0 : i32, i32
  }
  func.func @transform_9(%arg0: i32) -> (i32, i32) {
    %c0_i32 = arith.constant 0 : i32
    %c0_i32_0 = arith.constant 0 : i32
    %c0_i32_1 = arith.constant 0 : i32
    return %c0_i32, %c0_i32_0 : i32, i32
  }
  func.func @transform_10(%arg0: i32) -> (i32, i32, i32) {
    %c0_i32 = arith.constant 0 : i32
    %c0_i32_0 = arith.constant 0 : i32
    %c0_i32_1 = arith.constant 0 : i32
    return %arg0, %c0_i32, %c0_i32_0 : i32, i32, i32
  }
}

</mosaic_0001>

<bundles_post_ra>
// kernel: _forward_impl.1
= control target key start
LH: loop header
LB: loop body
LE: loop exit
PB: predicated region body
PF: predicated region fallthrough
CT: control target
= control target key end

     0   :  { %s5951_s0 = inlined_call_operand.vmem [shape: f32[3,32,128], index: 0, kind: input, shape index: {}]   ;;  %s5952_s1 = inlined_call_operand.hbm [shape: f32[3,128,32], index: 1, kind: input, shape index: {}]   ;;  %s5953_s2 = inlined_call_operand.hbm [shape: bf16[6,128,384], index: 2, kind: input, shape index: {}]   ;;  %s5954_s3 = inlined_call_operand.vmem [shape: f32[6,1,384], index: 3, kind: input, shape index: {}]   ;;  %s5955_s4 = inlined_call_operand.vmem [shape: bf16[6,128,128], index: 4, kind: input, shape index: {}]   ;;  %s5956_s5 = inlined_call_operand.hbm [shape: bf16[6,128,128], index: 5, kind: input, shape index: {}]   ;;  %s5957_s6 = inlined_call_operand.hbm [shape: bf16[6,128,128], index: 6, kind: input, shape index: {}]   ;;  %s5958_s7 = inlined_call_operand.vmem [shape: f32[6,8,128], index: 7, kind: input, shape index: {}]   ;;  %s5959_s8 = inlined_call_operand.vmem [shape: bf16[128,128], index: 8, kind: input, shape index: {}]   ;;  %s5960_s9 = inlined_call_operand.vmem [shape: f32[8,128], index: 9, kind: input, shape index: {}]   ;;  %s5961_s10 = inlined_call_operand.vmem [shape: f32[3,32,128], index: 10, kind: output, shape index: {}]  }
   0x1   :  { %5966 = sst [smem:[#allocation15_spill]] %s5952_s1 }
   0x2   :  { %5967 = sst [smem:[#allocation16_spill]] %s5953_s2 }
   0x3   :  { %15 = vsyncpa [#allocation3], 0 }
   0x4   :  { %17 = vsyncpa [#allocation3 + $0x1], 0 }
   0x5   :  { %18 = vsyncpa [#allocation5], 0 }
   0x6   :  { %20 = vsyncpa [#allocation5 + $0x1], 0 }
   0x7   :  { %21 = vsyncpa [#allocation8], 0 }
   0x8   :  { %23 = vsyncpa [#allocation8 + $0x1], 0  ;;  %s4928_s13 = smov 0   ;;  %s4930_s14 = smov 0  }
   0x9   :  { %s4932_s15 = smov 0   ;;  %s4934_s16 = smov 0  }
   0xa LB: > { %5968 = sst [smem:[#allocation12_spill]] %s4855_s15  ;;  %s4947_s17 = sadd.s32 4294967295, %s4859_s16   ;;  %s4859_s16 = sphi %s4934_s16, %s5979_s16   ;;  %s4855_s15 = sphi %s4932_s15, %s5981_s15   ;;  %s4851_s14 = sphi %s4930_s14, %s5983_s14   ;;  %s4847_s13 = sphi %s4928_s13, %s5982_s13  }
   0xb   : > { %s4950_s18 = sadd.s32 1, %s4859_s16   ;;  %s62_s20 = sadd.s32 1, %s4855_s15 }
   0xc   : > { %5969 = sst [smem:[#allocation13_spill]] %s4950_s18  ;;  %s59_s19 = ssub.s32 %s4859_s16, %s4950_s18 }
   0xd   : > { %p60_p0 = scmp.eq.s32.totalorder %s59_s19, 0  ;;  %p69_p1 = scmp.ne.s32.totalorder %s4855_s15, %s4851_s14 }
   0xe   : > { %p70_p2 = scmp.eq.s32.totalorder %s4859_s16, 0  ;;  %p75_p3 = scmp.ne.s32.totalorder %s4851_s14, %s4847_s13 }
   0xf   : > { %s4960_s21 = scalar_select %p60_p0, %s4855_s15, %s62_s20  }
  0x10   : > { %p71_p4 = por %p70_p2, %p69_p1  ;;  %p76_p5 = scmp.eq.s32.totalorder %s4947_s17, 0 }
  0x11   : > { %5970 = sst [smem:[#allocation14_spill]] %s4960_s21  ;;  %p4332_p6 = scmp.lt.s32.totalorder %s4859_s16, 3 }
  0x12   : > { %p4964_p7 = por %p76_p5, %p75_p3  ;;  %s4969_s23 = sand.u32 1, %s4855_s15  }
  0x13   : > { %p4971_p8 = pnand %p4332_p6, %p71_p4  ;;  %s358_s25 = sand.u32 1, %s4859_s16  }
  0x14   : > { %s5971_s22 = scalar_select %p4964_p7, 1, 0 }
  0x15   : > { %s4307_s26 = smul.u32 384, %s4969_s23  ;;  %s5973_s2 = sld [smem:[#allocation16_spill]] }
  0x16   : > { %s4308_s27 = smul.u32 6144, %s4859_s16  ;;  %s4985_s13 = scalar_lea.sflag [#allocation5], %s358_s25 }
  0x17   : > { %s362_s11 = scalar_lea.vmem [#allocation4], %s4307_s26  ;;  %p4991_p10 = pneg %p4971_p8 }
  0x18   : > { %s370_s12 = sshll.u32 %s362_s11, 4  ;;  %s4983_s12 = int_to_ptr.vmem [resolvable:$true] %s370_s12 }
  0x1b   : > { %s4981_s30 = scalar_lea.hbm %s5973_s2, %s4308_s27  ;;  %s4702_s26 = scalar_lea.hbm %s5973_s2, 18432 }
  0x1c   : > { %s4697_s19 = scalar_lea.hbm %s4981_s30, 6144  ;;  %p4703_p13 = scmp.lt.u32.totalorder %s4981_s30, %s5973_s2 }
  0x1d   : > { %p4698_p9 = scmp.ne.s32.totalorder %s4981_s30, %s4697_s19  ;;  %p4704_p0 = scmp.lt.u32.totalorder %s4702_s26, %s4697_s19 }
  0x1e   : > { %p4706_p2 = scmp.lt.u32.totalorder %s4697_s19, %s4981_s30 }
  0x1f   : > { %p4700_p11 = pnand %p4991_p10, %p4698_p9  ;;  %p4705_p1 = por %p4704_p0, %p4703_p13 }
  0x21   : > { %p4701_p12 = pneg %p4700_p11  ;;  %p4707_p3 = por %p4706_p2, %p4705_p1 }
  0x23   : > { %p4708_p4 = pnand %p4707_p3, %p4701_p12 }
  0x25   : > { %4711 = shalt.err (!%p4708_p4)
}
  0x26   : > { %s4712_s25 = scalar_lea.vmem %s4983_s12, 6144  ;;  %s4861_s27 = smov [#allocation4]  }
  0x27   : > { %p4713_p5 = scmp.ne.s32.totalorder %s4983_s12, %s4712_s25  ;;  %s4717_s28 = sshll.u32 %s4861_s27, 4  ;;  %s4718_s28 = int_to_ptr.vmem [resolvable:$false] %s4717_s28 }
  0x28   : > { %s4719_s29 = scalar_lea.vmem %s4718_s28, 12288  ;;  %p4720_p11 = scmp.lt.s32.totalorder %s4983_s12, %s4718_s28 }
  0x29   : > { %p4715_p6 = pnand %p4713_p5, %p4991_p10  ;;  %p4721_p7 = scmp.lt.s32.totalorder %s4719_s29, %s4712_s25 }
  0x2b   : > { %p4716_p9 = pneg %p4715_p6  ;;  %p4722_p13 = por %p4721_p7, %p4720_p11 }
  0x2d   : > { %p4723_p0 = pnand %p4722_p13, %p4716_p9 }
  0x2f   : > { %4726 = shalt.err (!%p4723_p0)
}
  0x30   : > { %s4862_s19 = smov 192   ;;  %s4863_s26 = smov 12  }
  0x31   : > { %4325 = dma.hbm_to_vmem [thread:$0]  (!%p4971_p8), %s4981_s30, 6144, %s4983_s12, %s4985_s13, %s4862_s19, %s4862_s19, %s4863_s26  }
  0x32   : > { %p3664_p12 = scmp.ge.s32.totalorder %s4859_s16, 1  ;;  %p450_p1 = scmp.lt.s32.totalorder %s4859_s16, 4 }
  0x33   : > { %s5018_s11 = sshll.u32 %s4969_s23, 7  ;;  %s5025_s27 = sshll.u32 %s4859_s16, 11 }
  0x34   : > { %p5020_p7 = pnand %p3664_p12, %p450_p1  ;;  %s341_s28 = scalar_lea.vmem [#allocation2], %s5018_s11 }
  0x35   : > { %s348_s29 = sshll.u32 %s341_s28, 4  ;;  %s5976_s1 = sld [smem:[#allocation15_spill]]  ;;  %s5034_s29 = int_to_ptr.vmem [resolvable:$true] %s348_s29 }
  0x36   : > { %s5975_s25 = scalar_select %p5020_p7, 1, 0 }
  0x37   : > { %s338_s30 = scalar_lea.sflag [#allocation3], %s4969_s23 }
  0x3b   : > { %s5032_s15 = scalar_lea.hbm %s5976_s1, %s5025_s27  ;;  %s4732_s26 = scalar_lea.hbm %s5976_s1, 6144 }
  0x3c   : > { %s4727_s12 = scalar_lea.hbm %s5032_s15, 2048  ;;  %p4733_p5 = scmp.lt.u32.totalorder %s5032_s15, %s5976_s1 }
  0x3d   : > { %p4728_p2 = scmp.ne.s32.totalorder %s5032_s15, %s4727_s12  ;;  %p4734_p6 = scmp.lt.u32.totalorder %s4732_s26, %s4727_s12 }
  0x3e   : > { %p4736_p11 = scmp.lt.u32.totalorder %s4727_s12, %s5032_s15 }
  0x3f   : > { %p4730_p3 = pnand %p4728_p2, %p4991_p10  ;;  %p4735_p9 = por %p4734_p6, %p4733_p5 }
  0x41   : > { %p4731_p4 = pneg %p4730_p3  ;;  %p4737_p13 = por %p4736_p11, %p4735_p9 }
  0x43   : > { %p4738_p0 = pnand %p4737_p13, %p4731_p4 }
  0x45   : > { %4741 = shalt.err (!%p4738_p0)
}
  0x46   : > { %s4742_s21 = scalar_lea.vmem %s5034_s29, 2048  ;;  %s4864_s16 = smov [#allocation2]  }
  0x47   : > { %p4743_p12 = scmp.ne.s32.totalorder %s5034_s29, %s4742_s21  ;;  %s4747_s19 = sshll.u32 %s4864_s16, 4  ;;  %s4748_s19 = int_to_ptr.vmem [resolvable:$false] %s4747_s19 }
  0x48   : > { %s4749_s28 = scalar_lea.vmem %s4748_s19, 4096  ;;  %p4750_p3 = scmp.lt.s32.totalorder %s5034_s29, %s4748_s19 }
  0x49   : > { %p4745_p1 = pnand %p4743_p12, %p4991_p10  ;;  %p4751_p7 = scmp.lt.s32.totalorder %s4749_s28, %s4742_s21 }
  0x4b   : > { %p4746_p2 = pneg %p4745_p1  ;;  %p4752_p5 = por %p4751_p7, %p4750_p3 }
  0x4d   : > { %p4753_p6 = pnand %p4752_p5, %p4746_p2 }
  0x4f   : > { %4756 = shalt.err (!%p4753_p6)
}
  0x50   : > { %s4865_s12 = smov 128   ;;  %s4866_s26 = smov 8  }
  0x51   : > { %4322 = dma.hbm_to_vmem [thread:$0]  (!%p4971_p8), %s5032_s15, 2048, %s5034_s29, %s338_s30, %s4865_s12, %s4865_s12, %s4866_s26  }
  0x52   : > { %s5064_s19 = scalar_lea.hbm %s5956_s5, %s5025_s27  ;;  %s403_s21 = scalar_lea.vmem [#allocation6], %s5018_s11 }
  0x53   : > { %s411_s28 = sshll.u32 %s403_s21, 4  ;;  %s4757_s1 = scalar_lea.hbm %s5064_s19, 2048  ;;  %s5067_s28 = int_to_ptr.vmem [resolvable:$true] %s411_s28 }
  0x54   : > { %p4758_p7 = scmp.ne.s32.totalorder %s5064_s19, %s4757_s1  ;;  %s4762_s29 = scalar_lea.hbm %s5956_s5, 6144 }
  0x55   : > { %p4763_p11 = scmp.lt.u32.totalorder %s5064_s19, %s5956_s5  ;;  %p4764_p13 = scmp.lt.u32.totalorder %s4762_s29, %s4757_s1 }
  0x56   : > { %p4760_p4 = pnand %p4758_p7, %p4991_p10  ;;  %p4766_p12 = scmp.lt.u32.totalorder %s4757_s1, %s5064_s19 }
  0x57   : > { %p4765_p0 = por %p4764_p13, %p4763_p11 }
  0x58   : > { %p4761_p9 = pneg %p4760_p4 }
  0x59   : > { %p4767_p1 = por %p4766_p12, %p4765_p0 }
  0x5b   : > { %p4768_p2 = pnand %p4767_p1, %p4761_p9 }
  0x5d   : > { %4771 = shalt.err (!%p4768_p2)
}
  0x5e   : > { %s4772_s26 = scalar_lea.vmem %s5067_s28, 2048  ;;  %s4867_s18 = smov [#allocation6]  }
  0x5f   : > { %p4773_p3 = scmp.ne.s32.totalorder %s5067_s28, %s4772_s26  ;;  %s4777_s2 = sshll.u32 %s4867_s18, 4  ;;  %s4778_s2 = int_to_ptr.vmem [resolvable:$false] %s4777_s2 }
  0x60   : > { %s4779_s16 = scalar_lea.vmem %s4778_s2, 4096  ;;  %p4780_p7 = scmp.lt.s32.totalorder %s5067_s28, %s4778_s2 }
  0x61   : > { %p4775_p5 = pnand %p4773_p3, %p4991_p10  ;;  %p4781_p4 = scmp.lt.s32.totalorder %s4779_s16, %s4772_s26 }
  0x63   : > { %p4776_p6 = pneg %p4775_p5  ;;  %p4782_p11 = por %p4781_p4, %p4780_p7 }
  0x65   : > { %p4783_p13 = pnand %p4782_p11, %p4776_p6 }
  0x67   : > { %4786 = shalt.err (!%p4783_p13)
}
  0x68   : > { %s4868_s1 = smov 64   ;;  %s4869_s21 = smov 4  }
  0x69   : > { %4328 = dma.hbm_to_vmem [thread:$0]  (!%p4971_p8), %s5064_s19, 2048, %s5067_s28, %s4985_s13, %s4868_s1, %s4868_s1, %s4869_s21  }
  0x6a   : > { %s5098_s30 = scalar_lea.hbm %s5957_s6, %s5025_s27  ;;  %s425_s12 = scalar_lea.vmem [#allocation7], %s5018_s11 }
  0x6b   : > { %s433_s26 = sshll.u32 %s425_s12, 4  ;;  %s422_s18 = scalar_lea.sflag [#allocation8], %s4969_s23  ;;  %s5101_s26 = int_to_ptr.vmem [resolvable:$true] %s433_s26 }
  0x6c   : > { %s4787_s2 = scalar_lea.hbm %s5098_s30, 2048  ;;  %s4792_s28 = scalar_lea.hbm %s5957_s6, 6144 }
  0x6d   : > { %p4788_p9 = scmp.ne.s32.totalorder %s5098_s30, %s4787_s2  ;;  %p4793_p1 = scmp.lt.u32.totalorder %s5098_s30, %s5957_s6 }
  0x6e   : > { %p4794_p2 = scmp.lt.u32.totalorder %s4792_s28, %s4787_s2  ;;  %p4796_p5 = scmp.lt.u32.totalorder %s4787_s2, %s5098_s30 }
  0x6f   : > { %p4790_p0 = pnand %p4788_p9, %p4991_p10 }
  0x70   : > { %p4795_p3 = por %p4794_p2, %p4793_p1 }
  0x71   : > { %p4791_p12 = pneg %p4790_p0 }
  0x72   : > { %p4797_p6 = por %p4796_p5, %p4795_p3 }
  0x74   : > { %p4798_p7 = pnand %p4797_p6, %p4791_p12 }
  0x76   : > { %4801 = shalt.err (!%p4798_p7)
}
  0x77   : > { %s4802_s11 = scalar_lea.vmem %s5101_s26, 2048  ;;  %s4870_s15 = smov [#allocation7]  }
  0x78   : > { %p4803_p4 = scmp.ne.s32.totalorder %s5101_s26, %s4802_s11  ;;  %s4807_s29 = sshll.u32 %s4870_s15, 4  ;;  %s4808_s29 = int_to_ptr.vmem [resolvable:$false] %s4807_s29 }
  0x79   : > { %s4809_s12 = scalar_lea.vmem %s4808_s29, 4096  ;;  %p4810_p9 = scmp.lt.s32.totalorder %s5101_s26, %s4808_s29 }
  0x7a   : > { %p4805_p11 = pnand %p4803_p4, %p4991_p10  ;;  %p4811_p0 = scmp.lt.s32.totalorder %s4809_s12, %s4802_s11 }
  0x7c   : > { %p4806_p13 = pneg %p4805_p11  ;;  %p4812_p1 = por %p4811_p0, %p4810_p9 }
  0x7e   : > { %p4813_p2 = pnand %p4812_p1, %p4806_p13 }
  0x80   : > { %4816 = shalt.err (!%p4813_p2)
}
  0x81   : > { %4331 = dma.hbm_to_vmem [thread:$0]  (!%p4971_p8), %s5098_s30, 2048, %s5101_s26, %s422_s18, %s4868_s1, %s4868_s1, %s4869_s21  }
  0x82   : > { %p5977_p10 = scmp.ne.s32.totalorder %s5975_s25, 0 }
  0x83   : > { %s456_s20 = sand.u32 (!%p5977_p10), 1, %s4851_s14   ;;  %p5978_p12 = scmp.ne.s32.totalorder (!%p5977_p10), %s5971_s22, 0 }
  0x84   : > { %454 = sbr.rel (%p5977_p10) target bundleno = 4656 (0x1230), region = 60  ;;  %s3665_s2 = sshll.u32 (!%p5977_p10), %s456_s20, 7 }
  0x85   : > { %s457_s13 = scalar_lea.sflag (!%p5977_p10), [#allocation3], %s456_s20  ;;  %s5133_s19 = scalar_lea.vmem (!%p5977_p10), [#allocation2], %s3665_s2 }
  0x8b   : > { %4834 = dma.done.wait (%p5978_p12), %s457_s13, 2048  }
  0x8c   : > { %4836 = vsyncadd (%p5978_p12), %s457_s13, 4294965248  ;;  %s465_s23 = sand.u32 1, %s4947_s17   ;;  %s4309_s24 = smul.u32 384, %s456_s20 }
  0x8d   : > { %s466_s1 = scalar_lea.sflag [#allocation5], %s465_s23 }
  0x8e   : > { %s5140_s21 = scalar_lea.vmem [#allocation4], %s4309_s24 }
  0x8f   : > { %4838 = dma.done.wait (%p5978_p12), %s466_s1, 8192  }
  0x90   : > { %4840 = vsyncadd (%p5978_p12), %s466_s1, 4294959104  ;;  %s5146_s25 = scalar_lea.vmem [#allocation6], %s3665_s2  ;;  %s484_s30 = scalar_lea.sflag [#allocation8], %s456_s20 }
  0x91   : > { %s5148_s26 = scalar_lea.vmem [#allocation7], %s3665_s2 }
  0x92   : > { %4842 = dma.done.wait (%p5978_p12), %s484_s30, 2048  }
  0x93   : > { %4844 = vsyncadd (%p5978_p12), %s484_s30, 4294965248  ;;  %p560_p8 = scmp.lt.s32.totalorder %s4947_s17, 2  ;;  %v4373_v3 = vld [vmem:[%s5140_s21 + $0x4] ss:$12 sps:$4 sm:$0xff]   ;;  %v4375_v9 = vld [vmem:[%s5140_s21] ss:$12 sps:$4 sm:$0xff]  }
  0x94   : > { %892 = vmatprep.subr.bf16.mxu0 %v4373_v3  ;;  %v4376_v10 = vld [vmem:[%s5140_s21 + $0x1c] ss:$12 sps:$4 sm:$0xff]   ;;  %v4378_v11 = vld [vmem:[%s5140_s21 + $0x18] ss:$12 sps:$4 sm:$0xff]   ;;  %v4379_v12 = vld [vmem:[%s5140_s21 + $0x34] ss:$12 sps:$4 sm:$0xff]  }
  0x95   : > { %s5156_s18 = scalar_select %p560_p8, %s4947_s17, 2  ;;  %893 = vmatpush1.bf16.msra.mxu0 %v4375_v9  ;;  %v4381_v13 = vld [vmem:[%s5140_s21 + $0x8] ss:$12 sps:$4 sm:$0xff]   ;;  %v4382_v14 = vld [vmem:[%s5140_s21 + $0x30] ss:$12 sps:$4 sm:$0xff]   ;;  %v4871_v30 = vmov 0  }
  0x96   : > { %894 = vmatprep.subr.bf16.mxu0 %v4376_v10  ;;  %4047 = vmatprep.subr.bf16.mxu1 %v4381_v13  ;;  %v4383_v15 = vld [vmem:[%s5140_s21 + $0x4c] ss:$12 sps:$4 sm:$0xff]   ;;  %v4386_v17 = vld [vmem:[%s5140_s21 + $0x48] ss:$12 sps:$4 sm:$0xff]   ;;  %v4387_v18 = vld [vmem:[%s5140_s21 + $0x64] ss:$12 sps:$4 sm:$0xff]  }
  0x97   : > { %s3914_s28 = sshll.u32 %s5156_s18, 5  ;;  %4048 = vmatpush3.bf16.msra.mxu1 %v4381_v13  ;;  %v4385_v16 = vld [vmem:[%s5140_s21 + $0x20] ss:$12 sps:$4 sm:$0xff]   ;;  %v4389_v19 = vld [vmem:[%s5140_s21 + $0x38] ss:$12 sps:$4 sm:$0xff]   ;;  %s3670_s22 = sshll.u32 %s4947_s17, 1  ;;  %924 = vmatprep.mubr.bf16.mxu0 %v4871_v30 }
  0x98   : > { %s5164_s11 = scalar_lea.vmem %s5951_s0, %s3914_s28  ;;  %4049 = vmatprep.subr.bf16.mxu1 %v4385_v16  ;;  %v4390_v20 = vld [vmem:[%s5140_s21 + $0x60] ss:$12 sps:$4 sm:$0xff]   ;;  %p567_p3 = scmp.lt.s32.totalorder %s3670_s22, 5  ;;  %v4391_v21 = vld [vmem:[%s5140_s21 + $0x7c] ss:$12 sps:$4 sm:$0xff]   ;;  %vm1151_vm8 = vcmask 261120  }
  0x99   : > { %v5167_v0 = vld [vmem:[%s5164_s11] sm:$0xff]  ;;  %v5170_v1 = vld [vmem:[%s5164_s11 + $0x8] sm:$0xff]  ;;  %v5179_v5 = vld [vmem:[%s5164_s11 + $0x10] sm:$0xff]  ;;  %895 = vmatpush1.bf16.msra.mxu0 %v4378_v11 }
  0x9a   : > { %645 = vadd.xlane.f32.xlu0 %v5167_v0  ;;  %v657_v2 = vmul.f32 %v5167_v0, %v5167_v0  ;;  %v658_v4 = vmul.f32 %v5170_v1, %v5170_v1  ;;  %v5183_v6 = vld [vmem:[%s5164_s11 + $0x18] sm:$0xff]  ;;  %v659_v7 = vmul.f32 %v5179_v5, %v5179_v5  ;;  %896 = vmatprep.subr.bf16.mxu0 %v4379_v12  ;;  %s5985_s22 = smov (!%p567_p3, %s3670_s22), 5  ;;  %v4395_v24 = vld [vmem:[%s5140_s21 + $0x94] ss:$12 sps:$4 sm:$0xff]  }
  0x9b   : > { %v660_v8 = vmul.f32 %v5183_v6, %v5183_v6  ;;  %4050 = vmatpush3.bf16.msra.mxu1 %v4385_v16  ;;  %v4393_v22 = vld [vmem:[%s5140_s21 + $0x50] ss:$12 sps:$4 sm:$0xff]   ;;  %v4394_v23 = vld [vmem:[%s5140_s21 + $0x78] ss:$12 sps:$4 sm:$0xff]   ;;  %v4397_v25 = vld [vmem:[%s5140_s21 + $0x68] ss:$12 sps:$4 sm:$0xff]  }
  0x9c   : > { %661 = vadd.xlane.f32.xlu1 %v657_v2  ;;  %4051 = vmatprep.subr.bf16.mxu1 %v4389_v19  ;;  %v4398_v26 = vld [vmem:[%s5140_s21 + $0x90] ss:$12 sps:$4 sm:$0xff]   ;;  %v4399_v27 = vld [vmem:[%s5140_s21 + $0xac] ss:$12 sps:$4 sm:$0xff]   ;;  %v4402_v29 = vld [vmem:[%s5140_s21 + $0xa8] ss:$12 sps:$4 sm:$0xff]  }
  0x9d   : > { %897 = vmatpush1.bf16.msra.mxu0 %v4382_v14  ;;  %v4401_v28 = vld [vmem:[%s5140_s21 + $0x80] ss:$12 sps:$4 sm:$0xff]   ;;  %s3915_s17 = sshll.u32 %s5985_s22, 6  ;;  %v4403_v31 = vld [vmem:[%s5140_s21 + $0x98] ss:$12 sps:$4 sm:$0xff]   ;;  %s3675_s20 = sshll.u32 %s5985_s22, 3 }
  0x9e   : > { %647 = vadd.xlane.f32.xlu0 %v5170_v1  ;;  %898 = vmatprep.subr.bf16.mxu0 %v4383_v15  ;;  %s5220_s12 = scalar_lea.vmem %s5955_s4, %s3915_s17  ;;  %v4404_v32 = vld [vmem:[%s5140_s21 + $0xb0] ss:$12 sps:$4 sm:$0xff]   ;;  %s5229_s23 = scalar_lea.vmem %s5958_s7, %s3675_s20 }
  0x9f   : > { %4052 = vmatpush3.bf16.msra.mxu1 %v4389_v19  ;;  %v3682_v2 = vld [vmem:[%s5229_s23] ss:$0 sm:$0xff]  ;;  %v3683_v9 = vld [vmem:[%s5229_s23 + $0x1] ss:$0 sm:$0xff]  ;;  %s4310_s24 = smul.u32 3, %s5985_s22 }
  0xa0   : > { %663 = vadd.xlane.f32.xlu1 %v658_v4  ;;  %4053 = vmatprep.subr.bf16.mxu1 %v4393_v22 }
  0xa1   : > { %899 = vmatpush1.bf16.msra.mxu0 %v4386_v17  ;;  %s5243_s27 = scalar_lea.vmem %s5954_s3, %s4310_s24 }
  0xa2   : > { %649 = vadd.xlane.f32.xlu0 %v5179_v5  ;;  %900 = vmatprep.subr.bf16.mxu0 %v4387_v18 }
  0xa3   : > { %4054 = vmatpush3.bf16.msra.mxu1 %v4393_v22 }
  0xa4   : > { %651 = vadd.xlane.f32.xlu1 %v5183_v6  ;;  %4055 = vmatprep.subr.bf16.mxu1 %v4397_v25 }
  0xa5   : > { %901 = vmatpush1.bf16.msra.mxu0 %v4390_v20 }
  0xa6   : > { %665 = vadd.xlane.f32.xlu0 %v659_v7  ;;  %902 = vmatprep.subr.bf16.mxu0 %v4391_v21 }
  0xa7   : > { %4056 = vmatpush3.bf16.msra.mxu1 %v4397_v25  ;;  %v747_v25 = vld [vmem:[%s5243_s27] sm:$0x7] }
  0xa8   : > { %667 = vadd.xlane.f32.xlu1 %v660_v8  ;;  %4057 = vmatprep.subr.bf16.mxu1 %v4401_v28 }
  0xa9   : > { %903 = vmatpush1.bf16.msra.mxu0 %v4394_v23 }
  0xaa   : > { %904 = vmatprep.subr.bf16.mxu0 %v4395_v24 }
  0xab   : > { %4058 = vmatpush3.bf16.msra.mxu1 %v4401_v28 }
  0xac   : > { %4059 = vmatprep.subr.bf16.mxu1 %v4403_v31 }
  0xad   : > { %905 = vmatpush1.bf16.msra.mxu0 %v4398_v26 }
  0xae   : > { %906 = vmatprep.subr.bf16.mxu0 %v4399_v27 }
  0xaf   : > { %4060 = vmatpush3.bf16.msra.mxu1 %v4403_v31 }
  0xb0   : > { %4061 = vmatprep.subr.bf16.mxu1 %v4404_v32 }
  0xb1   : > { %907 = vmatpush1.bf16.msra.mxu0 %v4402_v29  ;;  %v4872_v29 = vmov 0.0  }
  0xb3   : > { %4062 = vmatpush3.bf16.msra.mxu1 %v4404_v32 }
 0x127   : > { %v646_v33 = vpop.xlane.xlu0 %645 }
 0x128   : > { %v653_v34 = vmul.f32 0.03125, %v646_v33 }
 0x129   : > { %v662_v35 = vpop.xlane.xlu1 %661 }
 0x12a   : > { %v673_v36 = vmul.f32 %v653_v34, %v653_v34  ;;  %v669_v37 = vmul.f32 0.03125, %v662_v35  ;;  %v681_v60 = vsub.f32 %v5167_v0, %v653_v34 }
 0x12b   : > { %v648_v38 = vpop.xlane.xlu0 %647 }
 0x12c   : > { %v677_v39 = vsub.f32 %v669_v37, %v673_v36  ;;  %v654_v40 = vmul.f32 0.03125, %v648_v38 }
 0x12d   : > { %v664_v41 = vpop.xlane.xlu1 %663 }
 0x12e   : > { %v685_v42 = vadd.f32 1e-05, %v677_v39  ;;  %v674_v43 = vmul.f32 %v654_v40, %v654_v40  ;;  %v670_v44 = vmul.f32 0.03125, %v664_v41  ;;  %v682_v3 = vsub.f32 %v5170_v1, %v654_v40 }
 0x12f   : > { %v650_v45 = vpop.xlane.xlu0 %649 }
 0x130   : > { %4493 = vrsqrt.f32 %v685_v42  ;;  %v678_v46 = vsub.f32 %v670_v44, %v674_v43  ;;  %v655_v47 = vmul.f32 0.03125, %v650_v45 }
 0x131   : > { %v652_v48 = vpop.xlane.xlu1 %651 }
 0x132   : > { %v686_v49 = vadd.f32 1e-05, %v678_v46  ;;  %v675_v50 = vmul.f32 %v655_v47, %v655_v47  ;;  %v656_v51 = vmul.f32 0.03125, %v652_v48  ;;  %v683_v10 = vsub.f32 %v5179_v5, %v655_v47 }
 0x133   : > { %v666_v52 = vpop.xlane.xlu0 %665  ;;  %v613_v5 = vlaneseq }
 0x134   : > { %4495 = vrsqrt.f32 %v686_v49  ;;  %v671_v53 = vmul.f32 0.03125, %v666_v52  ;;  %v676_v55 = vmul.f32 %v656_v51, %v656_v51  ;;  %v684_v14 = vsub.f32 %v5183_v6, %v656_v51 }
 0x135   : > { %v668_v54 = vpop.xlane.xlu1 %667  ;;  %v5238_v23 = vshrl.u32 %v613_v5, 7  ;;  %v614_v6 = vand.u32 127, %v613_v5 }
 0x136   : > { %v679_v56 = vsub.f32 %v671_v53, %v675_v50  ;;  %v672_v57 = vmul.f32 0.03125, %v668_v54 }
 0x137   : > { %v751_v24 = vsub.s32 0, %v5238_v23  ;;  %vm620_vm0 = vcmp.ge.s32.totalorder %v614_v6, 32  ;;  %vm621_vm1 = vcmp.lt.s32.totalorder %v614_v6, 64  ;;  %vm625_vm2 = vcmp.ge.s32.totalorder %v614_v6, 64 }
 0x138   : > { %v687_v58 = vadd.f32 1e-05, %v679_v56  ;;  %v680_v59 = vsub.f32 %v672_v57, %v676_v55  ;;  %vm626_vm3 = vcmp.lt.s32.totalorder %v614_v6, 96  ;;  %v755_v26 = vsub.s32 1, %v5238_v23  ;;  %vm622_vm5 = vmand %vm620_vm0, %vm621_vm1 }
 0x139   : > { %vm616_vm4 = vcmp.lt.s32.totalorder %v614_v6, 32  ;;  %v752_v27 = vrot.slane %v747_v25, %v751_v24  ;;  %vm627_vm6 = vmand %vm625_vm2, %vm626_vm3  ;;  %vm630_vm7 = vcmp.ge.s32.totalorder %v614_v6, 96  ;;  %v5254_v33 = vsel %vm622_vm5, 1.0, %v4872_v29 }
 0x13a   : > { %v4494_v61 = vpop.eup %4493  ;;  %4497 = vrsqrt.f32 %v687_v58  ;;  %v688_v62 = vadd.f32 1e-05, %v680_v59  ;;  %v756_v28 = vrot.slane %v747_v25, %v755_v26  ;;  %v5252_v31 = vsel %vm616_vm4, 1.0, %v4872_v29 }
 0x13b   : > { %v693_v63 = vmul.f32 %v4494_v61, %v681_v60  ;;  %v5256_v34 = vsel %vm627_vm6, 1.0, %v4872_v29  ;;  %v5258_v35 = vsel %vm630_vm7, 1.0, %v4872_v29  ;;  %v759_v39 = vsub.s32 2, %v5238_v23 }
 0x13c   : > { %4499 = vrsqrt.f32 %v688_v62 }
 0x13d   : > { %v701_v8 = vmul.f32 %v3682_v2, %v693_v63  ;;  %v760_v53 = vrot.slane %v747_v25, %v759_v39 }
 0x13e   : > { %v4496_v4 = vpop.eup %4495 }
 0x13f   : > { %v694_v7 = vmul.f32 %v4496_v4, %v682_v3  ;;  %v709_v11 = vadd.f32 %v3683_v9, %v701_v8 }
 0x141   : > { %v702_v0 = vmul.f32 %v3682_v2, %v694_v7 }
 0x143   : > { %v710_v12 = vadd.f32 %v3683_v9, %v702_v0 }
 0x144   : > { %v4498_v13 = vpop.eup %4497 }
 0x145   : > { %v713_v15 = vpack.c.bf16 %v710_v12, %v709_v11  ;;  %v695_v16 = vmul.f32 %v4498_v13, %v683_v10 }
 0x146   : > { %v4500_v17 = vpop.eup %4499 }
 0x147   : > { %925 = vmatmul.mubr.bf16.vlgmr.msra.gmra.mrb[0].mxu0 %v713_v15  ;;  %4063 = vmatprep.mubr.bf16.mxu1 %v713_v15  ;;  %v696_v18 = vmul.f32 %v4500_v17, %v684_v14  ;;  %v703_v1 = vmul.f32 %v3682_v2, %v695_v16 }
 0x148   : > { %934 = vmatprep.mubr.bf16.mxu0 %v4871_v30 }
 0x149   : > { %v704_v19 = vmul.f32 %v3682_v2, %v696_v18  ;;  %v711_v20 = vadd.f32 %v3683_v9, %v703_v1 }
 0x14b   : > { %v712_v21 = vadd.f32 %v3683_v9, %v704_v19 }
 0x14d   : > { %v714_v22 = vpack.c.bf16 %v712_v21, %v711_v20 }
 0x14f   : > { %935 = vmatmul.mubr.bf16.gmra.mrb[4].mxu0 %v714_v22  ;;  %4064 = vmatmul.mubr.bf16.vlgmr.msra.gmra.mrb[0].mxu1 %v714_v22 }
 0x21a   : > { %v926_v32 = vpop.f32.mrb[0].mxu0 }
 0x21b   : > { %v927_v36 = vadd.f32 %v926_v32, %v752_v27  ;;  %v928_v37 = vpop.f32.mrb[1].mxu0  ;;  %v597_v32 = vld [vmem:[%s5133_s19] sm:$0xff] }
 0x21c   : > { %v930_v38 = vpop.f32.mrb[2].mxu0  ;;  %v929_v40 = vadd.f32 %v928_v37, %v756_v28 }
 0x21d   : > { %v931_v41 = vadd.f32 %v930_v38, %v752_v27  ;;  %v932_v42 = vpop.f32.mrb[3].mxu0  ;;  %v998_v43 = vmul.f32 %v5252_v31, %v927_v36  ;;  %v1002_v45 = vmul.f32 %v5254_v33, %v927_v36  ;;  %v1006_v46 = vmul.f32 %v5256_v34, %v927_v36 }
 0x21e   : > { %v933_v44 = vadd.f32 %v932_v42, %v756_v28  ;;  %v1010_v47 = vmul.f32 %v5258_v35, %v927_v36  ;;  %v599_v42 = vld [vmem:[%s5133_s19 + $0x10] sm:$0xff] }
 0x21f   : > { %v999_v48 = vmul.f32 %v5252_v31, %v931_v41  ;;  %v1003_v49 = vmul.f32 %v5254_v33, %v931_v41  ;;  %v1007_v50 = vmul.f32 %v5256_v34, %v931_v41  ;;  %v1011_v51 = vmul.f32 %v5258_v35, %v931_v41  ;;  %v598_v41 = vld [vmem:[%s5133_s19 + $0x8] sm:$0xff] }
 0x220   : > { %v994_v52 = vpack.c.bf16 %v933_v44, %v929_v40 }
 0x221   : > { %v1014_v54 = vpack.c.bf16 %v999_v48, %v998_v43  ;;  %v1016_v55 = vpack.c.bf16 %v1003_v49, %v1002_v45  ;;  %v1018_v56 = vpack.c.bf16 %v1007_v50, %v1006_v46  ;;  %v1020_v57 = vpack.c.bf16 %v1011_v51, %v1010_v47  ;;  %v600_v46 = vld [vmem:[%s5133_s19 + $0x18] sm:$0xff] }
 0x222   : > { %v936_v58 = vpop.f32.mrb[4].mxu0  ;;  %v4065_v59 = vpop.f32.mrb[0].mxu1  ;;  %4067 = vmatprep.subr.bf16.mxu0 %v994_v52 }
 0x223   : > { %v937_v60 = vadd.f32 %v936_v58, %v752_v27  ;;  %v938_v61 = vpop.f32.mrb[5].mxu0  ;;  %v979_v62 = vpop.f32.mrb[1].mxu1  ;;  %4068 = vmatpush3.bf16.xpose.msra.mxu0 %v994_v52  ;;  %4071 = vmatprep.mubr.bf16.mxu0 %v1014_v54  ;;  %v988_v63 = vadd.f32 %v4065_v59, %v760_v53  ;;  %v601_v54 = vld [vmem:[%s5133_s19 + $0x20] sm:$0xff] }
 0x224   : > { %v939_v2 = vadd.f32 %v938_v61, %v756_v28  ;;  %v940_v3 = vpop.f32.mrb[6].mxu0  ;;  %v4066_v4 = vpop.f32.mrb[2].mxu1  ;;  %v980_v8 = vadd.f32 %v979_v62, %v760_v53  ;;  %v603_v61 = vld [vmem:[%s5133_s19 + $0x30] sm:$0xff] }
 0x225   : > { %v1000_v7 = vmul.f32 %v5252_v31, %v937_v60  ;;  %v941_v9 = vadd.f32 %v940_v3, %v752_v27  ;;  %v991_v0 = vadd.f32 %v4066_v4, %v760_v53  ;;  %v942_v10 = vpop.f32.mrb[7].mxu0  ;;  %v982_v11 = vpop.f32.mrb[3].mxu1  ;;  %v1004_v14 = vmul.f32 %v5254_v33, %v937_v60  ;;  %v604_v4 = vld [vmem:[%s5133_s19 + $0x38] sm:$0xff] }
 0x226   : > { %v943_v12 = vadd.f32 %v942_v10, %v756_v28  ;;  %v983_v13 = vadd.f32 %v982_v11, %v760_v53  ;;  %v1008_v15 = vmul.f32 %v5256_v34, %v937_v60  ;;  %v1012_v21 = vmul.f32 %v5258_v35, %v937_v60  ;;  %v602_v60 = vld [vmem:[%s5133_s19 + $0x28] sm:$0xff] }
 0x227   : > { %v1001_v16 = vmul.f32 %v5252_v31, %v941_v9  ;;  %v997_v17 = vpack.c.bf16 %v991_v0, %v988_v63  ;;  %v1005_v18 = vmul.f32 %v5254_v33, %v941_v9  ;;  %v1009_v1 = vmul.f32 %v5256_v34, %v941_v9 }
 0x228   : > { %v995_v19 = vpack.c.bf16 %v943_v12, %v939_v2  ;;  %v996_v20 = vpack.c.bf16 %v983_v13, %v980_v8  ;;  %v1013_v22 = vmul.f32 %v5258_v35, %v941_v9  ;;  %v605_v13 = vld [vmem:[%s5133_s19 + $0x40] sm:$0xff] }
 0x229   : > { %v1015_v5 = vpack.c.bf16 %v1001_v16, %v1000_v7  ;;  %v1017_v6 = vpack.c.bf16 %v1005_v18, %v1004_v14  ;;  %v1019_v25 = vpack.c.bf16 %v1009_v1, %v1008_v15  ;;  %v606_v1 = vld [vmem:[%s5133_s19 + $0x48] sm:$0xff] }
 0x22a   : > { %4069 = vmatprep.subr.bf16.mxu0 %v995_v19  ;;  %4087 = vmatprep.subr.bf16.mxu1 %v996_v20  ;;  %v1021_v27 = vpack.c.bf16 %v1013_v22, %v1012_v21 }
 0x22b   : > { %4070 = vmatpush3.bf16.xpose.msra.mxu0 %v995_v19  ;;  %4088 = vmatpush3.bf16.msra.mxu1 %v996_v20  ;;  %v607_v19 = vld [vmem:[%s5133_s19 + $0x50] sm:$0xff] }
 0x22c   : > { %4089 = vmatprep.subr.bf16.mxu1 %v997_v17 }
 0x22f   : > { %4090 = vmatpush3.bf16.msra.mxu1 %v997_v17 }
 0x232   : > { %4072 = vmatmul.mubr.bf16.vlgmr.msra.gmra.mrb[8].mxu0 %v1015_v5 }
 0x233   : > { %4075 = vmatprep.mubr.bf16.mxu0 %v1016_v55 }
 0x23a   : > { %4076 = vmatmul.mubr.bf16.gmra.mrb[12].mxu0 %v1017_v6  ;;  %v608_v6 = vld [vmem:[%s5133_s19 + $0x58] sm:$0xff] }
 0x23b   : > { %4079 = vmatprep.mubr.bf16.mxu0 %v1018_v56 }
 0x242   : > { %4080 = vmatmul.mubr.bf16.gmra.mrb[16].mxu0 %v1019_v25 }
 0x243   : > { %4083 = vmatprep.mubr.bf16.mxu0 %v1020_v57 }
 0x24a   : > { %4084 = vmatmul.mubr.bf16.gmra.mrb[20].mxu0 %v1021_v27 }
 0x305   : > { %v4073_v28 = vpop.f32.mrb[8].mxu0 }
 0x306   : > { %v1056_v29 = vpop.f32.mrb[9].mxu0  ;;  %v1121_v36 = vmul.f32 0.35355338, %v4073_v28 }
 0x307   : > { %v1119_v37 = vmul.f32 0.35355338, %v1056_v29  ;;  %v4074_v38 = vpop.f32.mrb[10].mxu0 }
 0x308   : > { %v1059_v40 = vpop.f32.mrb[11].mxu0  ;;  %v1122_v43 = vmul.f32 0.35355338, %v4074_v38  ;;  %v5289_v49 = vadd.f32 %v1121_v36, %v599_v42  ;;  %v609_v38 = vld [vmem:[%s5133_s19 + $0x60] sm:$0xff] }
 0x309   : > { %v1120_v44 = vmul.f32 0.35355338, %v1059_v40  ;;  %v5282_v45 = vadd.f32 %v1119_v37, %v597_v32 }
 0x30a   : > { %v5293_v52 = vadd.f32 %v1122_v43, %v600_v46  ;;  %v1158_v58 = vsel %vm1151_vm8, %v5289_v49, -inf  ;;  %v610_v46 = vld [vmem:[%s5133_s19 + $0x68] sm:$0xff] }
 0x30b   : > { %v1152_v47 = vsel %vm1151_vm8, %v5282_v45, -inf  ;;  %v5287_v48 = vadd.f32 %v1120_v44, %v598_v41 }
 0x30c   : > { %1153 = vmax.xlane.f32.xlu0 %v1152_v47  ;;  %v1161_v2 = vsel %vm1151_vm8, %v5293_v52, -inf  ;;  %v611_v47 = vld [vmem:[%s5133_s19 + $0x70] sm:$0xff] }
 0x30d   : > { %v4077_v50 = vpop.f32.mrb[12].mxu0  ;;  %v1155_v51 = vsel %vm1151_vm8, %v5287_v48, -inf }
 0x30e   : > { %1156 = vmax.xlane.f32.xlu1 %v1155_v51  ;;  %v1072_v53 = vpop.f32.mrb[13].mxu0  ;;  %v1125_v55 = vmul.f32 0.35355338, %v4077_v50 }
 0x30f   : > { %v1123_v56 = vmul.f32 0.35355338, %v1072_v53  ;;  %v4078_v57 = vpop.f32.mrb[14].mxu0 }
 0x310   : > { %1159 = vmax.xlane.f32.xlu0 %v1158_v58  ;;  %v1075_v59 = vpop.f32.mrb[15].mxu0  ;;  %v1126_v62 = vmul.f32 0.35355338, %v4078_v57  ;;  %v5309_v9 = vadd.f32 %v1125_v55, %v603_v61  ;;  %v612_v55 = vld [vmem:[%s5133_s19 + $0x78] sm:$0xff] }
 0x311   : > { %v1124_v63 = vmul.f32 0.35355338, %v1075_v59  ;;  %v5302_v3 = vadd.f32 %v1123_v56, %v601_v54 }
 0x312   : > { %1162 = vmax.xlane.f32.xlu1 %v1161_v2  ;;  %v5313_v11 = vadd.f32 %v1126_v62, %v604_v4  ;;  %v1170_v17 = vsel %vm1151_vm8, %v5309_v9, -inf }
 0x313   : > { %v1164_v7 = vsel %vm1151_vm8, %v5302_v3, -inf  ;;  %v5307_v8 = vadd.f32 %v1124_v63, %v602_v60 }
 0x314   : > { %1165 = vmax.xlane.f32.xlu0 %v1164_v7  ;;  %v1173_v22 = vsel %vm1151_vm8, %v5313_v11, -inf }
 0x315   : > { %v4081_v0 = vpop.f32.mrb[16].mxu0  ;;  %v1167_v10 = vsel %vm1151_vm8, %v5307_v8, -inf }
 0x316   : > { %1168 = vmax.xlane.f32.xlu1 %v1167_v10  ;;  %v1088_v12 = vpop.f32.mrb[17].mxu0  ;;  %v1129_v14 = vmul.f32 0.35355338, %v4081_v0 }
 0x317   : > { %v1127_v15 = vmul.f32 0.35355338, %v1088_v12  ;;  %v4082_v16 = vpop.f32.mrb[18].mxu0 }
 0x318   : > { %1171 = vmax.xlane.f32.xlu0 %v1170_v17  ;;  %v1091_v18 = vpop.f32.mrb[19].mxu0  ;;  %v1130_v20 = vmul.f32 0.35355338, %v4082_v16  ;;  %v5329_v28 = vadd.f32 %v1129_v14, %v607_v19 }
 0x319   : > { %v1128_v21 = vmul.f32 0.35355338, %v1091_v18  ;;  %v5322_v5 = vadd.f32 %v1127_v15, %v605_v13 }
 0x31a   : > { %1174 = vmax.xlane.f32.xlu1 %v1173_v22  ;;  %v5333_v36 = vadd.f32 %v1130_v20, %v608_v6  ;;  %v1182_v43 = vsel %vm1151_vm8, %v5329_v28, -inf }
 0x31b   : > { %v1176_v25 = vsel %vm1151_vm8, %v5322_v5, -inf  ;;  %v5327_v27 = vadd.f32 %v1128_v21, %v606_v1 }
 0x31c   : > { %1177 = vmax.xlane.f32.xlu0 %v1176_v25  ;;  %v1185_v53 = vsel %vm1151_vm8, %v5333_v36, -inf }
 0x31d   : > { %v4085_v29 = vpop.f32.mrb[20].mxu0  ;;  %v1179_v32 = vsel %vm1151_vm8, %v5327_v27, -inf }
 0x31e   : > { %1180 = vmax.xlane.f32.xlu1 %v1179_v32  ;;  %v1104_v37 = vpop.f32.mrb[21].mxu0  ;;  %v1133_v40 = vmul.f32 0.35355338, %v4085_v29 }
 0x31f   : > { %v1131_v41 = vmul.f32 0.35355338, %v1104_v37  ;;  %v4086_v42 = vpop.f32.mrb[22].mxu0 }
 0x320   : > { %1183 = vmax.xlane.f32.xlu0 %v1182_v43  ;;  %v1107_v44 = vpop.f32.mrb[23].mxu0  ;;  %v1134_v50 = vmul.f32 0.35355338, %v4086_v42  ;;  %v5349_v58 = vadd.f32 %v1133_v40, %v611_v47 }
 0x321   : > { %v1132_v51 = vmul.f32 0.35355338, %v1107_v44  ;;  %v5342_v54 = vadd.f32 %v1131_v41, %v609_v38 }
 0x322   : > { %1186 = vmax.xlane.f32.xlu1 %v1185_v53  ;;  %v5353_v60 = vadd.f32 %v1134_v50, %v612_v55  ;;  %v1194_v61 = vsel %vm1151_vm8, %v5349_v58, -inf }
 0x323   : > { %v1188_v56 = vsel %vm1151_vm8, %v5342_v54, -inf  ;;  %v5347_v57 = vadd.f32 %v1132_v51, %v610_v46 }
 0x324   : > { %1189 = vmax.xlane.f32.xlu0 %v1188_v56  ;;  %v1197_v62 = vsel %vm1151_vm8, %v5353_v60, -inf }
 0x325   : > { %v1191_v59 = vsel %vm1151_vm8, %v5347_v57, -inf }
 0x326   : > { %1192 = vmax.xlane.f32.xlu1 %v1191_v59 }
 0x328   : > { %1195 = vmax.xlane.f32.xlu0 %v1194_v61 }
 0x32a   : > { %1198 = vmax.xlane.f32.xlu1 %v1197_v62 }
 0x399   : > { %v1154_v63 = vpop.xlane.xlu0 %1153 }
 0x39a   : > { %v1200_v2 = vsub.f32 %v5282_v45, %v1154_v63 }
 0x39b   : > { %v1157_v4 = vpop.xlane.xlu1 %1156 }
 0x39c   : > { %v1216_v7 = vmul.f32 1.442695, %v1200_v2  ;;  %v1201_v0 = vsub.f32 %v5287_v48, %v1157_v4 }
 0x39d   : > { %v1160_v10 = vpop.xlane.xlu0 %1159 }
 0x39e   : > { %4501 = vpow2.f32 %v1216_v7  ;;  %v1218_v12 = vmul.f32 1.442695, %v1201_v0  ;;  %v1202_v13 = vsub.f32 %v5289_v49, %v1160_v10 }
 0x39f   : > { %v1163_v14 = vpop.xlane.xlu1 %1162 }
 0x3a0   : > { %4503 = vpow2.f32 %v1218_v12  ;;  %v1220_v15 = vmul.f32 1.442695, %v1202_v13  ;;  %v1203_v16 = vsub.f32 %v5293_v52, %v1163_v14 }
 0x3a1   : > { %v1166_v17 = vpop.xlane.xlu0 %1165 }
 0x3a2   : > { %4505 = vpow2.f32 %v1220_v15  ;;  %v1222_v18 = vmul.f32 1.442695, %v1203_v16  ;;  %v1204_v1 = vsub.f32 %v5302_v3, %v1166_v17 }
 0x3a3   : > { %v1169_v45 = vpop.xlane.xlu1 %1168 }
 0x3a4   : > { %4507 = vpow2.f32 %v1222_v18  ;;  %v1224_v19 = vmul.f32 1.442695, %v1204_v1  ;;  %v1205_v48 = vsub.f32 %v5307_v8, %v1169_v45 }
 0x3a5   : > { %v1172_v20 = vpop.xlane.xlu0 %1171 }
 0x3a6   : > { %4509 = vpow2.f32 %v1224_v19  ;;  %v1226_v21 = vmul.f32 1.442695, %v1205_v48  ;;  %v1206_v49 = vsub.f32 %v5309_v9, %v1172_v20 }
 0x3a7   : > { %v1175_v22 = vpop.xlane.xlu1 %1174 }
 0x3a8   : > { %v5366_v6 = vpop.eup %4501  ;;  %4511 = vpow2.f32 %v1226_v21  ;;  %v1228_v52 = vmul.f32 1.442695, %v1206_v49  ;;  %v1207_v25 = vsub.f32 %v5313_v11, %v1175_v22 }
 0x3a9   : > { %v1178_v29 = vpop.xlane.xlu0 %1177  ;;  %v1248_v3 = vsel %vm1151_vm8, %v5366_v6, 0.0 }
 0x3aa   : > { %v5371_v32 = vpop.eup %4503  ;;  %4513 = vpow2.f32 %v1228_v52  ;;  %v1230_v8 = vmul.f32 1.442695, %v1207_v25  ;;  %v1208_v37 = vsub.f32 %v5322_v5, %v1178_v29  ;;  %1249 = vadd.xlane.f32.xlu0 %v1248_v3 }
 0x3ab   : > { %v1181_v38 = vpop.xlane.xlu1 %1180  ;;  %v1251_v9 = vsel %vm1151_vm8, %v5371_v32, 0.0 }
 0x3ac   : > { %v5376_v40 = vpop.eup %4505  ;;  %4515 = vpow2.f32 %v1230_v8  ;;  %v1232_v41 = vmul.f32 1.442695, %v1208_v37  ;;  %v1209_v11 = vsub.f32 %v5327_v27, %v1181_v38  ;;  %1252 = vadd.xlane.f32.xlu1 %v1251_v9 }
 0x3ad   : > { %v1184_v42 = vpop.xlane.xlu0 %1183  ;;  %v1254_v43 = vsel %vm1151_vm8, %v5376_v40, 0.0 }
 0x3ae   : > { %v5381_v44 = vpop.eup %4507  ;;  %4517 = vpow2.f32 %v1232_v41  ;;  %v1234_v5 = vmul.f32 1.442695, %v1209_v11  ;;  %v1210_v46 = vsub.f32 %v5329_v28, %v1184_v42  ;;  %1255 = vadd.xlane.f32.xlu0 %v1254_v43 }
 0x3af   : > { %v1187_v47 = vpop.xlane.xlu1 %1186  ;;  %v1257_v50 = vsel %vm1151_vm8, %v5381_v44, 0.0 }
 0x3b0   : > { %v5386_v51 = vpop.eup %4509  ;;  %4519 = vpow2.f32 %v1234_v5  ;;  %v1236_v27 = vmul.f32 1.442695, %v1210_v46  ;;  %v1211_v53 = vsub.f32 %v5333_v36, %v1187_v47  ;;  %1258 = vadd.xlane.f32.xlu1 %v1257_v50 }
 0x3b1   : > { %v1190_v55 = vpop.xlane.xlu0 %1189  ;;  %v1260_v56 = vsel %vm1151_vm8, %v5386_v51, 0.0 }
 0x3b2   : > { %v5391_v59 = vpop.eup %4511  ;;  %4521 = vpow2.f32 %v1236_v27  ;;  %v1238_v28 = vmul.f32 1.442695, %v1211_v53  ;;  %v1212_v61 = vsub.f32 %v5342_v54, %v1190_v55  ;;  %1261 = vadd.xlane.f32.xlu0 %v1260_v56 }
 0x3b3   : > { %v1193_v62 = vpop.xlane.xlu1 %1192  ;;  %v1263_v63 = vsel %vm1151_vm8, %v5391_v59, 0.0 }
 0x3b4   : > { %v5396_v2 = vpop.eup %4513  ;;  %4523 = vpow2.f32 %v1238_v28  ;;  %v1240_v36 = vmul.f32 1.442695, %v1212_v61  ;;  %v1213_v4 = vsub.f32 %v5347_v57, %v1193_v62  ;;  %1264 = vadd.xlane.f32.xlu1 %v1263_v63 }
 0x3b5   : > { %v1196_v7 = vpop.xlane.xlu0 %1195  ;;  %v1266_v0 = vsel %vm1151_vm8, %v5396_v2, 0.0 }
 0x3b6   : > { %v5401_v10 = vpop.eup %4515  ;;  %4525 = vpow2.f32 %v1240_v36  ;;  %v1242_v54 = vmul.f32 1.442695, %v1213_v4  ;;  %v1214_v12 = vsub.f32 %v5349_v58, %v1196_v7  ;;  %1267 = vadd.xlane.f32.xlu0 %v1266_v0 }
 0x3b7   : > { %v1199_v13 = vpop.xlane.xlu1 %1198  ;;  %v1269_v14 = vsel %vm1151_vm8, %v5401_v10, 0.0 }
 0x3b8   : > { %v5406_v15 = vpop.eup %4517  ;;  %4527 = vpow2.f32 %v1242_v54  ;;  %v1244_v57 = vmul.f32 1.442695, %v1214_v12  ;;  %v1215_v16 = vsub.f32 %v5353_v60, %v1199_v13  ;;  %1270 = vadd.xlane.f32.xlu1 %v1269_v14 }
 0x3b9   : > { %v1272_v17 = vsel %vm1151_vm8, %v5406_v15, 0.0 }
 0x3ba   : > { %v5411_v18 = vpop.eup %4519  ;;  %4529 = vpow2.f32 %v1244_v57  ;;  %v1246_v1 = vmul.f32 1.442695, %v1215_v16  ;;  %1273 = vadd.xlane.f32.xlu0 %v1272_v17 }
 0x3bb   : > { %v1275_v58 = vsel %vm1151_vm8, %v5411_v18, 0.0 }
 0x3bc   : > { %v5415_v45 = vpop.eup %4521  ;;  %4531 = vpow2.f32 %v1246_v1  ;;  %1276 = vadd.xlane.f32.xlu1 %v1275_v58 }
 0x3bd   : > { %v1278_v19 = vsel %vm1151_vm8, %v5415_v45, 0.0 }
 0x3be   : > { %v5419_v60 = vpop.eup %4523  ;;  %1279 = vadd.xlane.f32.xlu0 %v1278_v19 }
 0x3bf   : > { %v1281_v48 = vsel %vm1151_vm8, %v5419_v60, 0.0 }
 0x3c0   : > { %v5423_v20 = vpop.eup %4525  ;;  %1282 = vadd.xlane.f32.xlu1 %v1281_v48 }
 0x3c1   : > { %v1284_v21 = vsel %vm1151_vm8, %v5423_v20, 0.0 }
 0x3c2   : > { %v5427_v49 = vpop.eup %4527  ;;  %1285 = vadd.xlane.f32.xlu0 %v1284_v21 }
 0x3c3   : > { %v1287_v22 = vsel %vm1151_vm8, %v5427_v49, 0.0 }
 0x3c4   : > { %v5431_v52 = vpop.eup %4529  ;;  %1288 = vadd.xlane.f32.xlu1 %v1287_v22 }
 0x3c5   : > { %v1290_v25 = vsel %vm1151_vm8, %v5431_v52, 0.0 }
 0x3c6   : > { %v5435_v29 = vpop.eup %4531  ;;  %1291 = vadd.xlane.f32.xlu0 %v1290_v25 }
 0x3c7   : > { %v1293_v3 = vsel %vm1151_vm8, %v5435_v29, 0.0 }
 0x3c8   : > { %1294 = vadd.xlane.f32.xlu1 %v1293_v3 }
 0x437   : > { %v1250_v8 = vpop.xlane.xlu0 %1249 }
 0x438   : > { %4533 = vrcp.f32 %v1250_v8 }
 0x439   : > { %v1253_v37 = vpop.xlane.xlu1 %1252 }
 0x43a   : > { %4535 = vrcp.f32 %v1253_v37 }
 0x43b   : > { %v1256_v38 = vpop.xlane.xlu0 %1255 }
 0x43c   : > { %4537 = vrcp.f32 %v1256_v38 }
 0x43d   : > { %v1259_v9 = vpop.xlane.xlu1 %1258 }
 0x43e   : > { %4539 = vrcp.f32 %v1259_v9 }
 0x43f   : > { %v1262_v41 = vpop.xlane.xlu0 %1261 }
 0x440   : > { %4541 = vrcp.f32 %v1262_v41 }
 0x441   : > { %v1265_v11 = vpop.xlane.xlu1 %1264 }
 0x442   : > { %v4534_v42 = vpop.eup %4533  ;;  %4543 = vrcp.f32 %v1265_v11  ;;  %v4405_v11 = vld [vmem:[%s5220_s12] sm:$0xff]  }
 0x443   : > { %v1268_v43 = vpop.xlane.xlu0 %1267  ;;  %v1312_v47 = vmul.f32 %v4534_v42, %v5366_v6  ;;  %4107 = vmatprep.subr.bf16.mxu1 %v4405_v11  ;;  %v4408_v42 = vld [vmem:[%s5220_s12 + $0x18] sm:$0xff]  }
 0x444   : > { %v4536_v5 = vpop.eup %4535  ;;  %4545 = vrcp.f32 %v1268_v43  ;;  %v4411_v43 = vld [vmem:[%s5220_s12 + $0x30] sm:$0xff]  }
 0x445   : > { %v1271_v46 = vpop.xlane.xlu1 %1270  ;;  %v1313_v50 = vmul.f32 %v4536_v5, %v5371_v32  ;;  %v4412_v5 = vld [vmem:[%s5220_s12 + $0x38] sm:$0xff]  }
 0x446   : > { %v4538_v27 = vpop.eup %4537  ;;  %4547 = vrcp.f32 %v1271_v46 }
 0x447   : > { %v1274_v53 = vpop.xlane.xlu0 %1273  ;;  %v1328_v55 = vpack.c.bf16 %v1313_v50, %v1312_v47  ;;  %v1314_v28 = vmul.f32 %v4538_v27, %v5376_v40 }
 0x448   : > { %v4540_v56 = vpop.eup %4539  ;;  %4549 = vrcp.f32 %v1274_v53 }
 0x449   : > { %v1315_v61 = vmul.f32 %v4540_v56, %v5381_v44  ;;  %4091 = vmatprep.mubr.msk.bf16.mxu1 %vm1151_vm8, %v1328_v55  ;;  %v1277_v62 = vpop.xlane.xlu1 %1276 }
 0x44a   : > { %v4542_v63 = vpop.eup %4541  ;;  %4551 = vrcp.f32 %v1277_v62 }
 0x44b   : > { %v1280_v36 = vpop.xlane.xlu0 %1279  ;;  %v1329_v4 = vpack.c.bf16 %v1315_v61, %v1314_v28  ;;  %v1316_v7 = vmul.f32 %v4542_v63, %v5386_v51 }
 0x44c   : > { %v4544_v6 = vpop.eup %4543  ;;  %4553 = vrcp.f32 %v1280_v36 }
 0x44d   : > { %4092 = vmatmul.mubr.msk.bf16.vlgmr.msra.gmra.mrb[4].mxu1 %vm1151_vm8, %v1329_v4  ;;  %v1283_v32 = vpop.xlane.xlu1 %1282  ;;  %v1317_v0 = vmul.f32 %v4544_v6, %v5391_v59 }
 0x44e   : > { %v4546_v54 = vpop.eup %4545  ;;  %4555 = vrcp.f32 %v1283_v32  ;;  %4108 = vmatpush3.bf16.msra.mxu1 %v4405_v11 }
 0x44f   : > { %v1286_v40 = vpop.xlane.xlu0 %1285  ;;  %v1330_v44 = vpack.c.bf16 %v1317_v0, %v1316_v7  ;;  %v1318_v14 = vmul.f32 %v4546_v54, %v5396_v2 }
 0x450   : > { %v4548_v12 = vpop.eup %4547  ;;  %4557 = vrcp.f32 %v1286_v40 }
 0x451   : > { %4095 = vmatprep.mubr.msk.bf16.mxu1 %vm1151_vm8, %v1330_v44  ;;  %v1289_v13 = vpop.xlane.xlu1 %1288  ;;  %v1319_v57 = vmul.f32 %v4548_v12, %v5401_v10 }
 0x452   : > { %v4550_v16 = vpop.eup %4549  ;;  %4559 = vrcp.f32 %v1289_v13 }
 0x453   : > { %v1292_v17 = vpop.xlane.xlu0 %1291  ;;  %v1331_v1 = vpack.c.bf16 %v1319_v57, %v1318_v14  ;;  %v1320_v58 = vmul.f32 %v4550_v16, %v5406_v15 }
 0x454   : > { %v4552_v51 = vpop.eup %4551  ;;  %4561 = vrcp.f32 %v1292_v17 }
 0x455   : > { %4096 = vmatmul.mubr.msk.bf16.gmra.mrb[8].mxu1 %vm1151_vm8, %v1331_v1  ;;  %v1295_v59 = vpop.xlane.xlu1 %1294  ;;  %v1321_v19 = vmul.f32 %v4552_v51, %v5411_v18 }
 0x456   : > { %v4554_v48 = vpop.eup %4553  ;;  %4563 = vrcp.f32 %v1295_v59 }
 0x457   : > { %v1332_v21 = vpack.c.bf16 %v1321_v19, %v1320_v58  ;;  %v1322_v2 = vmul.f32 %v4554_v48, %v5415_v45 }
 0x458   : > { %v4556_v22 = vpop.eup %4555 }
 0x459   : > { %4099 = vmatprep.mubr.msk.bf16.mxu1 %vm1151_vm8, %v1332_v21  ;;  %v1323_v10 = vmul.f32 %v4556_v22, %v5419_v60 }
 0x45a   : > { %v4558_v25 = vpop.eup %4557 }
 0x45b   : > { %v1333_v3 = vpack.c.bf16 %v1323_v10, %v1322_v2  ;;  %v1324_v15 = vmul.f32 %v4558_v25, %v5423_v20  ;;  %v4406_v20 = vld [vmem:[%s5220_s12 + $0x8] sm:$0xff]  }
 0x45c   : > { %v4560_v8 = vpop.eup %4559  ;;  %4109 = vmatprep.subr.bf16.mxu1 %v4406_v20 }
 0x45d   : > { %4100 = vmatmul.mubr.msk.bf16.gmra.mrb[12].mxu1 %vm1151_vm8, %v1333_v3  ;;  %v1325_v18 = vmul.f32 %v4560_v8, %v5427_v49  ;;  %v4407_v49 = vld [vmem:[%s5220_s12 + $0x10] sm:$0xff]  }
 0x45e   : > { %v4562_v37 = vpop.eup %4561  ;;  %4110 = vmatpush3.bf16.msra.mxu1 %v4406_v20 }
 0x45f   : > { %v1334_v38 = vpack.c.bf16 %v1325_v18, %v1324_v15  ;;  %v1326_v45 = vmul.f32 %v4562_v37, %v5431_v52  ;;  %4111 = vmatprep.subr.bf16.mxu1 %v4407_v49  ;;  %v4409_v52 = vld [vmem:[%s5220_s12 + $0x20] sm:$0xff]  }
 0x460   : > { %v4564_v9 = vpop.eup %4563 }
 0x461   : > { %4103 = vmatprep.mubr.msk.bf16.mxu1 %vm1151_vm8, %v1334_v38  ;;  %v1327_v60 = vmul.f32 %v4564_v9, %v5435_v29  ;;  %v4410_v29 = vld [vmem:[%s5220_s12 + $0x28] sm:$0xff]  }
 0x462   : > { %4112 = vmatpush3.bf16.msra.mxu1 %v4407_v49 }
 0x463   : > { %v1335_v41 = vpack.c.bf16 %v1327_v60, %v1326_v45  ;;  %4113 = vmatprep.subr.bf16.mxu1 %v4408_v42 }
 0x465   : > { %4104 = vmatmul.mubr.msk.bf16.gmra.mrb[16].mxu1 %vm1151_vm8, %v1335_v41  ;;  %v3716_v41 = vld [vmem:[%s5229_s23 + $0x2] ss:$0 sm:$0xff] }
 0x466   : > { %4114 = vmatpush3.bf16.msra.mxu1 %v4408_v42 }
 0x467   : > { %4115 = vmatprep.subr.bf16.mxu1 %v4409_v52 }
 0x46a   : > { %4116 = vmatpush3.bf16.msra.mxu1 %v4409_v52  ;;  %v4677_v52 = vld [vmem:[%s5164_s11 + $0x10] sm:$0xff] }
 0x46b   : > { %4117 = vmatprep.subr.bf16.mxu1 %v4410_v29 }
 0x46e   : > { %4118 = vmatpush3.bf16.msra.mxu1 %v4410_v29 }
 0x46f   : > { %4119 = vmatprep.subr.bf16.mxu1 %v4411_v43 }
 0x472   : > { %4120 = vmatpush3.bf16.msra.mxu1 %v4411_v43 }
 0x473   : > { %4121 = vmatprep.subr.bf16.mxu1 %v4412_v5 }
 0x476   : > { %4122 = vmatpush3.bf16.msra.mxu1 %v4412_v5 }
 0x520   : > { %v4093_v46 = vpop.f32.mrb[4].mxu1 }
 0x521   : > { %v1394_v47 = vpop.f32.mrb[5].mxu1  ;;  %v1459_v55 = vmul.f32 %v4093_v46, %v5252_v31 }
 0x522   : > { %v4094_v50 = vpop.f32.mrb[6].mxu1  ;;  %v1457_v61 = vmul.f32 %v5252_v31, %v1394_v47  ;;  %v4678_v47 = vld [vmem:[%s5164_s11 + $0x18] sm:$0xff] }
 0x523   : > { %v1397_v27 = vpop.f32.mrb[7].mxu1  ;;  %v1460_v36 = vmul.f32 %v4094_v50, %v5252_v31 }
 0x524   : > { %v1458_v7 = vmul.f32 %v5252_v31, %v1397_v27 }
 0x528   : > { %v4097_v53 = vpop.f32.mrb[8].mxu1 }
 0x529   : > { %v1463_v56 = vmul.f32 %v4097_v53, %v5254_v33  ;;  %v1410_v28 = vpop.f32.mrb[9].mxu1  ;;  %v4679_v53 = vld [vmem:[%s5164_s11] sm:$0xff] }
 0x52a   : > { %v1461_v62 = vmul.f32 %v5254_v33, %v1410_v28  ;;  %v4098_v63 = vpop.f32.mrb[10].mxu1 }
 0x52b   : > { %v1467_v4 = vadd.f32 %v1463_v56, %v1459_v55  ;;  %v1464_v6 = vmul.f32 %v4098_v63, %v5254_v33  ;;  %v1413_v32 = vpop.f32.mrb[11].mxu1  ;;  %v4680_v56 = vld [vmem:[%s5164_s11 + $0x8] sm:$0xff]  ;;  %s591_s11 = scalar_lea.vmem %s5961_s10, %s3914_s28 }
 0x52c   : > { %v1465_v0 = vadd.f32 %v1461_v62, %v1457_v61  ;;  %v1462_v54 = vmul.f32 %v5254_v33, %v1413_v32  ;;  %v4415_v32 = vld [vmem:[%s5146_s25 + $0x10] sm:$0xff]  }
 0x52d   : > { %v1468_v40 = vadd.f32 %v1464_v6, %v1460_v36  ;;  %v4414_v6 = vld [vmem:[%s5146_s25 + $0x8] sm:$0xff]  }
 0x52e   : > { %v1466_v44 = vadd.f32 %v1462_v54, %v1458_v7  ;;  %v4416_v7 = vld [vmem:[%s5146_s25 + $0x18] sm:$0xff]   ;;  %v4418_v54 = vld [vmem:[%s5146_s25 + $0x28] sm:$0xff]  }
 0x530   : > { %v4101_v12 = vpop.f32.mrb[12].mxu1 }
 0x531   : > { %v1471_v13 = vmul.f32 %v4101_v12, %v5256_v34  ;;  %v1426_v14 = vpop.f32.mrb[13].mxu1 }
 0x532   : > { %v1469_v57 = vmul.f32 %v5256_v34, %v1426_v14  ;;  %v4102_v16 = vpop.f32.mrb[14].mxu1 }
 0x533   : > { %v1475_v17 = vadd.f32 %v1471_v13, %v1467_v4  ;;  %v1472_v1 = vmul.f32 %v4102_v16, %v5256_v34  ;;  %v1429_v51 = vpop.f32.mrb[15].mxu1  ;;  %v4413_v4 = vld [vmem:[%s5146_s25] sm:$0xff]  }
 0x534   : > { %v1473_v59 = vadd.f32 %v1469_v57, %v1465_v0  ;;  %v1470_v58 = vmul.f32 %v5256_v34, %v1429_v51  ;;  %4127 = vmatprep.subr.bf16.mxu0 %v4413_v4  ;;  %v4417_v0 = vld [vmem:[%s5146_s25 + $0x20] sm:$0xff]  }
 0x535   : > { %v1476_v19 = vadd.f32 %v1472_v1, %v1468_v40  ;;  %4128 = vmatpush3.bf16.msra.mxu0 %v4413_v4  ;;  %v4419_v40 = vld [vmem:[%s5146_s25 + $0x30] sm:$0xff]  }
 0x536   : > { %v1474_v48 = vadd.f32 %v1470_v58, %v1466_v44  ;;  %4129 = vmatprep.subr.bf16.mxu0 %v4414_v6  ;;  %v4420_v44 = vld [vmem:[%s5146_s25 + $0x38] sm:$0xff]  }
 0x538   : > { %v4105_v21 = vpop.f32.mrb[16].mxu1 }
 0x539   : > { %v1479_v22 = vmul.f32 %v4105_v21, %v5258_v35  ;;  %v1442_v2 = vpop.f32.mrb[17].mxu1  ;;  %4130 = vmatpush3.bf16.msra.mxu0 %v4414_v6 }
 0x53a   : > { %v1477_v10 = vmul.f32 %v5258_v35, %v1442_v2  ;;  %v4106_v25 = vpop.f32.mrb[18].mxu1  ;;  %4131 = vmatprep.subr.bf16.mxu0 %v4415_v32 }
 0x53b   : > { %v1483_v3 = vadd.f32 %v1479_v22, %v1475_v17  ;;  %v1480_v8 = vmul.f32 %v4106_v25, %v5258_v35  ;;  %v1445_v15 = vpop.f32.mrb[19].mxu1 }
 0x53c   : > { %v1481_v18 = vadd.f32 %v1477_v10, %v1473_v59  ;;  %v1478_v37 = vmul.f32 %v5258_v35, %v1445_v15 }
 0x53d   : > { %v1484_v38 = vadd.f32 %v1480_v8, %v1476_v19  ;;  %4132 = vmatpush3.bf16.msra.mxu0 %v4415_v32 }
 0x53e   : > { %v1482_v9 = vadd.f32 %v1478_v37, %v1474_v48  ;;  %4133 = vmatprep.subr.bf16.mxu0 %v4416_v7 }
 0x53f   : > { %v1486_v45 = vpack.c.bf16 %v1484_v38, %v1483_v3 }
 0x540   : > { %v1485_v60 = vpack.c.bf16 %v1482_v9, %v1481_v18 }
 0x541   : > { %4134 = vmatpush3.bf16.msra.mxu0 %v4416_v7 }
 0x542   : > { %4123 = vmatprep.mubr.bf16.mxu1 %v1485_v60  ;;  %4135 = vmatprep.subr.bf16.mxu0 %v4417_v0 }
 0x543   : > { %4124 = vmatmul.mubr.bf16.vlgmr.msra.gmra.mrb[20].mxu1 %v1486_v45 }
 0x545   : > { %4136 = vmatpush3.bf16.msra.mxu0 %v4417_v0 }
 0x546   : > { %4137 = vmatprep.subr.bf16.mxu0 %v4418_v54 }
 0x549   : > { %4138 = vmatpush3.bf16.msra.mxu0 %v4418_v54 }
 0x54a   : > { %4139 = vmatprep.subr.bf16.mxu0 %v4419_v40 }
 0x54d   : > { %4140 = vmatpush3.bf16.msra.mxu0 %v4419_v40 }
 0x54e   : > { %4141 = vmatprep.subr.bf16.mxu0 %v4420_v44 }
 0x551   : > { %4142 = vmatpush3.bf16.msra.mxu0 %v4420_v44 }
 0x616   : > { %v4125_v11 = vpop.f32.mrb[20].mxu1 }
 0x617   : > { %v1598_v20 = vadd.f32 %v4125_v11, %v3716_v41  ;;  %v1589_v49 = vpop.f32.mrb[21].mxu1 }
 0x618   : > { %v4126_v42 = vpop.f32.mrb[22].mxu1  ;;  %v1590_v43 = vadd.f32 %v3716_v41, %v1589_v49 }
 0x619   : > { %v5489_v29 = vadd.f32 %v4677_v52, %v1598_v20  ;;  %v1601_v5 = vadd.f32 %v4126_v42, %v3716_v41  ;;  %v1592_v46 = vpop.f32.mrb[23].mxu1  ;;  %v3725_v42 = vld [vmem:[%s5229_s23 + $0x3] ss:$0 sm:$0xff] }
 0x61a   : > { %v1593_v27 = vadd.f32 %v3716_v41, %v1592_v46  ;;  %v5496_v55 = vadd.f32 %v4679_v53, %v1590_v43 }
 0x61b   : > { %v5492_v50 = vadd.f32 %v4678_v47, %v1601_v5  ;;  %1612 = vadd.xlane.f32.xlu0 %v5489_v29  ;;  %v1622_v63 = vmul.f32 %v5489_v29, %v5489_v29 }
 0x61c   : > { %v5500_v28 = vadd.f32 %v4680_v56, %v1593_v27  ;;  %v1620_v61 = vmul.f32 %v5496_v55, %v5496_v55  ;;  %v3726_v56 = vld [vmem:[%s5229_s23 + $0x4] ss:$0 sm:$0xff] }
 0x61d   : > { %1614 = vadd.xlane.f32.xlu1 %v5492_v50  ;;  %v1623_v36 = vmul.f32 %v5492_v50, %v5492_v50 }
 0x61e   : > { %v1621_v62 = vmul.f32 %v5500_v28, %v5500_v28 }
 0x61f   : > { %1608 = vadd.xlane.f32.xlu0 %v5496_v55 }
 0x621   : > { %1610 = vadd.xlane.f32.xlu1 %v5500_v28 }
 0x623   : > { %1624 = vadd.xlane.f32.xlu0 %v1620_v61 }
 0x625   : > { %1626 = vadd.xlane.f32.xlu1 %v1621_v62 }
 0x627   : > { %1628 = vadd.xlane.f32.xlu0 %v1622_v63 }
 0x629   : > { %1630 = vadd.xlane.f32.xlu1 %v1623_v36 }
 0x6a8   : > { %v1613_v12 = vpop.xlane.xlu0 %1612 }
 0x6a9   : > { %v1618_v51 = vmul.f32 0.03125, %v1613_v12 }
 0x6aa   : > { %v1615_v13 = vpop.xlane.xlu1 %1614 }
 0x6ab   : > { %v1619_v19 = vmul.f32 0.03125, %v1615_v13  ;;  %v1638_v25 = vmul.f32 %v1618_v51, %v1618_v51  ;;  %v1646_v46 = vsub.f32 %v5489_v29, %v1618_v51  ;;  %v4421_v13 = vld [vmem:[%s5148_s26] sm:$0xff]   ;;  %v4427_v51 = vld [vmem:[%s5148_s26 + $0x30] sm:$0xff]  }
 0x6ac   : > { %v1609_v14 = vpop.xlane.xlu0 %1608  ;;  %4147 = vmatprep.subr.bf16.mxu1 %v4421_v13 }
 0x6ad   : > { %v1616_v57 = vmul.f32 0.03125, %v1609_v14  ;;  %v1639_v18 = vmul.f32 %v1619_v19, %v1619_v19  ;;  %v1647_v61 = vsub.f32 %v5492_v50, %v1619_v19  ;;  %4148 = vmatpush3.bf16.msra.mxu1 %v4421_v13  ;;  %v4422_v14 = vld [vmem:[%s5148_s26 + $0x8] sm:$0xff]  }
 0x6ae   : > { %v1611_v16 = vpop.xlane.xlu1 %1610  ;;  %4149 = vmatprep.subr.bf16.mxu1 %v4422_v14 }
 0x6af   : > { %v1617_v17 = vmul.f32 0.03125, %v1611_v16  ;;  %v1636_v59 = vmul.f32 %v1616_v57, %v1616_v57  ;;  %v1644_v20 = vsub.f32 %v5496_v55, %v1616_v57  ;;  %v4423_v57 = vld [vmem:[%s5148_s26 + $0x10] sm:$0xff]   ;;  %v4424_v16 = vld [vmem:[%s5148_s26 + $0x18] sm:$0xff]  }
 0x6b0   : > { %v1625_v1 = vpop.xlane.xlu0 %1624 }
 0x6b1   : > { %v1632_v58 = vmul.f32 0.03125, %v1625_v1  ;;  %v1637_v21 = vmul.f32 %v1617_v17, %v1617_v17  ;;  %v1645_v52 = vsub.f32 %v5500_v28, %v1617_v17  ;;  %4150 = vmatpush3.bf16.msra.mxu1 %v4422_v14  ;;  %v4425_v17 = vld [vmem:[%s5148_s26 + $0x20] sm:$0xff]   ;;  %v4426_v1 = vld [vmem:[%s5148_s26 + $0x28] sm:$0xff]  }
 0x6b2   : > { %v1627_v48 = vpop.xlane.xlu1 %1626  ;;  %4151 = vmatprep.subr.bf16.mxu1 %v4423_v57 }
 0x6b3   : > { %v1640_v22 = vsub.f32 %v1632_v58, %v1636_v59  ;;  %v1633_v2 = vmul.f32 0.03125, %v1627_v48  ;;  %v4428_v59 = vld [vmem:[%s5148_s26 + $0x38] sm:$0xff]   ;;  %v3727_v58 = vld [vmem:[%s5229_s23 + $0x5] ss:$0 sm:$0xff] }
 0x6b4   : > { %v1629_v10 = vpop.xlane.xlu0 %1628 }
 0x6b5   : > { %v1648_v3 = vadd.f32 1e-05, %v1640_v22  ;;  %v1641_v8 = vsub.f32 %v1633_v2, %v1637_v21  ;;  %v1634_v15 = vmul.f32 0.03125, %v1629_v10  ;;  %4152 = vmatpush3.bf16.msra.mxu1 %v4423_v57 }
 0x6b6   : > { %v1631_v37 = vpop.xlane.xlu1 %1630  ;;  %4153 = vmatprep.subr.bf16.mxu1 %v4424_v16 }
 0x6b7   : > { %4565 = vrsqrt.f32 %v1648_v3  ;;  %v1649_v38 = vadd.f32 1e-05, %v1641_v8  ;;  %v1642_v9 = vsub.f32 %v1634_v15, %v1638_v25  ;;  %v1635_v45 = vmul.f32 0.03125, %v1631_v37 }
 0x6b9   : > { %4567 = vrsqrt.f32 %v1649_v38  ;;  %v1650_v60 = vadd.f32 1e-05, %v1642_v9  ;;  %v1643_v41 = vsub.f32 %v1635_v45, %v1639_v18  ;;  %4154 = vmatpush3.bf16.msra.mxu1 %v4424_v16 }
 0x6ba   : > { %4155 = vmatprep.subr.bf16.mxu1 %v4425_v17 }
 0x6bb   : > { %4569 = vrsqrt.f32 %v1650_v60  ;;  %v1651_v11 = vadd.f32 1e-05, %v1643_v41 }
 0x6bd   : > { %4571 = vrsqrt.f32 %v1651_v11  ;;  %4156 = vmatpush3.bf16.msra.mxu1 %v4425_v17  ;;  %v4429_v17 = vld [vmem:[%s5140_s21 + $0xc0] ss:$12 sps:$4 sm:$0xff]  }
 0x6be   : > { %4157 = vmatprep.subr.bf16.mxu1 %v4426_v1 }
 0x6c1   : > { %v4566_v49 = vpop.eup %4565  ;;  %4158 = vmatpush3.bf16.msra.mxu1 %v4426_v1  ;;  %v4431_v1 = vld [vmem:[%s5140_s21 + $0xc4] ss:$12 sps:$4 sm:$0xff]  }
 0x6c2   : > { %v1656_v43 = vmul.f32 %v4566_v49, %v1644_v20  ;;  %4159 = vmatprep.subr.bf16.mxu1 %v4427_v51  ;;  %2211 = vmatprep.subr.bf16.mxu0 %v4431_v1 }
 0x6c3   : > { %v4568_v5 = vpop.eup %4567 }
 0x6c4   : > { %v1657_v47 = vmul.f32 %v4568_v5, %v1645_v52  ;;  %v1664_v27 = vmul.f32 %v3725_v42, %v1656_v43 }
 0x6c5   : > { %v4570_v53 = vpop.eup %4569  ;;  %4160 = vmatpush3.bf16.msra.mxu1 %v4427_v51  ;;  %v3736_v51 = vld [vmem:[%s5229_s23 + $0x6] ss:$0 sm:$0xff] }
 0x6c6   : > { %v1658_v62 = vmul.f32 %v4570_v53, %v1646_v46  ;;  %v1665_v63 = vmul.f32 %v3725_v42, %v1657_v47  ;;  %v1672_v6 = vadd.f32 %v3726_v56, %v1664_v27  ;;  %4161 = vmatprep.subr.bf16.mxu1 %v4428_v59 }
 0x6c7   : > { %v4572_v36 = vpop.eup %4571 }
 0x6c8   : > { %v1659_v4 = vmul.f32 %v4572_v36, %v1647_v61  ;;  %v1673_v32 = vadd.f32 %v3726_v56, %v1665_v63  ;;  %v1666_v7 = vmul.f32 %v3725_v42, %v1658_v62 }
 0x6c9   : > { %4162 = vmatpush3.bf16.msra.mxu1 %v4428_v59 }
 0x6ca   : > { %v1676_v0 = vpack.c.bf16 %v1673_v32, %v1672_v6  ;;  %v1667_v54 = vmul.f32 %v3725_v42, %v1659_v4  ;;  %v1674_v40 = vadd.f32 %v3726_v56, %v1666_v7 }
 0x6cc   : > { %4143 = vmatprep.mubr.bf16.mxu0 %v1676_v0  ;;  %v1675_v44 = vadd.f32 %v3726_v56, %v1667_v54 }
 0x6ce   : > { %v1677_v12 = vpack.c.bf16 %v1675_v44, %v1674_v40 }
 0x6d0   : > { %4144 = vmatmul.mubr.bf16.vlgmr.msra.gmra.mrb[24].mxu0 %v1677_v12 }
 0x6d1   : > { %2243 = vmatprep.mubr.bf16.mxu0 %v4871_v30  ;;  %2212 = vmatpush1.bf16.msra.mxu0 %v4429_v17 }
 0x7a3   : > { %v4145_v19 = vpop.f32.mrb[24].mxu0 }
 0x7a4   : > { %v1789_v48 = vadd.f32 %v4145_v19, %v3727_v58  ;;  %v1780_v21 = vpop.f32.mrb[25].mxu0 }
 0x7a5   : > { %v1781_v22 = vadd.f32 %v3727_v58, %v1780_v21  ;;  %v4146_v2 = vpop.f32.mrb[26].mxu0 }
 0x7a6   : > { %v1801_v10 = vmul.f32 0.044715, %v1789_v48  ;;  %v1792_v25 = vadd.f32 %v4146_v2, %v3727_v58  ;;  %v1783_v3 = vpop.f32.mrb[27].mxu0  ;;  %v1797_v6 = vmul.f32 0.5, %v1789_v48 }
 0x7a7   : > { %v1799_v8 = vmul.f32 0.044715, %v1781_v22  ;;  %v1784_v15 = vadd.f32 %v3727_v58, %v1783_v3  ;;  %v1795_v0 = vmul.f32 0.5, %v1781_v22 }
 0x7a8   : > { %v1805_v18 = vmul.f32 %v1801_v10, %v1789_v48  ;;  %v1802_v37 = vmul.f32 0.044715, %v1792_v25  ;;  %v1798_v32 = vmul.f32 0.5, %v1792_v25 }
 0x7a9   : > { %v1803_v38 = vmul.f32 %v1799_v8, %v1781_v22  ;;  %v1800_v9 = vmul.f32 0.044715, %v1784_v15  ;;  %v1796_v54 = vmul.f32 0.5, %v1784_v15 }
 0x7aa   : > { %v1809_v45 = vmul.f32 %v1805_v18, %v1789_v48  ;;  %v1806_v60 = vmul.f32 %v1802_v37, %v1792_v25 }
 0x7ab   : > { %v1807_v41 = vmul.f32 %v1803_v38, %v1781_v22  ;;  %v1804_v11 = vmul.f32 %v1800_v9, %v1784_v15  ;;  %v4432_v38 = vld [vmem:[%s5140_s21 + $0xd8] ss:$12 sps:$4 sm:$0xff]   ;;  %v4438_v9 = vld [vmem:[%s5140_s21 + $0xc8] ss:$12 sps:$4 sm:$0xff]  }
 0x7ac   : > { %v1813_v20 = vadd.f32 %v1809_v45, %v1789_v48  ;;  %v1810_v49 = vmul.f32 %v1806_v60, %v1792_v25  ;;  %v4435_v45 = vld [vmem:[%s5140_s21 + $0xf0] ss:$12 sps:$4 sm:$0xff]   ;;  %4167 = vmatprep.subr.bf16.mxu1 %v4438_v9  ;;  %v4441_v60 = vld [vmem:[%s5140_s21 + $0x10c] ss:$12 sps:$4 sm:$0xff]  }
 0x7ad   : > { %v1808_v42 = vmul.f32 %v1804_v11, %v1784_v15  ;;  %v1811_v52 = vadd.f32 %v1807_v41, %v1781_v22  ;;  %v4442_v41 = vld [vmem:[%s5140_s21 + $0xe0] ss:$12 sps:$4 sm:$0xff]   ;;  %v4439_v11 = vld [vmem:[%s5140_s21 + $0x108] ss:$12 sps:$4 sm:$0xff]  }
 0x7ae   : > { %v1817_v43 = vmul.f32 0.7978846, %v1813_v20  ;;  %v1814_v5 = vadd.f32 %v1810_v49, %v1792_v25  ;;  %v4445_v20 = vld [vmem:[%s5140_s21 + $0x124] ss:$12 sps:$4 sm:$0xff]  }
 0x7af   : > { %v1812_v46 = vadd.f32 %v1808_v42, %v1784_v15  ;;  %v1815_v47 = vmul.f32 0.7978846, %v1811_v52  ;;  %v4446_v49 = vld [vmem:[%s5140_s21 + $0xf8] ss:$12 sps:$4 sm:$0xff]   ;;  %v4443_v42 = vld [vmem:[%s5140_s21 + $0x120] ss:$12 sps:$4 sm:$0xff]  }
 0x7b0   : > { %4573 = vtanh.f32 %v1817_v43  ;;  %v1818_v27 = vmul.f32 0.7978846, %v1814_v5  ;;  %v4449_v52 = vld [vmem:[%s5140_s21 + $0x13c] ss:$12 sps:$4 sm:$0xff]   ;;  %v4447_v5 = vld [vmem:[%s5140_s21 + $0x138] ss:$12 sps:$4 sm:$0xff]  }
 0x7b1   : > { %v1816_v53 = vmul.f32 0.7978846, %v1812_v46  ;;  %4575 = vtanh.f32 %v1815_v47  ;;  %v4450_v43 = vld [vmem:[%s5140_s21 + $0x110] ss:$12 sps:$4 sm:$0xff]   ;;  %v4453_v46 = vld [vmem:[%s5140_s21 + $0x154] ss:$12 sps:$4 sm:$0xff]  }
 0x7b2   : > { %4577 = vtanh.f32 %v1818_v27  ;;  %v4454_v47 = vld [vmem:[%s5140_s21 + $0x128] ss:$12 sps:$4 sm:$0xff]   ;;  %v4451_v27 = vld [vmem:[%s5140_s21 + $0x150] ss:$12 sps:$4 sm:$0xff]  }
 0x7b3   : > { %4579 = vtanh.f32 %v1816_v53  ;;  %v4457_v53 = vld [vmem:[%s5140_s21 + $0x16c] ss:$12 sps:$4 sm:$0xff]  }
 0x7ba   : > { %v4574_v56 = vpop.eup %4573 }
 0x7bb   : > { %v4576_v61 = vpop.eup %4575  ;;  %v1825_v62 = vadd.f32 1.0, %v4574_v56  ;;  %v4458_v56 = vld [vmem:[%s5140_s21 + $0x140] ss:$12 sps:$4 sm:$0xff]  }
 0x7bc   : > { %v4578_v63 = vpop.eup %4577  ;;  %v1823_v36 = vadd.f32 1.0, %v4576_v61  ;;  %v4455_v61 = vld [vmem:[%s5140_s21 + $0x168] ss:$12 sps:$4 sm:$0xff]  }
 0x7bd   : > { %v4580_v4 = vpop.eup %4579  ;;  %v1826_v7 = vadd.f32 1.0, %v4578_v63  ;;  %v1829_v44 = vmul.f32 %v1825_v62, %v1797_v6  ;;  %v4459_v62 = vld [vmem:[%s5140_s21 + $0x158] ss:$12 sps:$4 sm:$0xff]   ;;  %v4460_v63 = vld [vmem:[%s5140_s21 + $0x170] ss:$12 sps:$4 sm:$0xff]  }
 0x7be   : > { %v1824_v40 = vadd.f32 1.0, %v4580_v4  ;;  %v1827_v13 = vmul.f32 %v1823_v36, %v1795_v0 }
 0x7bf   : > { %v1830_v12 = vmul.f32 %v1826_v7, %v1798_v32 }
 0x7c0   : > { %v1828_v14 = vmul.f32 %v1824_v40, %v1796_v54 }
 0x7c1   : > { %v1832_v57 = vpack.c.bf16 %v1830_v12, %v1829_v44 }
 0x7c2   : > { %v1831_v16 = vpack.c.bf16 %v1828_v14, %v1827_v13 }
 0x7c4   : > { %4163 = vmatprep.mubr.bf16.mxu1 %v1831_v16 }
 0x7c5   : > { %4164 = vmatmul.mubr.bf16.vlgmr.msra.gmra.mrb[24].mxu1 %v1832_v57 }
 0x7c6   : > { %4168 = vmatpush3.bf16.msra.mxu1 %v4438_v9 }
 0x7c7   : > { %4169 = vmatprep.subr.bf16.mxu1 %v4442_v41 }
 0x7ca   : > { %4170 = vmatpush3.bf16.msra.mxu1 %v4442_v41 }
 0x7cb   : > { %4171 = vmatprep.subr.bf16.mxu1 %v4446_v49 }
 0x7ce   : > { %4172 = vmatpush3.bf16.msra.mxu1 %v4446_v49 }
 0x7cf   : > { %4173 = vmatprep.subr.bf16.mxu1 %v4450_v43 }
 0x7d2   : > { %4174 = vmatpush3.bf16.msra.mxu1 %v4450_v43 }
 0x7d3   : > { %4175 = vmatprep.subr.bf16.mxu1 %v4454_v47 }
 0x7d6   : > { %4176 = vmatpush3.bf16.msra.mxu1 %v4454_v47 }
 0x7d7   : > { %4177 = vmatprep.subr.bf16.mxu1 %v4458_v56 }
 0x7da   : > { %4178 = vmatpush3.bf16.msra.mxu1 %v4458_v56 }
 0x7db   : > { %4179 = vmatprep.subr.bf16.mxu1 %v4459_v62 }
 0x7de   : > { %4180 = vmatpush3.bf16.msra.mxu1 %v4459_v62 }
 0x7df   : > { %4181 = vmatprep.subr.bf16.mxu1 %v4460_v63 }
 0x7e2   : > { %4182 = vmatpush3.bf16.msra.mxu1 %v4460_v63 }
 0x898   : > { %v4165_v59 = vpop.f32.mrb[24].mxu1 }
 0x899   : > { %v1935_v58 = vpop.f32.mrb[25].mxu1  ;;  %v1944_v25 = vadd.f32 %v4165_v59, %v3736_v51 }
 0x89a   : > { %v1936_v19 = vadd.f32 %v3736_v51, %v1935_v58  ;;  %v4166_v48 = vpop.f32.mrb[26].mxu1 }
 0x89b   : > { %v1938_v21 = vpop.f32.mrb[27].mxu1  ;;  %v1947_v8 = vadd.f32 %v4166_v48, %v3736_v51 }
 0x89c   : > { %v5540_v22 = vadd.f32 %v1936_v19, %v5496_v55  ;;  %v1939_v2 = vadd.f32 %v3736_v51, %v1938_v21 }
 0x89d   : > { %v5555_v15 = vadd.f32 %v1947_v8, %v5492_v50  ;;  %v4437_v50 = vld [vmem:[%s5140_s21 + $0xf4] ss:$12 sps:$4 sm:$0xff]  }
 0x89e   : > { %v5543_v10 = vadd.f32 %v1939_v2, %v5500_v28  ;;  %1962 = vadd.xlane.f32.xlu0 %v5540_v22  ;;  %v1974_v3 = vmul.f32 %v5540_v22, %v5540_v22  ;;  %v5552_v28 = vadd.f32 %v1944_v25, %v5489_v29  ;;  %v4434_v29 = vld [vmem:[%s5140_s21 + $0xdc] ss:$12 sps:$4 sm:$0xff]  }
 0x89f   : > { %v1977_v37 = vmul.f32 %v5555_v15, %v5555_v15  ;;  %2213 = vmatprep.subr.bf16.mxu0 %v4434_v29 }
 0x8a0   : > { %1964 = vadd.xlane.f32.xlu1 %v5543_v10  ;;  %v1975_v55 = vmul.f32 %v5543_v10, %v5543_v10  ;;  %v1976_v18 = vmul.f32 %v5552_v28, %v5552_v28  ;;  %2214 = vmatpush1.bf16.msra.mxu0 %v4432_v38  ;;  %v3752_v38 = vld [vmem:[%s5229_s23 + $0x8] ss:$0 sm:$0xff] }
 0x8a1   : > { %2215 = vmatprep.subr.bf16.mxu0 %v4437_v50 }
 0x8a2   : > { %1978 = vadd.xlane.f32.xlu0 %v1974_v3 }
 0x8a4   : > { %1980 = vadd.xlane.f32.xlu1 %v1975_v55  ;;  %2216 = vmatpush1.bf16.msra.mxu0 %v4435_v45 }
 0x8a5   : > { %2217 = vmatprep.subr.bf16.mxu0 %v4441_v60 }
 0x8a6   : > { %1966 = vadd.xlane.f32.xlu0 %v5552_v28 }
 0x8a8   : > { %1968 = vadd.xlane.f32.xlu1 %v5555_v15  ;;  %2218 = vmatpush1.bf16.msra.mxu0 %v4439_v11  ;;  %v3753_v11 = vld [vmem:[%s5229_s23 + $0x9] ss:$0 sm:$0xff] }
 0x8a9   : > { %2219 = vmatprep.subr.bf16.mxu0 %v4445_v20 }
 0x8aa   : > { %1982 = vadd.xlane.f32.xlu0 %v1976_v18 }
 0x8ac   : > { %1984 = vadd.xlane.f32.xlu1 %v1977_v37  ;;  %2220 = vmatpush1.bf16.msra.mxu0 %v4443_v42 }
 0x8ad   : > { %2221 = vmatprep.subr.bf16.mxu0 %v4449_v52 }
 0x8b0   : > { %2222 = vmatpush1.bf16.msra.mxu0 %v4447_v5 }
 0x8b1   : > { %2223 = vmatprep.subr.bf16.mxu0 %v4453_v46 }
 0x8b4   : > { %2224 = vmatpush1.bf16.msra.mxu0 %v4451_v27 }
 0x8b5   : > { %2225 = vmatprep.subr.bf16.mxu0 %v4457_v53 }
 0x8b8   : > { %2226 = vmatpush1.bf16.msra.mxu0 %v4455_v61 }
 0x92b   : > { %v1963_v36 = vpop.xlane.xlu0 %1962 }
 0x92c   : > { %v1970_v4 = vmul.f32 0.03125, %v1963_v36 }
 0x92d   : > { %v1965_v6 = vpop.xlane.xlu1 %1964 }
 0x92e   : > { %v1971_v32 = vmul.f32 0.03125, %v1965_v6  ;;  %v1990_v0 = vmul.f32 %v1970_v4, %v1970_v4  ;;  %v1998_v37 = vsub.f32 %v5540_v22, %v1970_v4  ;;  %v3786_v4 = vld [vmem:[%s5243_s27 + $0x3] sm:$0x7] }
 0x92f   : > { %v1979_v7 = vpop.xlane.xlu0 %1978  ;;  %v2071_v6 = vrot.slane %v3786_v4, %v751_v24 }
 0x930   : > { %v1986_v54 = vmul.f32 0.03125, %v1979_v7  ;;  %v1991_v44 = vmul.f32 %v1971_v32, %v1971_v32  ;;  %v1999_v50 = vsub.f32 %v5543_v10, %v1971_v32  ;;  %v2075_v32 = vrot.slane %v3786_v4, %v755_v26 }
 0x931   : > { %v1981_v40 = vpop.xlane.xlu1 %1980 }
 0x932   : > { %v1994_v12 = vsub.f32 %v1986_v54, %v1990_v0  ;;  %v1987_v13 = vmul.f32 0.03125, %v1981_v40 }
 0x933   : > { %v1967_v14 = vpop.xlane.xlu0 %1966 }
 0x934   : > { %v2002_v57 = vadd.f32 1e-05, %v1994_v12  ;;  %v1995_v16 = vsub.f32 %v1987_v13, %v1991_v44  ;;  %v1972_v17 = vmul.f32 0.03125, %v1967_v14 }
 0x935   : > { %v1969_v1 = vpop.xlane.xlu1 %1968 }
 0x936   : > { %4581 = vrsqrt.f32 %v2002_v57  ;;  %v2003_v51 = vadd.f32 1e-05, %v1995_v16  ;;  %v1973_v59 = vmul.f32 0.03125, %v1969_v1  ;;  %v1992_v19 = vmul.f32 %v1972_v17, %v1972_v17 }
 0x937   : > { %v1983_v58 = vpop.xlane.xlu0 %1982  ;;  %v2000_v49 = vsub.f32 %v5552_v28, %v1972_v17 }
 0x938   : > { %4583 = vrsqrt.f32 %v2003_v51  ;;  %v1988_v48 = vmul.f32 0.03125, %v1983_v58  ;;  %v1993_v2 = vmul.f32 %v1973_v59, %v1973_v59  ;;  %v2001_v5 = vsub.f32 %v5555_v15, %v1973_v59 }
 0x939   : > { %v1985_v21 = vpop.xlane.xlu1 %1984  ;;  %v2079_v58 = vrot.slane %v3786_v4, %v759_v39 }
 0x93a   : > { %v1996_v25 = vsub.f32 %v1988_v48, %v1992_v19  ;;  %v1989_v3 = vmul.f32 0.03125, %v1985_v21 }
 0x93c   : > { %v2004_v8 = vadd.f32 1e-05, %v1996_v25  ;;  %v1997_v55 = vsub.f32 %v1989_v3, %v1993_v2 }
 0x93e   : > { %4585 = vrsqrt.f32 %v2004_v8  ;;  %v2005_v18 = vadd.f32 1e-05, %v1997_v55 }
 0x940   : > { %v4582_v29 = vpop.eup %4581  ;;  %4587 = vrsqrt.f32 %v2005_v18 }
 0x941   : > { %v2010_v9 = vmul.f32 %v4582_v29, %v1998_v37 }
 0x942   : > { %v4584_v45 = vpop.eup %4583 }
 0x943   : > { %v2011_v60 = vmul.f32 %v4584_v45, %v1999_v50  ;;  %v2018_v41 = vmul.f32 %v3752_v38, %v2010_v9 }
 0x945   : > { %v2019_v20 = vmul.f32 %v3752_v38, %v2011_v60  ;;  %v2026_v42 = vadd.f32 %v3753_v11, %v2018_v41 }
 0x947   : > { %v2027_v52 = vadd.f32 %v3753_v11, %v2019_v20 }
 0x948   : > { %v4586_v43 = vpop.eup %4585 }
 0x949   : > { %v2030_v46 = vpack.c.bf16 %v2027_v52, %v2026_v42  ;;  %v2012_v47 = vmul.f32 %v4586_v43, %v2000_v49 }
 0x94a   : > { %v4588_v27 = vpop.eup %4587 }
 0x94b   : > { %2244 = vmatmul.mubr.bf16.vlgmr.msra.gmra.mrb[28].mxu0 %v2030_v46  ;;  %4183 = vmatprep.mubr.bf16.mxu1 %v2030_v46  ;;  %v2013_v53 = vmul.f32 %v4588_v27, %v2001_v5  ;;  %v2020_v56 = vmul.f32 %v3752_v38, %v2012_v47 }
 0x94c   : > { %2253 = vmatprep.mubr.bf16.mxu0 %v4871_v30 }
 0x94d   : > { %v2021_v61 = vmul.f32 %v3752_v38, %v2013_v53  ;;  %v2028_v62 = vadd.f32 %v3753_v11, %v2020_v56 }
 0x94f   : > { %v2029_v63 = vadd.f32 %v3753_v11, %v2021_v61 }
 0x951   : > { %v2031_v36 = vpack.c.bf16 %v2029_v63, %v2028_v62 }
 0x953   : > { %2254 = vmatmul.mubr.bf16.gmra.mrb[32].mxu0 %v2031_v36  ;;  %4184 = vmatmul.mubr.bf16.vlgmr.msra.gmra.mrb[28].mxu1 %v2031_v36 }
 0xa1e   : > { %v2245_v7 = vpop.f32.mrb[28].mxu0 }
 0xa1f   : > { %v2246_v0 = vadd.f32 %v2245_v7, %v2071_v6  ;;  %v2247_v54 = vpop.f32.mrb[29].mxu0 }
 0xa20   : > { %v2249_v40 = vpop.f32.mrb[30].mxu0  ;;  %v2248_v44 = vadd.f32 %v2247_v54, %v2075_v32 }
 0xa21   : > { %v2250_v12 = vadd.f32 %v2249_v40, %v2071_v6  ;;  %v2251_v30 = vpop.f32.mrb[31].mxu0  ;;  %v2317_v13 = vmul.f32 %v5252_v31, %v2246_v0  ;;  %v2321_v57 = vmul.f32 %v5254_v33, %v2246_v0  ;;  %v2325_v16 = vmul.f32 %v5256_v34, %v2246_v0 }
 0xa22   : > { %v2252_v14 = vadd.f32 %v2251_v30, %v2075_v32  ;;  %v2329_v17 = vmul.f32 %v5258_v35, %v2246_v0 }
 0xa23   : > { %v2318_v24 = vmul.f32 %v5252_v31, %v2250_v12  ;;  %v2322_v26 = vmul.f32 %v5254_v33, %v2250_v12  ;;  %v2326_v1 = vmul.f32 %v5256_v34, %v2250_v12  ;;  %v2330_v51 = vmul.f32 %v5258_v35, %v2250_v12  ;;  %v4681_v12 = vld [vmem:[%s5133_s19] sm:$0xff] }
 0xa24   : > { %v2313_v59 = vpack.c.bf16 %v2252_v14, %v2248_v44  ;;  %v4682_v14 = vld [vmem:[%s5133_s19 + $0x8] sm:$0xff] }
 0xa25   : > { %v2333_v19 = vpack.c.bf16 %v2318_v24, %v2317_v13  ;;  %v2335_v48 = vpack.c.bf16 %v2322_v26, %v2321_v57  ;;  %v2337_v21 = vpack.c.bf16 %v2326_v1, %v2325_v16  ;;  %v2339_v2 = vpack.c.bf16 %v2330_v51, %v2329_v17  ;;  %v4683_v16 = vld [vmem:[%s5133_s19 + $0x10] sm:$0xff]  ;;  %v4684_v1 = vld [vmem:[%s5133_s19 + $0x18] sm:$0xff] }
 0xa26   : > { %v2255_v25 = vpop.f32.mrb[32].mxu0  ;;  %v4185_v3 = vpop.f32.mrb[28].mxu1  ;;  %4187 = vmatprep.subr.bf16.mxu0 %v2313_v59 }
 0xa27   : > { %v2256_v8 = vadd.f32 %v2255_v25, %v2071_v6  ;;  %v2257_v55 = vpop.f32.mrb[33].mxu0  ;;  %v2298_v18 = vpop.f32.mrb[29].mxu1  ;;  %4188 = vmatpush3.bf16.xpose.msra.mxu0 %v2313_v59  ;;  %4191 = vmatprep.mubr.bf16.mxu0 %v2333_v19  ;;  %v2307_v37 = vadd.f32 %v4185_v3, %v2079_v58 }
 0xa28   : > { %v2258_v29 = vadd.f32 %v2257_v55, %v2075_v32  ;;  %v2259_v38 = vpop.f32.mrb[34].mxu0  ;;  %v4186_v50 = vpop.f32.mrb[30].mxu1  ;;  %v2299_v23 = vadd.f32 %v2298_v18, %v2079_v58  ;;  %v4685_v55 = vld [vmem:[%s5133_s19 + $0x20] sm:$0xff] }
 0xa29   : > { %v2319_v9 = vmul.f32 %v5252_v31, %v2256_v8  ;;  %v2260_v39 = vadd.f32 %v2259_v38, %v2071_v6  ;;  %v2310_v45 = vadd.f32 %v4186_v50, %v2079_v58  ;;  %v2261_v60 = vpop.f32.mrb[35].mxu0  ;;  %v2301_v41 = vpop.f32.mrb[31].mxu1  ;;  %v2323_v49 = vmul.f32 %v5254_v33, %v2256_v8  ;;  %v4687_v50 = vld [vmem:[%s5133_s19 + $0x30] sm:$0xff] }
 0xa2a   : > { %v2262_v11 = vadd.f32 %v2261_v60, %v2075_v32  ;;  %v2302_v20 = vadd.f32 %v2301_v41, %v2079_v58  ;;  %v2327_v42 = vmul.f32 %v5256_v34, %v2256_v8  ;;  %v2331_v53 = vmul.f32 %v5258_v35, %v2256_v8 }
 0xa2b   : > { %v2320_v52 = vmul.f32 %v5252_v31, %v2260_v39  ;;  %v2316_v43 = vpack.c.bf16 %v2310_v45, %v2307_v37  ;;  %v2324_v5 = vmul.f32 %v5254_v33, %v2260_v39  ;;  %v2328_v46 = vmul.f32 %v5256_v34, %v2260_v39  ;;  %v4688_v45 = vld [vmem:[%s5133_s19 + $0x38] sm:$0xff] }
 0xa2c   : > { %v2314_v47 = vpack.c.bf16 %v2262_v11, %v2258_v29  ;;  %v2315_v27 = vpack.c.bf16 %v2302_v20, %v2299_v23  ;;  %v2332_v56 = vmul.f32 %v5258_v35, %v2260_v39  ;;  %v4686_v29 = vld [vmem:[%s5133_s19 + $0x28] sm:$0xff] }
 0xa2d   : > { %v2334_v61 = vpack.c.bf16 %v2320_v52, %v2319_v9  ;;  %v2336_v62 = vpack.c.bf16 %v2324_v5, %v2323_v49  ;;  %v2338_v63 = vpack.c.bf16 %v2328_v46, %v2327_v42 }
 0xa2e   : > { %4189 = vmatprep.subr.bf16.mxu0 %v2314_v47  ;;  %4207 = vmatprep.subr.bf16.mxu1 %v2315_v27  ;;  %v2340_v36 = vpack.c.bf16 %v2332_v56, %v2331_v53  ;;  %v4690_v56 = vld [vmem:[%s5133_s19 + $0x48] sm:$0xff] }
 0xa2f   : > { %4190 = vmatpush3.bf16.xpose.msra.mxu0 %v2314_v47  ;;  %4208 = vmatpush3.bf16.msra.mxu1 %v2315_v27  ;;  %v4689_v47 = vld [vmem:[%s5133_s19 + $0x40] sm:$0xff] }
 0xa30   : > { %4209 = vmatprep.subr.bf16.mxu1 %v2316_v43 }
 0xa33   : > { %4210 = vmatpush3.bf16.msra.mxu1 %v2316_v43 }
 0xa36   : > { %4192 = vmatmul.mubr.bf16.vlgmr.msra.gmra.mrb[36].mxu0 %v2334_v61 }
 0xa37   : > { %4195 = vmatprep.mubr.bf16.mxu0 %v2335_v48 }
 0xa3e   : > { %4196 = vmatmul.mubr.bf16.gmra.mrb[40].mxu0 %v2336_v62  ;;  %v4691_v62 = vld [vmem:[%s5133_s19 + $0x50] sm:$0xff] }
 0xa3f   : > { %4199 = vmatprep.mubr.bf16.mxu0 %v2337_v21 }
 0xa46   : > { %4200 = vmatmul.mubr.bf16.gmra.mrb[44].mxu0 %v2338_v63 }
 0xa47   : > { %4203 = vmatprep.mubr.bf16.mxu0 %v2339_v2 }
 0xa4e   : > { %4204 = vmatmul.mubr.bf16.gmra.mrb[48].mxu0 %v2340_v36 }
 0xb09   : > { %v4193_v4 = vpop.f32.mrb[36].mxu0 }
 0xb0a   : > { %v2375_v6 = vpop.f32.mrb[37].mxu0  ;;  %v2440_v32 = vmul.f32 0.35355338, %v4193_v4 }
 0xb0b   : > { %v2438_v7 = vmul.f32 0.35355338, %v2375_v6  ;;  %v4194_v0 = vpop.f32.mrb[38].mxu0  ;;  %v4692_v6 = vld [vmem:[%s5133_s19 + $0x58] sm:$0xff] }
 0xb0c   : > { %v2378_v54 = vpop.f32.mrb[39].mxu0  ;;  %v2441_v40 = vmul.f32 0.35355338, %v4194_v0  ;;  %v5624_v17 = vadd.f32 %v4683_v16, %v2440_v32 }
 0xb0d   : > { %v2439_v44 = vmul.f32 0.35355338, %v2378_v54  ;;  %v5616_v30 = vadd.f32 %v4681_v12, %v2438_v7 }
 0xb0e   : > { %v5629_v51 = vadd.f32 %v4684_v1, %v2441_v40  ;;  %v2476_v21 = vsel %vm1151_vm8, %v5624_v17, -inf }
 0xb0f   : > { %v2470_v13 = vsel %vm1151_vm8, %v5616_v30, -inf  ;;  %v5621_v57 = vadd.f32 %v4682_v14, %v2439_v44 }
 0xb10   : > { %2471 = vmax.xlane.f32.xlu0 %v2470_v13  ;;  %v2479_v8 = vsel %vm1151_vm8, %v5629_v51, -inf }
 0xb11   : > { %v4197_v24 = vpop.f32.mrb[40].mxu0  ;;  %v2473_v26 = vsel %vm1151_vm8, %v5621_v57, -inf }
 0xb12   : > { %2474 = vmax.xlane.f32.xlu1 %v2473_v26  ;;  %v2391_v59 = vpop.f32.mrb[41].mxu0  ;;  %v2444_v58 = vmul.f32 0.35355338, %v4197_v24  ;;  %v4693_v24 = vld [vmem:[%s5133_s19 + $0x60] sm:$0xff] }
 0xb13   : > { %v2442_v19 = vmul.f32 0.35355338, %v2391_v59  ;;  %v4198_v48 = vpop.f32.mrb[42].mxu0  ;;  %v4694_v59 = vld [vmem:[%s5133_s19 + $0x68] sm:$0xff] }
 0xb14   : > { %2477 = vmax.xlane.f32.xlu0 %v2476_v21  ;;  %v2394_v2 = vpop.f32.mrb[43].mxu0  ;;  %v2445_v25 = vmul.f32 0.35355338, %v4198_v48  ;;  %v5644_v9 = vadd.f32 %v4687_v50, %v2444_v58 }
 0xb15   : > { %v2443_v3 = vmul.f32 0.35355338, %v2394_v2  ;;  %v5636_v18 = vadd.f32 %v4685_v55, %v2442_v19  ;;  %v4695_v19 = vld [vmem:[%s5133_s19 + $0x70] sm:$0xff]  ;;  %v4696_v2 = vld [vmem:[%s5133_s19 + $0x78] sm:$0xff] }
 0xb16   : > { %2480 = vmax.xlane.f32.xlu1 %v2479_v8  ;;  %v5649_v60 = vadd.f32 %v4688_v45, %v2445_v25  ;;  %v2488_v42 = vsel %vm1151_vm8, %v5644_v9, -inf }
 0xb17   : > { %v2482_v37 = vsel %vm1151_vm8, %v5636_v18, -inf  ;;  %v5641_v38 = vadd.f32 %v4686_v29, %v2443_v3 }
 0xb18   : > { %2483 = vmax.xlane.f32.xlu0 %v2482_v37  ;;  %v2491_v46 = vsel %vm1151_vm8, %v5649_v60, -inf }
 0xb19   : > { %v4201_v23 = vpop.f32.mrb[44].mxu0  ;;  %v2485_v39 = vsel %vm1151_vm8, %v5641_v38, -inf }
 0xb1a   : > { %2486 = vmax.xlane.f32.xlu1 %v2485_v39  ;;  %v2407_v41 = vpop.f32.mrb[45].mxu0  ;;  %v2448_v11 = vmul.f32 0.35355338, %v4201_v23 }
 0xb1b   : > { %v2446_v20 = vmul.f32 0.35355338, %v2407_v41  ;;  %v4202_v49 = vpop.f32.mrb[46].mxu0 }
 0xb1c   : > { %2489 = vmax.xlane.f32.xlu0 %v2488_v42  ;;  %v2410_v52 = vpop.f32.mrb[47].mxu0  ;;  %v2449_v43 = vmul.f32 0.35355338, %v4202_v49  ;;  %v5664_v63 = vadd.f32 %v4691_v62, %v2448_v11 }
 0xb1d   : > { %v2447_v5 = vmul.f32 0.35355338, %v2410_v52  ;;  %v5656_v27 = vadd.f32 %v4689_v47, %v2446_v20 }
 0xb1e   : > { %2492 = vmax.xlane.f32.xlu1 %v2491_v46  ;;  %v5669_v32 = vadd.f32 %v4692_v6, %v2449_v43  ;;  %v2500_v44 = vsel %vm1151_vm8, %v5664_v63, -inf }
 0xb1f   : > { %v2494_v53 = vsel %vm1151_vm8, %v5656_v27, -inf  ;;  %v5661_v61 = vadd.f32 %v4690_v56, %v2447_v5 }
 0xb20   : > { %2495 = vmax.xlane.f32.xlu0 %v2494_v53  ;;  %v2503_v16 = vsel %vm1151_vm8, %v5669_v32, -inf }
 0xb21   : > { %v4205_v36 = vpop.f32.mrb[48].mxu0  ;;  %v2497_v4 = vsel %vm1151_vm8, %v5661_v61, -inf }
 0xb22   : > { %2498 = vmax.xlane.f32.xlu1 %v2497_v4  ;;  %v2423_v7 = vpop.f32.mrb[49].mxu0  ;;  %v2452_v0 = vmul.f32 0.35355338, %v4205_v36 }
 0xb23   : > { %v2450_v54 = vmul.f32 0.35355338, %v2423_v7  ;;  %v4206_v40 = vpop.f32.mrb[50].mxu0 }
 0xb24   : > { %2501 = vmax.xlane.f32.xlu0 %v2500_v44  ;;  %v2426_v12 = vpop.f32.mrb[51].mxu0  ;;  %v2453_v13 = vmul.f32 0.35355338, %v4206_v40  ;;  %v5684_v48 = vadd.f32 %v4695_v19, %v2452_v0 }
 0xb25   : > { %v2451_v14 = vmul.f32 0.35355338, %v2426_v12  ;;  %v5676_v26 = vadd.f32 %v4693_v24, %v2450_v54 }
 0xb26   : > { %2504 = vmax.xlane.f32.xlu1 %v2503_v16  ;;  %v5689_v25 = vadd.f32 %v4696_v2, %v2453_v13  ;;  %v2512_v3 = vsel %vm1151_vm8, %v5684_v48, -inf }
 0xb27   : > { %v2506_v1 = vsel %vm1151_vm8, %v5676_v26, -inf  ;;  %v5681_v58 = vadd.f32 %v4694_v59, %v2451_v14 }
 0xb28   : > { %2507 = vmax.xlane.f32.xlu0 %v2506_v1  ;;  %v2515_v8 = vsel %vm1151_vm8, %v5689_v25, -inf }
 0xb29   : > { %v2509_v21 = vsel %vm1151_vm8, %v5681_v58, -inf }
 0xb2a   : > { %2510 = vmax.xlane.f32.xlu1 %v2509_v21 }
 0xb2c   : > { %2513 = vmax.xlane.f32.xlu0 %v2512_v3 }
 0xb2e   : > { %2516 = vmax.xlane.f32.xlu1 %v2515_v8 }
 0xb9d   : > { %v2472_v55 = vpop.xlane.xlu0 %2471 }
 0xb9e   : > { %v2518_v37 = vsub.f32 %v5616_v30, %v2472_v55 }
 0xb9f   : > { %v2475_v29 = vpop.xlane.xlu1 %2474 }
 0xba0   : > { %v2534_v50 = vmul.f32 1.442695, %v2518_v37  ;;  %v2519_v23 = vsub.f32 %v5621_v57, %v2475_v29 }
 0xba1   : > { %v2478_v39 = vpop.xlane.xlu0 %2477 }
 0xba2   : > { %4589 = vpow2.f32 %v2534_v50  ;;  %v2536_v45 = vmul.f32 1.442695, %v2519_v23  ;;  %v2520_v41 = vsub.f32 %v5624_v17, %v2478_v39 }
 0xba3   : > { %v2481_v11 = vpop.xlane.xlu1 %2480 }
 0xba4   : > { %4591 = vpow2.f32 %v2536_v45  ;;  %v2538_v20 = vmul.f32 1.442695, %v2520_v41  ;;  %v2521_v49 = vsub.f32 %v5629_v51, %v2481_v11 }
 0xba5   : > { %v2484_v42 = vpop.xlane.xlu0 %2483 }
 0xba6   : > { %4593 = vpow2.f32 %v2538_v20  ;;  %v2540_v52 = vmul.f32 1.442695, %v2521_v49  ;;  %v2522_v43 = vsub.f32 %v5636_v18, %v2484_v42 }
 0xba7   : > { %v2487_v30 = vpop.xlane.xlu1 %2486 }
 0xba8   : > { %4595 = vpow2.f32 %v2540_v52  ;;  %v2542_v5 = vmul.f32 1.442695, %v2522_v43  ;;  %v2523_v57 = vsub.f32 %v5641_v38, %v2487_v30 }
 0xba9   : > { %v2490_v46 = vpop.xlane.xlu0 %2489 }
 0xbaa   : > { %4597 = vpow2.f32 %v2542_v5  ;;  %v2544_v47 = vmul.f32 1.442695, %v2523_v57  ;;  %v2524_v17 = vsub.f32 %v5644_v9, %v2490_v46 }
 0xbab   : > { %v2493_v53 = vpop.xlane.xlu1 %2492 }
 0xbac   : > { %v5702_v56 = vpop.eup %4589  ;;  %4599 = vpow2.f32 %v2544_v47  ;;  %v2546_v51 = vmul.f32 1.442695, %v2524_v17  ;;  %v2525_v62 = vsub.f32 %v5649_v60, %v2493_v53 }
 0xbad   : > { %v2496_v36 = vpop.xlane.xlu0 %2495  ;;  %v2566_v18 = vsel %vm1151_vm8, %v5702_v56, 0.0 }
 0xbae   : > { %v5707_v4 = vpop.eup %4591  ;;  %4601 = vpow2.f32 %v2546_v51  ;;  %v2548_v38 = vmul.f32 1.442695, %v2525_v62  ;;  %v2526_v6 = vsub.f32 %v5656_v27, %v2496_v36  ;;  %2567 = vadd.xlane.f32.xlu0 %v2566_v18 }
 0xbaf   : > { %v2499_v7 = vpop.xlane.xlu1 %2498  ;;  %v2569_v9 = vsel %vm1151_vm8, %v5707_v4, 0.0 }
 0xbb0   : > { %v5712_v0 = vpop.eup %4593  ;;  %4603 = vpow2.f32 %v2548_v38  ;;  %v2550_v54 = vmul.f32 1.442695, %v2526_v6  ;;  %v2527_v60 = vsub.f32 %v5661_v61, %v2499_v7  ;;  %2570 = vadd.xlane.f32.xlu1 %v2569_v9 }
 0xbb1   : > { %v2502_v40 = vpop.xlane.xlu0 %2501  ;;  %v2572_v44 = vsel %vm1151_vm8, %v5712_v0, 0.0 }
 0xbb2   : > { %v5717_v12 = vpop.eup %4595  ;;  %4605 = vpow2.f32 %v2550_v54  ;;  %v2552_v27 = vmul.f32 1.442695, %v2527_v60  ;;  %v2528_v13 = vsub.f32 %v5664_v63, %v2502_v40  ;;  %2573 = vadd.xlane.f32.xlu0 %v2572_v44 }
 0xbb3   : > { %v2505_v14 = vpop.xlane.xlu1 %2504  ;;  %v2575_v16 = vsel %vm1151_vm8, %v5717_v12, 0.0 }
 0xbb4   : > { %v5722_v24 = vpop.eup %4597  ;;  %4607 = vpow2.f32 %v2552_v27  ;;  %v2554_v61 = vmul.f32 1.442695, %v2528_v13  ;;  %v2529_v1 = vsub.f32 %v5669_v32, %v2505_v14  ;;  %2576 = vadd.xlane.f32.xlu1 %v2575_v16 }
 0xbb5   : > { %v2508_v59 = vpop.xlane.xlu0 %2507  ;;  %v2578_v19 = vsel %vm1151_vm8, %v5722_v24, 0.0 }
 0xbb6   : > { %v5727_v21 = vpop.eup %4599  ;;  %4609 = vpow2.f32 %v2554_v61  ;;  %v2556_v63 = vmul.f32 1.442695, %v2529_v1  ;;  %v2530_v2 = vsub.f32 %v5676_v26, %v2508_v59  ;;  %2579 = vadd.xlane.f32.xlu0 %v2578_v19 }
 0xbb7   : > { %v2511_v3 = vpop.xlane.xlu1 %2510  ;;  %v2581_v8 = vsel %vm1151_vm8, %v5727_v21, 0.0 }
 0xbb8   : > { %v5732_v55 = vpop.eup %4601  ;;  %4611 = vpow2.f32 %v2556_v63  ;;  %v2558_v32 = vmul.f32 1.442695, %v2530_v2  ;;  %v2531_v37 = vsub.f32 %v5681_v58, %v2511_v3  ;;  %2582 = vadd.xlane.f32.xlu1 %v2581_v8 }
 0xbb9   : > { %v2514_v29 = vpop.xlane.xlu0 %2513  ;;  %v2584_v50 = vsel %vm1151_vm8, %v5732_v55, 0.0 }
 0xbba   : > { %v5737_v23 = vpop.eup %4603  ;;  %4613 = vpow2.f32 %v2558_v32  ;;  %v2560_v26 = vmul.f32 1.442695, %v2531_v37  ;;  %v2532_v39 = vsub.f32 %v5684_v48, %v2514_v29  ;;  %2585 = vadd.xlane.f32.xlu0 %v2584_v50 }
 0xbbb   : > { %v2517_v45 = vpop.xlane.xlu1 %2516  ;;  %v2587_v41 = vsel %vm1151_vm8, %v5737_v23, 0.0 }
 0xbbc   : > { %v5742_v11 = vpop.eup %4605  ;;  %4615 = vpow2.f32 %v2560_v26  ;;  %v2562_v58 = vmul.f32 1.442695, %v2532_v39  ;;  %v2533_v20 = vsub.f32 %v5689_v25, %v2517_v45  ;;  %2588 = vadd.xlane.f32.xlu1 %v2587_v41 }
 0xbbd   : > { %v2590_v49 = vsel %vm1151_vm8, %v5742_v11, 0.0 }
 0xbbe   : > { %v5747_v42 = vpop.eup %4607  ;;  %4617 = vpow2.f32 %v2562_v58  ;;  %v2564_v52 = vmul.f32 1.442695, %v2533_v20  ;;  %2591 = vadd.xlane.f32.xlu0 %v2590_v49 }
 0xbbf   : > { %v2593_v48 = vsel %vm1151_vm8, %v5747_v42, 0.0 }
 0xbc0   : > { %v5751_v43 = vpop.eup %4609  ;;  %4619 = vpow2.f32 %v2564_v52  ;;  %2594 = vadd.xlane.f32.xlu1 %v2593_v48 }
 0xbc1   : > { %v2596_v30 = vsel %vm1151_vm8, %v5751_v43, 0.0 }
 0xbc2   : > { %v5755_v25 = vpop.eup %4611  ;;  %2597 = vadd.xlane.f32.xlu0 %v2596_v30 }
 0xbc3   : > { %v2599_v5 = vsel %vm1151_vm8, %v5755_v25, 0.0 }
 0xbc4   : > { %v5759_v57 = vpop.eup %4613  ;;  %2600 = vadd.xlane.f32.xlu1 %v2599_v5 }
 0xbc5   : > { %v2602_v46 = vsel %vm1151_vm8, %v5759_v57, 0.0 }
 0xbc6   : > { %v5763_v47 = vpop.eup %4615  ;;  %2603 = vadd.xlane.f32.xlu0 %v2602_v46 }
 0xbc7   : > { %v2605_v17 = vsel %vm1151_vm8, %v5763_v47, 0.0 }
 0xbc8   : > { %v5767_v53 = vpop.eup %4617  ;;  %2606 = vadd.xlane.f32.xlu1 %v2605_v17 }
 0xbc9   : > { %v2608_v51 = vsel %vm1151_vm8, %v5767_v53, 0.0 }
 0xbca   : > { %v5771_v62 = vpop.eup %4619  ;;  %2609 = vadd.xlane.f32.xlu0 %v2608_v51 }
 0xbcb   : > { %v2611_v36 = vsel %vm1151_vm8, %v5771_v62, 0.0 }
 0xbcc   : > { %2612 = vadd.xlane.f32.xlu1 %v2611_v36 }
 0xc3b   : > { %v2568_v18 = vpop.xlane.xlu0 %2567 }
 0xc3c   : > { %4621 = vrcp.f32 %v2568_v18 }
 0xc3d   : > { %v2571_v38 = vpop.xlane.xlu1 %2570 }
 0xc3e   : > { %4623 = vrcp.f32 %v2571_v38 }
 0xc3f   : > { %v2574_v6 = vpop.xlane.xlu0 %2573 }
 0xc40   : > { %4625 = vrcp.f32 %v2574_v6 }
 0xc41   : > { %v2577_v7 = vpop.xlane.xlu1 %2576 }
 0xc42   : > { %4627 = vrcp.f32 %v2577_v7 }
 0xc43   : > { %v2580_v9 = vpop.xlane.xlu0 %2579 }
 0xc44   : > { %4629 = vrcp.f32 %v2580_v9  ;;  %v4461_v9 = vld [vmem:[%s5220_s12 + $0x40] sm:$0xff]  }
 0xc45   : > { %v2583_v54 = vpop.xlane.xlu1 %2582  ;;  %4227 = vmatprep.subr.bf16.mxu0 %v4461_v9 }
 0xc46   : > { %v4622_v60 = vpop.eup %4621  ;;  %4631 = vrcp.f32 %v2583_v54  ;;  %4228 = vmatpush3.bf16.msra.mxu0 %v4461_v9  ;;  %v4464_v54 = vld [vmem:[%s5220_s12 + $0x58] sm:$0xff]  }
 0xc47   : > { %v2586_v40 = vpop.xlane.xlu0 %2585  ;;  %v2630_v13 = vmul.f32 %v4622_v60, %v5702_v56  ;;  %v4467_v60 = vld [vmem:[%s5220_s12 + $0x70] sm:$0xff]  }
 0xc48   : > { %v4624_v44 = vpop.eup %4623  ;;  %4633 = vrcp.f32 %v2586_v40  ;;  %v4468_v40 = vld [vmem:[%s5220_s12 + $0x78] sm:$0xff]  }
 0xc49   : > { %v2589_v27 = vpop.xlane.xlu1 %2588  ;;  %v2631_v14 = vmul.f32 %v4624_v44, %v5707_v4 }
 0xc4a   : > { %v4626_v16 = vpop.eup %4625  ;;  %4635 = vrcp.f32 %v2589_v27 }
 0xc4b   : > { %v2592_v61 = vpop.xlane.xlu0 %2591  ;;  %v2646_v1 = vpack.c.bf16 %v2631_v14, %v2630_v13  ;;  %v2632_v19 = vmul.f32 %v4626_v16, %v5712_v0 }
 0xc4c   : > { %v4628_v59 = vpop.eup %4627  ;;  %4637 = vrcp.f32 %v2592_v61 }
 0xc4d   : > { %v2633_v63 = vmul.f32 %v4628_v59, %v5717_v12  ;;  %4211 = vmatprep.mubr.msk.bf16.mxu1 %vm1151_vm8, %v2646_v1  ;;  %v2595_v2 = vpop.xlane.xlu1 %2594 }
 0xc4e   : > { %v4630_v3 = vpop.eup %4629  ;;  %4639 = vrcp.f32 %v2595_v2 }
 0xc4f   : > { %v2598_v8 = vpop.xlane.xlu0 %2597  ;;  %v2647_v32 = vpack.c.bf16 %v2633_v63, %v2632_v19  ;;  %v2634_v37 = vmul.f32 %v4630_v3, %v5722_v24 }
 0xc50   : > { %v4632_v56 = vpop.eup %4631  ;;  %4641 = vrcp.f32 %v2598_v8 }
 0xc51   : > { %4212 = vmatmul.mubr.msk.bf16.vlgmr.msra.gmra.mrb[32].mxu1 %vm1151_vm8, %v2647_v32  ;;  %v2601_v4 = vpop.xlane.xlu1 %2600  ;;  %v2635_v29 = vmul.f32 %v4632_v56, %v5727_v21 }
 0xc52   : > { %v4634_v50 = vpop.eup %4633  ;;  %4643 = vrcp.f32 %v2601_v4 }
 0xc53   : > { %v2604_v0 = vpop.xlane.xlu0 %2603  ;;  %v2648_v12 = vpack.c.bf16 %v2635_v29, %v2634_v37  ;;  %v2636_v45 = vmul.f32 %v4634_v50, %v5732_v55 }
 0xc54   : > { %v4636_v26 = vpop.eup %4635  ;;  %4645 = vrcp.f32 %v2604_v0 }
 0xc55   : > { %4215 = vmatprep.mubr.msk.bf16.mxu1 %vm1151_vm8, %v2648_v12  ;;  %v2607_v39 = vpop.xlane.xlu1 %2606  ;;  %v2637_v41 = vmul.f32 %v4636_v26, %v5737_v23 }
 0xc56   : > { %v4638_v58 = vpop.eup %4637  ;;  %4647 = vrcp.f32 %v2607_v39 }
 0xc57   : > { %v2610_v20 = vpop.xlane.xlu0 %2609  ;;  %v2649_v49 = vpack.c.bf16 %v2637_v41, %v2636_v45  ;;  %v2638_v52 = vmul.f32 %v4638_v58, %v5742_v11 }
 0xc58   : > { %v4640_v24 = vpop.eup %4639  ;;  %4649 = vrcp.f32 %v2610_v20 }
 0xc59   : > { %4216 = vmatmul.mubr.msk.bf16.gmra.mrb[36].mxu1 %vm1151_vm8, %v2649_v49  ;;  %v2613_v21 = vpop.xlane.xlu1 %2612  ;;  %v2639_v48 = vmul.f32 %v4640_v24, %v5747_v42 }
 0xc5a   : > { %v4642_v30 = vpop.eup %4641  ;;  %4651 = vrcp.f32 %v2613_v21 }
 0xc5b   : > { %v2650_v5 = vpack.c.bf16 %v2639_v48, %v2638_v52  ;;  %v2640_v55 = vmul.f32 %v4642_v30, %v5751_v43 }
 0xc5c   : > { %v4644_v46 = vpop.eup %4643 }
 0xc5d   : > { %4219 = vmatprep.mubr.msk.bf16.mxu1 %vm1151_vm8, %v2650_v5  ;;  %v2641_v23 = vmul.f32 %v4644_v46, %v5755_v25 }
 0xc5e   : > { %v4646_v17 = vpop.eup %4645 }
 0xc5f   : > { %v2651_v51 = vpack.c.bf16 %v2641_v23, %v2640_v55  ;;  %v2642_v11 = vmul.f32 %v4646_v17, %v5759_v57  ;;  %v4462_v57 = vld [vmem:[%s5220_s12 + $0x48] sm:$0xff]  }
 0xc60   : > { %v4648_v36 = vpop.eup %4647  ;;  %4229 = vmatprep.subr.bf16.mxu0 %v4462_v57 }
 0xc61   : > { %4220 = vmatmul.mubr.msk.bf16.gmra.mrb[40].mxu1 %vm1151_vm8, %v2651_v51  ;;  %v2643_v42 = vmul.f32 %v4648_v36, %v5763_v47  ;;  %4230 = vmatpush3.bf16.msra.mxu0 %v4462_v57  ;;  %v4463_v47 = vld [vmem:[%s5220_s12 + $0x50] sm:$0xff]  }
 0xc62   : > { %v4650_v18 = vpop.eup %4649  ;;  %4231 = vmatprep.subr.bf16.mxu0 %v4463_v47 }
 0xc63   : > { %v2652_v38 = vpack.c.bf16 %v2643_v42, %v2642_v11  ;;  %v2644_v43 = vmul.f32 %v4650_v18, %v5767_v53  ;;  %v4465_v53 = vld [vmem:[%s5220_s12 + $0x60] sm:$0xff]  }
 0xc64   : > { %v4652_v6 = vpop.eup %4651 }
 0xc65   : > { %4223 = vmatprep.mubr.msk.bf16.mxu1 %vm1151_vm8, %v2652_v38  ;;  %v2645_v25 = vmul.f32 %v4652_v6, %v5771_v62  ;;  %4232 = vmatpush3.bf16.msra.mxu0 %v4463_v47  ;;  %v4466_v62 = vld [vmem:[%s5220_s12 + $0x68] sm:$0xff]  }
 0xc66   : > { %4233 = vmatprep.subr.bf16.mxu0 %v4464_v54  ;;  %v3835_v38 = vld [vmem:[%s5229_s23 + $0xa] ss:$0 sm:$0xff] }
 0xc67   : > { %v2653_v7 = vpack.c.bf16 %v2645_v25, %v2644_v43 }
 0xc69   : > { %4224 = vmatmul.mubr.msk.bf16.gmra.mrb[44].mxu1 %vm1151_vm8, %v2653_v7  ;;  %4234 = vmatpush3.bf16.msra.mxu0 %v4464_v54 }
 0xc6a   : > { %4235 = vmatprep.subr.bf16.mxu0 %v4465_v53 }
 0xc6d   : > { %4236 = vmatpush3.bf16.msra.mxu0 %v4465_v53 }
 0xc6e   : > { %4237 = vmatprep.subr.bf16.mxu0 %v4466_v62 }
 0xc71   : > { %4238 = vmatpush3.bf16.msra.mxu0 %v4466_v62 }
 0xc72   : > { %4239 = vmatprep.subr.bf16.mxu0 %v4467_v60 }
 0xc75   : > { %4240 = vmatpush3.bf16.msra.mxu0 %v4467_v60 }
 0xc76   : > { %4241 = vmatprep.subr.bf16.mxu0 %v4468_v40 }
 0xc79   : > { %4242 = vmatpush3.bf16.msra.mxu0 %v4468_v40  ;;  %v4469_v40 = vld [vmem:[%s5146_s25 + $0x40] sm:$0xff]  }
 0xc7a   : > { %4247 = vmatprep.subr.bf16.mxu1 %v4469_v40 }
 0xc7b   : > { %4248 = vmatpush3.bf16.msra.mxu1 %v4469_v40  ;;  %v4477_v40 = vld [vmem:[%s5148_s26 + $0x40] sm:$0xff]  }
 0xc7c   : > { %4267 = vmatprep.subr.bf16.mxu0 %v4477_v40 }
 0xd24   : > { %v4213_v44 = vpop.f32.mrb[32].mxu1 }
 0xd25   : > { %v2712_v27 = vpop.f32.mrb[33].mxu1  ;;  %v2777_v61 = vmul.f32 %v4213_v44, %v5252_v31  ;;  %v4470_v44 = vld [vmem:[%s5146_s25 + $0x48] sm:$0xff]  }
 0xd26   : > { %v4214_v13 = vpop.f32.mrb[34].mxu1  ;;  %v2775_v19 = vmul.f32 %v5252_v31, %v2712_v27  ;;  %4249 = vmatprep.subr.bf16.mxu1 %v4470_v44  ;;  %v4471_v27 = vld [vmem:[%s5146_s25 + $0x50] sm:$0xff]  }
 0xd27   : > { %v2715_v14 = vpop.f32.mrb[35].mxu1  ;;  %v2778_v3 = vmul.f32 %v4214_v13, %v5252_v31  ;;  %4250 = vmatpush3.bf16.msra.mxu1 %v4470_v44  ;;  %v4472_v13 = vld [vmem:[%s5146_s25 + $0x58] sm:$0xff]   ;;  %v4478_v44 = vld [vmem:[%s5148_s26 + $0x48] sm:$0xff]  }
 0xd28   : > { %v2776_v4 = vmul.f32 %v5252_v31, %v2715_v14  ;;  %4251 = vmatprep.subr.bf16.mxu1 %v4471_v27  ;;  %v4473_v14 = vld [vmem:[%s5146_s25 + $0x60] sm:$0xff]  }
 0xd2b   : > { %4252 = vmatpush3.bf16.msra.mxu1 %v4471_v27  ;;  %v4479_v27 = vld [vmem:[%s5148_s26 + $0x50] sm:$0xff]  }
 0xd2c   : > { %v4217_v16 = vpop.f32.mrb[36].mxu1  ;;  %4253 = vmatprep.subr.bf16.mxu1 %v4472_v13 }
 0xd2d   : > { %v2781_v1 = vmul.f32 %v4217_v16, %v5254_v33  ;;  %v2728_v59 = vpop.f32.mrb[37].mxu1  ;;  %v4474_v16 = vld [vmem:[%s5146_s25 + $0x68] sm:$0xff]  }
 0xd2e   : > { %v2779_v63 = vmul.f32 %v5254_v33, %v2728_v59  ;;  %v4218_v2 = vpop.f32.mrb[38].mxu1 }
 0xd2f   : > { %v2785_v8 = vadd.f32 %v2781_v1, %v2777_v61  ;;  %v2782_v32 = vmul.f32 %v4218_v2, %v5254_v33  ;;  %v2731_v56 = vpop.f32.mrb[39].mxu1  ;;  %4254 = vmatpush3.bf16.msra.mxu1 %v4472_v13  ;;  %v4475_v61 = vld [vmem:[%s5146_s25 + $0x70] sm:$0xff]   ;;  %v4476_v1 = vld [vmem:[%s5146_s25 + $0x78] sm:$0xff]  }
 0xd30   : > { %v2783_v37 = vadd.f32 %v2779_v63, %v2775_v19  ;;  %v2780_v29 = vmul.f32 %v5254_v33, %v2731_v56  ;;  %4255 = vmatprep.subr.bf16.mxu1 %v4473_v14  ;;  %v4480_v13 = vld [vmem:[%s5148_s26 + $0x58] sm:$0xff]  }
 0xd31   : > { %v2786_v50 = vadd.f32 %v2782_v32, %v2778_v3 }
 0xd32   : > { %v2784_v0 = vadd.f32 %v2780_v29, %v2776_v4 }
 0xd33   : > { %4256 = vmatpush3.bf16.msra.mxu1 %v4473_v14  ;;  %v4481_v14 = vld [vmem:[%s5148_s26 + $0x60] sm:$0xff]  }
 0xd34   : > { %v4221_v12 = vpop.f32.mrb[40].mxu1  ;;  %4257 = vmatprep.subr.bf16.mxu1 %v4474_v16 }
 0xd35   : > { %v2789_v26 = vmul.f32 %v4221_v12, %v5256_v34  ;;  %v2744_v39 = vpop.f32.mrb[41].mxu1 }
 0xd36   : > { %v2787_v45 = vmul.f32 %v5256_v34, %v2744_v39  ;;  %v4222_v41 = vpop.f32.mrb[42].mxu1 }
 0xd37   : > { %v2793_v58 = vadd.f32 %v2789_v26, %v2785_v8  ;;  %v2790_v20 = vmul.f32 %v4222_v41, %v5256_v34  ;;  %v2747_v49 = vpop.f32.mrb[43].mxu1  ;;  %4258 = vmatpush3.bf16.msra.mxu1 %v4474_v16  ;;  %v4482_v16 = vld [vmem:[%s5148_s26 + $0x68] sm:$0xff]  }
 0xd38   : > { %v2791_v24 = vadd.f32 %v2787_v45, %v2783_v37  ;;  %v2788_v21 = vmul.f32 %v5256_v34, %v2747_v49  ;;  %4259 = vmatprep.subr.bf16.mxu1 %v4475_v61 }
 0xd39   : > { %v2794_v31 = vadd.f32 %v2790_v20, %v2786_v50 }
 0xd3a   : > { %v2792_v52 = vadd.f32 %v2788_v21, %v2784_v0 }
 0xd3b   : > { %4260 = vmatpush3.bf16.msra.mxu1 %v4475_v61  ;;  %v4483_v61 = vld [vmem:[%s5148_s26 + $0x70] sm:$0xff]  }
 0xd3c   : > { %v4225_v48 = vpop.f32.mrb[44].mxu1  ;;  %4261 = vmatprep.subr.bf16.mxu1 %v4476_v1 }
 0xd3d   : > { %v2797_v33 = vmul.f32 %v4225_v48, %v5258_v35  ;;  %v2760_v30 = vpop.f32.mrb[45].mxu1 }
 0xd3e   : > { %v2795_v5 = vmul.f32 %v5258_v35, %v2760_v30  ;;  %v4226_v46 = vpop.f32.mrb[46].mxu1 }
 0xd3f   : > { %v2801_v55 = vadd.f32 %v2797_v33, %v2793_v58  ;;  %v2798_v23 = vmul.f32 %v4226_v46, %v5258_v35  ;;  %v2763_v17 = vpop.f32.mrb[47].mxu1  ;;  %4262 = vmatpush3.bf16.msra.mxu1 %v4476_v1  ;;  %v4484_v1 = vld [vmem:[%s5148_s26 + $0x78] sm:$0xff]  }
 0xd40   : > { %v2799_v51 = vadd.f32 %v2795_v5, %v2791_v24  ;;  %v2796_v36 = vmul.f32 %v5258_v35, %v2763_v17 }
 0xd41   : > { %v2802_v11 = vadd.f32 %v2798_v23, %v2794_v31 }
 0xd42   : > { %v2800_v42 = vadd.f32 %v2796_v36, %v2792_v52 }
 0xd43   : > { %v2804_v34 = vpack.c.bf16 %v2802_v11, %v2801_v55  ;;  %v3844_v55 = vld [vmem:[%s5229_s23 + $0xb] ss:$0 sm:$0xff] }
 0xd44   : > { %v2803_v18 = vpack.c.bf16 %v2800_v42, %v2799_v51 }
 0xd46   : > { %4243 = vmatprep.mubr.bf16.mxu0 %v2803_v18  ;;  %v3845_v18 = vld [vmem:[%s5229_s23 + $0xc] ss:$0 sm:$0xff] }
 0xd47   : > { %4244 = vmatmul.mubr.bf16.vlgmr.msra.gmra.mrb[52].mxu0 %v2804_v34 }
 0xd48   : > { %4268 = vmatpush3.bf16.msra.mxu0 %v4477_v40 }
 0xd49   : > { %4269 = vmatprep.subr.bf16.mxu0 %v4478_v44 }
 0xd4c   : > { %4270 = vmatpush3.bf16.msra.mxu0 %v4478_v44 }
 0xd4d   : > { %4271 = vmatprep.subr.bf16.mxu0 %v4479_v27 }
 0xd50   : > { %4272 = vmatpush3.bf16.msra.mxu0 %v4479_v27 }
 0xd51   : > { %4273 = vmatprep.subr.bf16.mxu0 %v4480_v13 }
 0xd54   : > { %4274 = vmatpush3.bf16.msra.mxu0 %v4480_v13 }
 0xd55   : > { %4275 = vmatprep.subr.bf16.mxu0 %v4481_v14 }
 0xd58   : > { %4276 = vmatpush3.bf16.msra.mxu0 %v4481_v14 }
 0xd59   : > { %4277 = vmatprep.subr.bf16.mxu0 %v4482_v16 }
 0xd5c   : > { %4278 = vmatpush3.bf16.msra.mxu0 %v4482_v16 }
 0xd5d   : > { %4279 = vmatprep.subr.bf16.mxu0 %v4483_v61 }
 0xd60   : > { %4280 = vmatpush3.bf16.msra.mxu0 %v4483_v61 }
 0xd61   : > { %4281 = vmatprep.subr.bf16.mxu0 %v4484_v1 }
 0xd64   : > { %4282 = vmatpush3.bf16.msra.mxu0 %v4484_v1 }
 0xe1a   : > { %v4245_v6 = vpop.f32.mrb[52].mxu0 }
 0xe1b   : > { %v2917_v43 = vadd.f32 %v4245_v6, %v3835_v38  ;;  %v2908_v25 = vpop.f32.mrb[53].mxu0 }
 0xe1c   : > { %v4246_v7 = vpop.f32.mrb[54].mxu0  ;;  %v2909_v57 = vadd.f32 %v3835_v38, %v2908_v25 }
 0xe1d   : > { %v5825_v9 = vadd.f32 %v2917_v43, %v5552_v28  ;;  %v2920_v47 = vadd.f32 %v4246_v7, %v3835_v38  ;;  %v2911_v54 = vpop.f32.mrb[55].mxu0 }
 0xe1e   : > { %v2912_v35 = vadd.f32 %v3835_v38, %v2911_v54  ;;  %v5832_v62 = vadd.f32 %v2909_v57, %v5540_v22 }
 0xe1f   : > { %v5828_v53 = vadd.f32 %v2920_v47, %v5555_v15  ;;  %2931 = vadd.xlane.f32.xlu0 %v5825_v9  ;;  %v2941_v15 = vmul.f32 %v5825_v9, %v5825_v9 }
 0xe20   : > { %v5836_v60 = vadd.f32 %v2912_v35, %v5543_v10  ;;  %v2939_v28 = vmul.f32 %v5832_v62, %v5832_v62 }
 0xe21   : > { %2933 = vadd.xlane.f32.xlu1 %v5828_v53  ;;  %v2942_v10 = vmul.f32 %v5828_v53, %v5828_v53 }
 0xe22   : > { %v2940_v22 = vmul.f32 %v5836_v60, %v5836_v60 }
 0xe23   : > { %2927 = vadd.xlane.f32.xlu0 %v5832_v62 }
 0xe25   : > { %2929 = vadd.xlane.f32.xlu1 %v5836_v60 }
 0xe27   : > { %2943 = vadd.xlane.f32.xlu0 %v2939_v28 }
 0xe29   : > { %2945 = vadd.xlane.f32.xlu1 %v2940_v22 }
 0xe2b   : > { %2947 = vadd.xlane.f32.xlu0 %v2941_v15 }
 0xe2d   : > { %2949 = vadd.xlane.f32.xlu1 %v2942_v10 }
 0xeac   : > { %v2932_v59 = vpop.xlane.xlu0 %2931 }
 0xead   : > { %v2937_v56 = vmul.f32 0.03125, %v2932_v59  ;;  %v3862_v59 = vld [vmem:[%s5229_s23 + $0xd] ss:$0 sm:$0xff] }
 0xeae   : > { %v2934_v19 = vpop.xlane.xlu1 %2933 }
 0xeaf   : > { %v2938_v29 = vmul.f32 0.03125, %v2934_v19  ;;  %v2957_v45 = vmul.f32 %v2937_v56, %v2937_v56  ;;  %v2965_v36 = vsub.f32 %v5825_v9, %v2937_v56 }
 0xeb0   : > { %v2928_v63 = vpop.xlane.xlu0 %2927 }
 0xeb1   : > { %v2935_v2 = vmul.f32 0.03125, %v2928_v63  ;;  %v2958_v49 = vmul.f32 %v2938_v29, %v2938_v29  ;;  %v2966_v38 = vsub.f32 %v5828_v53, %v2938_v29 }
 0xeb2   : > { %v2930_v3 = vpop.xlane.xlu1 %2929 }
 0xeb3   : > { %v2936_v8 = vmul.f32 0.03125, %v2930_v3  ;;  %v2955_v4 = vmul.f32 %v2935_v2, %v2935_v2  ;;  %v2963_v5 = vsub.f32 %v5832_v62, %v2935_v2 }
 0xeb4   : > { %v2944_v32 = vpop.xlane.xlu0 %2943 }
 0xeb5   : > { %v2951_v37 = vmul.f32 0.03125, %v2944_v32  ;;  %v2956_v0 = vmul.f32 %v2936_v8, %v2936_v8  ;;  %v2964_v23 = vsub.f32 %v5836_v60, %v2936_v8 }
 0xeb6   : > { %v2946_v50 = vpop.xlane.xlu1 %2945 }
 0xeb7   : > { %v2959_v12 = vsub.f32 %v2951_v37, %v2955_v4  ;;  %v2952_v26 = vmul.f32 0.03125, %v2946_v50 }
 0xeb8   : > { %v2948_v39 = vpop.xlane.xlu0 %2947 }
 0xeb9   : > { %v2967_v41 = vadd.f32 1e-05, %v2959_v12  ;;  %v2960_v58 = vsub.f32 %v2952_v26, %v2956_v0  ;;  %v2953_v20 = vmul.f32 0.03125, %v2948_v39 }
 0xeba   : > { %v2950_v24 = vpop.xlane.xlu1 %2949 }
 0xebb   : > { %4653 = vrsqrt.f32 %v2967_v41  ;;  %v2968_v21 = vadd.f32 1e-05, %v2960_v58  ;;  %v2961_v31 = vsub.f32 %v2953_v20, %v2957_v45  ;;  %v2954_v52 = vmul.f32 0.03125, %v2950_v24 }
 0xebd   : > { %4655 = vrsqrt.f32 %v2968_v21  ;;  %v2969_v48 = vadd.f32 1e-05, %v2961_v31  ;;  %v2962_v33 = vsub.f32 %v2954_v52, %v2958_v49 }
 0xebf   : > { %4657 = vrsqrt.f32 %v2969_v48  ;;  %v2970_v30 = vadd.f32 1e-05, %v2962_v33 }
 0xec1   : > { %4659 = vrsqrt.f32 %v2970_v30 }
 0xec5   : > { %v4654_v46 = vpop.eup %4653 }
 0xec6   : > { %v2975_v17 = vmul.f32 %v4654_v46, %v2963_v5 }
 0xec7   : > { %v4656_v51 = vpop.eup %4655 }
 0xec8   : > { %v2976_v11 = vmul.f32 %v4656_v51, %v2964_v23  ;;  %v2983_v42 = vmul.f32 %v3844_v55, %v2975_v17 }
 0xec9   : > { %v4658_v34 = vpop.eup %4657 }
 0xeca   : > { %v2977_v6 = vmul.f32 %v4658_v34, %v2965_v36  ;;  %v2984_v43 = vmul.f32 %v3844_v55, %v2976_v11  ;;  %v2991_v57 = vadd.f32 %v3845_v18, %v2983_v42 }
 0xecb   : > { %v4660_v25 = vpop.eup %4659 }
 0xecc   : > { %v2978_v7 = vmul.f32 %v4660_v25, %v2966_v38  ;;  %v2992_v47 = vadd.f32 %v3845_v18, %v2984_v43  ;;  %v2985_v54 = vmul.f32 %v3844_v55, %v2977_v6 }
 0xece   : > { %v2995_v35 = vpack.c.bf16 %v2992_v47, %v2991_v57  ;;  %v2986_v28 = vmul.f32 %v3844_v55, %v2978_v7  ;;  %v2993_v22 = vadd.f32 %v3845_v18, %v2985_v54 }
 0xed0   : > { %4263 = vmatprep.mubr.bf16.mxu1 %v2995_v35  ;;  %v2994_v15 = vadd.f32 %v3845_v18, %v2986_v28  ;;  %v3887_v35 = vld [vmem:[%s5229_s23 + $0xe] ss:$0 sm:$0xff] }
 0xed2   : > { %v2996_v10 = vpack.c.bf16 %v2994_v15, %v2993_v22 }
 0xed4   : > { %4264 = vmatmul.mubr.bf16.vlgmr.msra.gmra.mrb[48].mxu1 %v2996_v10 }
 0xfa7   : > { %v4265_v19 = vpop.f32.mrb[48].mxu1 }
 0xfa8   : > { %v3109_v63 = vadd.f32 %v4265_v19, %v3862_v59  ;;  %v3100_v2 = vpop.f32.mrb[49].mxu1  ;;  %v4486_v19 = vld [vmem:[%s5959_s8 + $0x8] sm:$0xff]  }
 0xfa9   : > { %v3101_v3 = vadd.f32 %v3862_v59, %v3100_v2  ;;  %v4266_v8 = vpop.f32.mrb[50].mxu1  ;;  %v4488_v2 = vld [vmem:[%s5959_s8 + $0x18] sm:$0xff]  }
 0xfaa   : > { %v3121_v32 = vmul.f32 0.044715, %v3109_v63  ;;  %v3112_v56 = vadd.f32 %v4266_v8, %v3862_v59  ;;  %v3103_v4 = vpop.f32.mrb[51].mxu1  ;;  %v3117_v11 = vmul.f32 0.5, %v3109_v63  ;;  %v4490_v8 = vld [vmem:[%s5959_s8 + $0x28] sm:$0xff]  }
 0xfab   : > { %v3119_v37 = vmul.f32 0.044715, %v3101_v3  ;;  %v3104_v29 = vadd.f32 %v3862_v59, %v3103_v4  ;;  %v3115_v18 = vmul.f32 0.5, %v3101_v3  ;;  %v4485_v59 = vld [vmem:[%s5959_s8] sm:$0xff]  }
 0xfac   : > { %v3125_v50 = vmul.f32 %v3121_v32, %v3109_v63  ;;  %v3122_v0 = vmul.f32 0.044715, %v3112_v56  ;;  %v3118_v42 = vmul.f32 0.5, %v3112_v56  ;;  %4287 = vmatprep.subr.bf16.mxu1 %v4485_v59  ;;  %v4491_v32 = vld [vmem:[%s5959_s8 + $0x30] sm:$0xff]  }
 0xfad   : > { %v3123_v12 = vmul.f32 %v3119_v37, %v3101_v3  ;;  %v3120_v26 = vmul.f32 0.044715, %v3104_v29  ;;  %v3116_v38 = vmul.f32 0.5, %v3104_v29  ;;  %4288 = vmatpush3.bf16.msra.mxu1 %v4485_v59 }
 0xfae   : > { %v3129_v39 = vmul.f32 %v3125_v50, %v3109_v63  ;;  %v3126_v45 = vmul.f32 %v3122_v0, %v3112_v56  ;;  %4289 = vmatprep.subr.bf16.mxu1 %v4486_v19 }
 0xfaf   : > { %v3127_v41 = vmul.f32 %v3123_v12, %v3101_v3  ;;  %v3124_v58 = vmul.f32 %v3120_v26, %v3104_v29 }
 0xfb0   : > { %v3133_v20 = vadd.f32 %v3129_v39, %v3109_v63  ;;  %v3130_v49 = vmul.f32 %v3126_v45, %v3112_v56  ;;  %v4487_v63 = vld [vmem:[%s5959_s8 + $0x10] sm:$0xff]  }
 0xfb1   : > { %v3128_v24 = vmul.f32 %v3124_v58, %v3104_v29  ;;  %v3131_v21 = vadd.f32 %v3127_v41, %v3101_v3  ;;  %4290 = vmatpush3.bf16.msra.mxu1 %v4486_v19  ;;  %v4489_v3 = vld [vmem:[%s5959_s8 + $0x20] sm:$0xff]  }
 0xfb2   : > { %v3137_v31 = vmul.f32 0.7978846, %v3133_v20  ;;  %v3134_v52 = vadd.f32 %v3130_v49, %v3112_v56  ;;  %4291 = vmatprep.subr.bf16.mxu1 %v4487_v63  ;;  %v4492_v56 = vld [vmem:[%s5959_s8 + $0x38] sm:$0xff]  }
 0xfb3   : > { %v3132_v48 = vadd.f32 %v3128_v24, %v3104_v29  ;;  %v3135_v33 = vmul.f32 0.7978846, %v3131_v21 }
 0xfb4   : > { %4661 = vtanh.f32 %v3137_v31  ;;  %v3138_v30 = vmul.f32 0.7978846, %v3134_v52 }
 0xfb5   : > { %v3136_v5 = vmul.f32 0.7978846, %v3132_v48  ;;  %4663 = vtanh.f32 %v3135_v33  ;;  %4292 = vmatpush3.bf16.msra.mxu1 %v4487_v63 }
 0xfb6   : > { %4665 = vtanh.f32 %v3138_v30  ;;  %4293 = vmatprep.subr.bf16.mxu1 %v4488_v2 }
 0xfb7   : > { %4667 = vtanh.f32 %v3136_v5 }
 0xfb9   : > { %4294 = vmatpush3.bf16.msra.mxu1 %v4488_v2 }
 0xfba   : > { %4295 = vmatprep.subr.bf16.mxu1 %v4489_v3 }
 0xfbd   : > { %4296 = vmatpush3.bf16.msra.mxu1 %v4489_v3 }
 0xfbe   : > { %v4662_v46 = vpop.eup %4661  ;;  %4297 = vmatprep.subr.bf16.mxu1 %v4490_v8 }
 0xfbf   : > { %v4664_v55 = vpop.eup %4663  ;;  %v3145_v23 = vadd.f32 1.0, %v4662_v46 }
 0xfc0   : > { %v4666_v17 = vpop.eup %4665  ;;  %v3143_v51 = vadd.f32 1.0, %v4664_v55 }
 0xfc1   : > { %v4668_v36 = vpop.eup %4667  ;;  %v3146_v34 = vadd.f32 1.0, %v4666_v17  ;;  %v3149_v43 = vmul.f32 %v3145_v23, %v3117_v11  ;;  %4298 = vmatpush3.bf16.msra.mxu1 %v4490_v8 }
 0xfc2   : > { %v3144_v6 = vadd.f32 1.0, %v4668_v36  ;;  %v3147_v7 = vmul.f32 %v3143_v51, %v3115_v18  ;;  %4299 = vmatprep.subr.bf16.mxu1 %v4491_v32  ;;  %v3896_v18 = vld [vmem:[%s5960_s9] ss:$0 sm:$0xff] }
 0xfc3   : > { %v3150_v25 = vmul.f32 %v3146_v34, %v3118_v42 }
 0xfc4   : > { %v3148_v57 = vmul.f32 %v3144_v6, %v3116_v38 }
 0xfc5   : > { %v3152_v47 = vpack.c.bf16 %v3150_v25, %v3149_v43  ;;  %4300 = vmatpush3.bf16.msra.mxu1 %v4491_v32 }
 0xfc6   : > { %v3151_v54 = vpack.c.bf16 %v3148_v57, %v3147_v7  ;;  %4301 = vmatprep.subr.bf16.mxu1 %v4492_v56 }
 0xfc8   : > { %4283 = vmatprep.mubr.bf16.mxu0 %v3151_v54  ;;  %v3897_v54 = vld [vmem:[%s5960_s9 + $0x1] ss:$0 sm:$0xff] }
 0xfc9   : > { %4284 = vmatmul.mubr.bf16.vlgmr.msra.gmra.mrb[56].mxu0 %v3152_v47  ;;  %4302 = vmatpush3.bf16.msra.mxu1 %v4492_v56 }
0x109c   : > { %v4285_v28 = vpop.f32.mrb[56].mxu0 }
0x109d   : > { %v3265_v22 = vadd.f32 %v4285_v28, %v3887_v35  ;;  %v3256_v15 = vpop.f32.mrb[57].mxu0 }
0x109e   : > { %v4286_v10 = vpop.f32.mrb[58].mxu0  ;;  %v3257_v44 = vadd.f32 %v3887_v35, %v3256_v15 }
0x109f   : > { %v5873_v40 = vadd.f32 %v3265_v22, %v5825_v9  ;;  %v3268_v27 = vadd.f32 %v4286_v10, %v3887_v35  ;;  %v3259_v13 = vpop.f32.mrb[59].mxu0 }
0x10a0   : > { %v3260_v16 = vadd.f32 %v3887_v35, %v3259_v13  ;;  %v5880_v61 = vadd.f32 %v3257_v44, %v5832_v62 }
0x10a1   : > { %v5876_v14 = vadd.f32 %v3268_v27, %v5828_v53  ;;  %3279 = vadd.xlane.f32.xlu0 %v5873_v40  ;;  %v3289_v62 = vmul.f32 %v5873_v40, %v5873_v40 }
0x10a2   : > { %v5884_v1 = vadd.f32 %v3260_v16, %v5836_v60  ;;  %v3287_v9 = vmul.f32 %v5880_v61, %v5880_v61 }
0x10a3   : > { %3281 = vadd.xlane.f32.xlu1 %v5876_v14  ;;  %v3290_v60 = vmul.f32 %v5876_v14, %v5876_v14 }
0x10a4   : > { %v3288_v53 = vmul.f32 %v5884_v1, %v5884_v1 }
0x10a5   : > { %3275 = vadd.xlane.f32.xlu0 %v5880_v61 }
0x10a7   : > { %3277 = vadd.xlane.f32.xlu1 %v5884_v1 }
0x10a9   : > { %3291 = vadd.xlane.f32.xlu0 %v3287_v9 }
0x10ab   : > { %3293 = vadd.xlane.f32.xlu1 %v3288_v53  ;;  %v3898_v53 = vld [vmem:[%s5960_s9 + $0x2] ss:$0 sm:$0xff] }
0x10ad   : > { %3295 = vadd.xlane.f32.xlu0 %v3289_v62 }
0x10af   : > { %3297 = vadd.xlane.f32.xlu1 %v3290_v60 }
0x112e   : > { %v3280_v4 = vpop.xlane.xlu0 %3279 }
0x112f   : > { %v3285_v39 = vmul.f32 0.03125, %v3280_v4 }
0x1130   : > { %v3282_v37 = vpop.xlane.xlu1 %3281 }
0x1131   : > { %v3286_v58 = vmul.f32 0.03125, %v3282_v37  ;;  %v3305_v52 = vmul.f32 %v3285_v39, %v3285_v39  ;;  %v3313_v25 = vsub.f32 %v5873_v40, %v3285_v39 }
0x1132   : > { %v3276_v29 = vpop.xlane.xlu0 %3275 }
0x1133   : > { %v3283_v50 = vmul.f32 0.03125, %v3276_v29  ;;  %v3306_v5 = vmul.f32 %v3286_v58, %v3286_v58  ;;  %v3314_v35 = vsub.f32 %v5876_v14, %v3286_v58 }
0x1134   : > { %v3278_v0 = vpop.xlane.xlu1 %3277 }
0x1135   : > { %v3284_v12 = vmul.f32 0.03125, %v3278_v0  ;;  %v3303_v45 = vmul.f32 %v3283_v50, %v3283_v50  ;;  %v3311_v42 = vsub.f32 %v5880_v61, %v3283_v50 }
0x1136   : > { %v3292_v26 = vpop.xlane.xlu0 %3291 }
0x1137   : > { %v3299_v41 = vmul.f32 0.03125, %v3292_v26  ;;  %v3304_v49 = vmul.f32 %v3284_v12, %v3284_v12  ;;  %v3312_v38 = vsub.f32 %v5884_v1, %v3284_v12 }
0x1138   : > { %v3294_v20 = vpop.xlane.xlu1 %3293 }
0x1139   : > { %v3307_v24 = vsub.f32 %v3299_v41, %v3303_v45  ;;  %v3300_v21 = vmul.f32 0.03125, %v3294_v20 }
0x113a   : > { %v3296_v31 = vpop.xlane.xlu0 %3295 }
0x113b   : > { %v3315_v48 = vadd.f32 1e-05, %v3307_v24  ;;  %v3308_v33 = vsub.f32 %v3300_v21, %v3304_v49  ;;  %v3301_v30 = vmul.f32 0.03125, %v3296_v31 }
0x113c   : > { %v3298_v46 = vpop.xlane.xlu1 %3297 }
0x113d   : > { %4669 = vrsqrt.f32 %v3315_v48  ;;  %v3316_v55 = vadd.f32 1e-05, %v3308_v33  ;;  %v3309_v23 = vsub.f32 %v3301_v30, %v3305_v52  ;;  %v3302_v17 = vmul.f32 0.03125, %v3298_v46 }
0x113f   : > { %4671 = vrsqrt.f32 %v3316_v55  ;;  %v3317_v51 = vadd.f32 1e-05, %v3309_v23  ;;  %v3310_v36 = vsub.f32 %v3302_v17, %v3306_v5 }
0x1141   : > { %4673 = vrsqrt.f32 %v3317_v51  ;;  %v3318_v11 = vadd.f32 1e-05, %v3310_v36 }
0x1143   : > { %4675 = vrsqrt.f32 %v3318_v11 }
0x1147   : > { %v4670_v34 = vpop.eup %4669 }
0x1148   : > { %v3323_v6 = vmul.f32 %v4670_v34, %v3311_v42 }
0x1149   : > { %v4672_v43 = vpop.eup %4671 }
0x114a   : > { %v3324_v7 = vmul.f32 %v4672_v43, %v3312_v38  ;;  %v3331_v57 = vmul.f32 %v3896_v18, %v3323_v6 }
0x114b   : > { %v4674_v47 = vpop.eup %4673 }
0x114c   : > { %v3332_v28 = vmul.f32 %v3896_v18, %v3324_v7  ;;  %v3325_v22 = vmul.f32 %v4674_v47, %v3313_v25  ;;  %v3339_v10 = vadd.f32 %v3897_v54, %v3331_v57 }
0x114d   : > { %v4676_v15 = vpop.eup %4675 }
0x114e   : > { %v3340_v44 = vadd.f32 %v3897_v54, %v3332_v28  ;;  %v3326_v27 = vmul.f32 %v4676_v15, %v3314_v35  ;;  %v3333_v13 = vmul.f32 %v3896_v18, %v3325_v22 }
0x1150   : > { %v3343_v16 = vpack.c.bf16 %v3340_v44, %v3339_v10  ;;  %v3334_v61 = vmul.f32 %v3896_v18, %v3326_v27  ;;  %v3341_v40 = vadd.f32 %v3897_v54, %v3333_v13 }
0x1152   : > { %4303 = vmatprep.mubr.bf16.mxu1 %v3343_v16  ;;  %v3342_v1 = vadd.f32 %v3897_v54, %v3334_v61 }
0x1154   : > { %v3344_v9 = vpack.c.bf16 %v3342_v1, %v3341_v40 }
0x1156   : > { %4304 = vmatmul.mubr.bf16.vlgmr.msra.gmra.mrb[52].mxu1 %v3344_v9 }
0x1229   : > { %v4305_v14 = vpop.f32.mrb[52].mxu1 }
0x122a   : > { %v3456_v62 = vadd.f32 %v4305_v14, %v3898_v53  ;;  %v3447_v60 = vpop.f32.mrb[53].mxu1 }
0x122b   : > { %v3448_v59 = vadd.f32 %v3898_v53, %v3447_v60  ;;  %v4306_v19 = vpop.f32.mrb[54].mxu1 }
0x122c   : > { %3464 = vst [vmem:[%s591_s11 + $0x10] sm:$0xff] %v3456_v62  ;;  %v3459_v63 = vadd.f32 %v4306_v19, %v3898_v53  ;;  %v3450_v2 = vpop.f32.mrb[55].mxu1 }
0x122d   : > { %3462 = vst [vmem:[%s591_s11] sm:$0xff] %v3448_v59  ;;  %v3451_v3 = vadd.f32 %v3898_v53, %v3450_v2 }
0x122e   : > { %3465 = vst [vmem:[%s591_s11 + $0x18] sm:$0xff] %v3459_v63 }
0x122f   : > { %3463 = vst [vmem:[%s591_s11 + $0x8] sm:$0xff] %v3451_v3 }
0x1230 PF: > { %s5979_s16 = sld [smem:[#allocation13_spill]]  ;;  %s5980_s18 = sld [smem:[#allocation12_spill]] }
0x1231   : > { %s5981_s15 = sld [smem:[#allocation14_spill]]  ;;  %s5982_s13 = smov %s4851_s14 }
0x1236   : > { %p26_p5 = scmp.ge.s32.totalorder %s5979_s16, 5   ;;  %s5983_s14 = smov %s5980_s18 }
0x1238   :  { %28 = sbr.rel (!%p26_p5) target bundleno = 10 (0xa), region = 155 }
0x123f   :  { %3487 = vsyncpa [#allocation3], 1 }
0x1240   :  { %3489 = vsyncpa [#allocation3 + $0x1], 1 }
0x1241   :  { %3490 = vsyncpa [#allocation5], 1 }
0x1242   :  { %3492 = vsyncpa [#allocation5 + $0x1], 1 }
0x1243   :  { %3493 = vsyncpa [#allocation8], 1 }
0x1244   :  { %3495 = vsyncpa [#allocation8 + $0x1], 1 }

</bundles_post_ra>
